<compile_context>
chip_gen: v6e
topology: v6e:2x2x1
jax: 0.10.0
libtpu: 0.0.40
codegen_flags: <defaults>
</compile_context>

<pallas_src>
import numpy as np
import jax
import jax.numpy as jnp
from jax import lax
from jax.experimental import pallas as pl
from jax.experimental.pallas import tpu as pltpu


def _make_resblock_kernel(C, H, W):
    HW = H * W
    TAPS = tuple((dh, dw) for dh in range(3) for dw in range(3))

    def kernel(x_ref, w1_ref, b1_ref, w2_ref, b2_ref, o_ref, xpad_s, mid_s):
        # Zero the padded scratches (small; re-done each step so the kernel is
        # safe when the batch axis is sharded across TensorCores).
        xpad_s[...] = jnp.zeros_like(xpad_s)
        mid_s[...] = jnp.zeros_like(mid_s)

        x = x_ref[0].astype(jnp.float32)                  # (H, W, C) NHWC
        xpad_s[1:H + 1, 1:W + 1, :] = x                   # interior; halo stays 0

        # ---- conv1 (BN1 scale folded into weights) -> +bias -> ReLU ----
        acc = jnp.zeros((HW, C), jnp.float32)
        for t, (dh, dw) in enumerate(TAPS):
            slab = xpad_s[dh:dh + H, dw:dw + W, :].reshape(HW, C)
            acc += jnp.dot(slab, w1_ref[t], preferred_element_type=jnp.float32)
        y1 = jnp.maximum(acc + b1_ref[...], 0.0)          # (HW, C)
        mid_s[1:H + 1, 1:W + 1, :] = y1.reshape(H, W, C)

        # ---- conv2 (BN2 scale folded) -> +bias -> +residual -> ReLU ----
        acc2 = jnp.zeros((HW, C), jnp.float32)
        for t, (dh, dw) in enumerate(TAPS):
            slab = mid_s[dh:dh + H, dw:dw + W, :].reshape(HW, C)
            acc2 += jnp.dot(slab, w2_ref[t], preferred_element_type=jnp.float32)
        out = jnp.maximum(acc2 + b2_ref[...] + x.reshape(HW, C), 0.0)
        o_ref[0] = out.reshape(H, W, C).astype(o_ref.dtype)

    return kernel


def residual_block(x, w1, bn1_scale, bn1_bias, w2, bn2_scale, bn2_bias):
    """x: (N, C, H, W) f32; w*: (C, C, 3, 3); bn*_scale/bias: (C,). Returns NCHW."""
    N, C, H, W = x.shape

    # Layout plumbing: NCHW -> NHWC so channels sit on the lane axis in-kernel.
    x_nhwc = jnp.transpose(x, (0, 2, 3, 1))

    # Fold BN scale into conv weights; reorder to (tap, C_in, C_out) for the MXU.
    w1f = (w1 * bn1_scale[:, None, None, None]).astype(jnp.float32)
    w2f = (w2 * bn2_scale[:, None, None, None]).astype(jnp.float32)
    w1_taps = jnp.transpose(w1f, (2, 3, 1, 0)).reshape(9, C, C)   # (kh*kw, Cin, Cout)
    w2_taps = jnp.transpose(w2f, (2, 3, 1, 0)).reshape(9, C, C)
    b1 = bn1_bias.astype(jnp.float32).reshape(1, C)
    b2 = bn2_bias.astype(jnp.float32).reshape(1, C)

    kernel = _make_resblock_kernel(C, H, W)

    out_nhwc = pl.pallas_call(
        kernel,
        out_shape=jax.ShapeDtypeStruct((N, H, W, C), x.dtype),
        grid_spec=pltpu.PrefetchScalarGridSpec(
            num_scalar_prefetch=0,
            grid=(N,),                                            # one image per grid step
            in_specs=[
                pl.BlockSpec((1, H, W, C), lambda n: (n, 0, 0, 0)),   # x (also residual)
                pl.BlockSpec((9, C, C), lambda n: (0, 0, 0)),         # conv1 weights (VMEM)
                pl.BlockSpec((1, C), lambda n: (0, 0)),               # bn1 bias
                pl.BlockSpec((9, C, C), lambda n: (0, 0, 0)),         # conv2 weights (VMEM)
                pl.BlockSpec((1, C), lambda n: (0, 0)),               # bn2 bias
            ],
            out_specs=pl.BlockSpec((1, H, W, C), lambda n: (n, 0, 0, 0)),
            scratch_shapes=[
                pltpu.VMEM((H + 2, W + 2, C), jnp.float32),   # zero-padded input
                pltpu.VMEM((H + 2, W + 2, C), jnp.float32),   # zero-padded conv1 output
            ],
        ),
        compiler_params=pltpu.CompilerParams(dimension_semantics=("parallel",)),
    )(x_nhwc, w1_taps, b1, w2_taps, b2)

    return jnp.transpose(out_nhwc, (0, 3, 1, 2))                  # NHWC -> NCHW


def ref_residual_block(x, w1, s1, b1, w2, s2, b2):
    """Pure-JAX reference (PyTorch semantics, BN folded to scale/bias)."""
    dn = ('NCHW', 'OIHW', 'NCHW')
    y = lax.conv_general_dilated(x, w1, (1, 1), 'SAME', dimension_numbers=dn)
    y = y * s1[None, :, None, None] + b1[None, :, None, None]
    y = jnp.maximum(y, 0.0)
    y = lax.conv_general_dilated(y, w2, (1, 1), 'SAME', dimension_numbers=dn)
    y = y * s2[None, :, None, None] + b2[None, :, None, None]
    return jnp.maximum(y + x, 0.0)


if __name__ == "__main__":
    N, C, H, W = 2, 4, 16, 16
    key = jax.random.PRNGKey(0)
    ks = jax.random.split(key, 12)

    x = jax.random.normal(ks[0], (N, C, H, W), jnp.float32)
    # conv3x3 weights: (out_channels, in_channels, 3, 3), bias=False
    w1 = jax.random.normal(ks[1], (C, C, 3, 3), jnp.float32) * 0.2
    w2 = jax.random.normal(ks[2], (C, C, 3, 3), jnp.float32) * 0.2

    # BatchNorm2d parameters (inference mode), folded to per-channel scale/bias.
    eps = 1e-5
    g1 = jax.random.uniform(ks[3], (C,), jnp.float32, 0.5, 1.5)
    be1 = jax.random.normal(ks[4], (C,), jnp.float32) * 0.1
    m1 = jax.random.normal(ks[5], (C,), jnp.float32) * 0.1
    v1 = jax.random.uniform(ks[6], (C,), jnp.float32, 0.5, 1.5)
    g2 = jax.random.uniform(ks[7], (C,), jnp.float32, 0.5, 1.5)
    be2 = jax.random.normal(ks[8], (C,), jnp.float32) * 0.1
    m2 = jax.random.normal(ks[9], (C,), jnp.float32) * 0.1
    v2 = jax.random.uniform(ks[10], (C,), jnp.float32, 0.5, 1.5)

    s1 = g1 / jnp.sqrt(v1 + eps)
    b1 = be1 - m1 * s1
    s2 = g2 / jnp.sqrt(v2 + eps)
    b2 = be2 - m2 * s2

    out = jax.block_until_ready(residual_block(x, w1, s1, b1, w2, s2, b2))
    ref = jax.block_until_ready(ref_residual_block(x, w1, s1, b1, w2, s2, b2))

    assert out.shape == (N, C, H, W) and out.dtype == jnp.float32
    np.testing.assert_allclose(np.asarray(out), np.asarray(ref), atol=1e-4, rtol=1e-4)
    print("KERNEL_OK")
</pallas_src>

<mosaic_0001>
module attributes {stable_mosaic.version = 11 : i64} {
  func.func @kernel(%arg0: i32, %arg1: memref<1x16x16x4xf32, #tpu.memory_space<vmem>>, %arg2: memref<9x4x4xf32, #tpu.memory_space<vmem>>, %arg3: memref<1x4xf32, #tpu.memory_space<vmem>>, %arg4: memref<9x4x4xf32, #tpu.memory_space<vmem>>, %arg5: memref<1x4xf32, #tpu.memory_space<vmem>>, %arg6: memref<1x16x16x4xf32, #tpu.memory_space<vmem>>, %arg7: memref<18x18x4xf32, #tpu.memory_space<vmem>>, %arg8: memref<18x18x4xf32, #tpu.memory_space<vmem>>) attributes {dimension_semantics = [#tpu.dimension_semantics<parallel>], iteration_bounds = array<i64: 2>, scalar_prefetch = 0 : i64, scratch_operands = 2 : i64, tpu.core_type = #tpu.core_type<tc>, window_params = [{transform_indices = @transform_0, window_bounds = array<i64: 1, 16, 16, 4>}, {pipeline_mode = #tpu.pipeline_mode<synchronous>, transform_indices = @transform_1, window_bounds = array<i64: 9, 4, 4>}, {pipeline_mode = #tpu.pipeline_mode<synchronous>, transform_indices = @transform_2, window_bounds = array<i64: 1, 4>}, {pipeline_mode = #tpu.pipeline_mode<synchronous>, transform_indices = @transform_3, window_bounds = array<i64: 9, 4, 4>}, {pipeline_mode = #tpu.pipeline_mode<synchronous>, transform_indices = @transform_4, window_bounds = array<i64: 1, 4>}, {transform_indices = @transform_5, window_bounds = array<i64: 1, 16, 16, 4>}]} {
    %cst = arith.constant 0.000000e+00 : f32
    %0 = vector.broadcast %cst : f32 to vector<18x18x4xf32>
    %c0 = arith.constant 0 : index
    %c0_0 = arith.constant 0 : index
    %c0_1 = arith.constant 0 : index
    %1 = vector.load %arg7[%c0, %c0_0, %c0_1] : memref<18x18x4xf32, #tpu.memory_space<vmem>>, vector<18x18x4xf32>
    tpu.vector_store %arg7[%c0, %c0_0, %c0_1], %0 {strides = array<i32>} : memref<18x18x4xf32, #tpu.memory_space<vmem>>, vector<18x18x4xf32>,
    %cst_2 = arith.constant 0.000000e+00 : f32
    %2 = vector.broadcast %cst_2 : f32 to vector<18x18x4xf32>
    %c0_3 = arith.constant 0 : index
    %c0_4 = arith.constant 0 : index
    %c0_5 = arith.constant 0 : index
    %3 = vector.load %arg8[%c0_3, %c0_4, %c0_5] : memref<18x18x4xf32, #tpu.memory_space<vmem>>, vector<18x18x4xf32>
    tpu.vector_store %arg8[%c0_3, %c0_4, %c0_5], %2 {strides = array<i32>} : memref<18x18x4xf32, #tpu.memory_space<vmem>>, vector<18x18x4xf32>,
    %c0_6 = arith.constant 0 : index
    %c0_7 = arith.constant 0 : index
    %c0_8 = arith.constant 0 : index
    %c0_9 = arith.constant 0 : index
    %4 = vector.load %arg1[%c0_6, %c0_7, %c0_8, %c0_9] : memref<1x16x16x4xf32, #tpu.memory_space<vmem>>, vector<1x16x16x4xf32>
    %5 = vector.shape_cast %4 : vector<1x16x16x4xf32> to vector<16x16x4xf32>
    %c1 = arith.constant 1 : index
    %c1_10 = arith.constant 1 : index
    %c0_11 = arith.constant 0 : index
    %6 = vector.load %arg7[%c1, %c1_10, %c0_11] : memref<18x18x4xf32, #tpu.memory_space<vmem>>, vector<16x16x4xf32>
    tpu.vector_store %arg7[%c1, %c1_10, %c0_11], %5 {strides = array<i32>} : memref<18x18x4xf32, #tpu.memory_space<vmem>>, vector<16x16x4xf32>,
    %cst_12 = arith.constant 0.000000e+00 : f32
    %7 = vector.broadcast %cst_12 : f32 to vector<256x4xf32>
    %c0_13 = arith.constant 0 : index
    %c0_14 = arith.constant 0 : index
    %c0_15 = arith.constant 0 : index
    %8 = vector.load %arg7[%c0_13, %c0_14, %c0_15] : memref<18x18x4xf32, #tpu.memory_space<vmem>>, vector<16x16x4xf32>
    %9 = vector.shape_cast %8 : vector<16x16x4xf32> to vector<256x4xf32>
    %c0_16 = arith.constant 0 : index
    %c0_17 = arith.constant 0 : index
    %c0_18 = arith.constant 0 : index
    %10 = vector.load %arg2[%c0_16, %c0_17, %c0_18] : memref<9x4x4xf32, #tpu.memory_space<vmem>>, vector<1x4x4xf32>
    %11 = vector.shape_cast %10 : vector<1x4x4xf32> to vector<4x4xf32>
    %cst_19 = arith.constant dense<0.000000e+00> : vector<256x4xf32>
    %12 = tpu.matmul %9, %11, %cst_19 {dimension_numbers = #tpu.dot_dimension_numbers<[1], [0], [0], [1], [0, 0, 1, 1], [], []>} : vector<256x4xf32>, vector<4x4xf32>, vector<256x4xf32> -> vector<256x4xf32>
    %13 = arith.addf %7, %12 : vector<256x4xf32>
    %c0_20 = arith.constant 0 : index
    %c1_21 = arith.constant 1 : index
    %c0_22 = arith.constant 0 : index
    %14 = vector.load %arg7[%c0_20, %c1_21, %c0_22] : memref<18x18x4xf32, #tpu.memory_space<vmem>>, vector<16x16x4xf32>
    %15 = vector.shape_cast %14 : vector<16x16x4xf32> to vector<256x4xf32>
    %c1_23 = arith.constant 1 : index
    %c0_24 = arith.constant 0 : index
    %c0_25 = arith.constant 0 : index
    %16 = vector.load %arg2[%c1_23, %c0_24, %c0_25] : memref<9x4x4xf32, #tpu.memory_space<vmem>>, vector<1x4x4xf32>
    %17 = vector.shape_cast %16 : vector<1x4x4xf32> to vector<4x4xf32>
    %cst_26 = arith.constant dense<0.000000e+00> : vector<256x4xf32>
    %18 = tpu.matmul %15, %17, %cst_26 {dimension_numbers = #tpu.dot_dimension_numbers<[1], [0], [0], [1], [0, 0, 1, 1], [], []>} : vector<256x4xf32>, vector<4x4xf32>, vector<256x4xf32> -> vector<256x4xf32>
    %19 = arith.addf %13, %18 : vector<256x4xf32>
    %c0_27 = arith.constant 0 : index
    %c2 = arith.constant 2 : index
    %c0_28 = arith.constant 0 : index
    %20 = vector.load %arg7[%c0_27, %c2, %c0_28] : memref<18x18x4xf32, #tpu.memory_space<vmem>>, vector<16x16x4xf32>
    %21 = vector.shape_cast %20 : vector<16x16x4xf32> to vector<256x4xf32>
    %c2_29 = arith.constant 2 : index
    %c0_30 = arith.constant 0 : index
    %c0_31 = arith.constant 0 : index
    %22 = vector.load %arg2[%c2_29, %c0_30, %c0_31] : memref<9x4x4xf32, #tpu.memory_space<vmem>>, vector<1x4x4xf32>
    %23 = vector.shape_cast %22 : vector<1x4x4xf32> to vector<4x4xf32>
    %cst_32 = arith.constant dense<0.000000e+00> : vector<256x4xf32>
    %24 = tpu.matmul %21, %23, %cst_32 {dimension_numbers = #tpu.dot_dimension_numbers<[1], [0], [0], [1], [0, 0, 1, 1], [], []>} : vector<256x4xf32>, vector<4x4xf32>, vector<256x4xf32> -> vector<256x4xf32>
    %25 = arith.addf %19, %24 : vector<256x4xf32>
    %c1_33 = arith.constant 1 : index
    %c0_34 = arith.constant 0 : index
    %c0_35 = arith.constant 0 : index
    %26 = vector.load %arg7[%c1_33, %c0_34, %c0_35] : memref<18x18x4xf32, #tpu.memory_space<vmem>>, vector<16x16x4xf32>
    %27 = vector.shape_cast %26 : vector<16x16x4xf32> to vector<256x4xf32>
    %c3 = arith.constant 3 : index
    %c0_36 = arith.constant 0 : index
    %c0_37 = arith.constant 0 : index
    %28 = vector.load %arg2[%c3, %c0_36, %c0_37] : memref<9x4x4xf32, #tpu.memory_space<vmem>>, vector<1x4x4xf32>
    %29 = vector.shape_cast %28 : vector<1x4x4xf32> to vector<4x4xf32>
    %cst_38 = arith.constant dense<0.000000e+00> : vector<256x4xf32>
    %30 = tpu.matmul %27, %29, %cst_38 {dimension_numbers = #tpu.dot_dimension_numbers<[1], [0], [0], [1], [0, 0, 1, 1], [], []>} : vector<256x4xf32>, vector<4x4xf32>, vector<256x4xf32> -> vector<256x4xf32>
    %31 = arith.addf %25, %30 : vector<256x4xf32>
    %c1_39 = arith.constant 1 : index
    %c1_40 = arith.constant 1 : index
    %c0_41 = arith.constant 0 : index
    %32 = vector.load %arg7[%c1_39, %c1_40, %c0_41] : memref<18x18x4xf32, #tpu.memory_space<vmem>>, vector<16x16x4xf32>
    %33 = vector.shape_cast %32 : vector<16x16x4xf32> to vector<256x4xf32>
    %c4 = arith.constant 4 : index
    %c0_42 = arith.constant 0 : index
    %c0_43 = arith.constant 0 : index
    %34 = vector.load %arg2[%c4, %c0_42, %c0_43] : memref<9x4x4xf32, #tpu.memory_space<vmem>>, vector<1x4x4xf32>
    %35 = vector.shape_cast %34 : vector<1x4x4xf32> to vector<4x4xf32>
    %cst_44 = arith.constant dense<0.000000e+00> : vector<256x4xf32>
    %36 = tpu.matmul %33, %35, %cst_44 {dimension_numbers = #tpu.dot_dimension_numbers<[1], [0], [0], [1], [0, 0, 1, 1], [], []>} : vector<256x4xf32>, vector<4x4xf32>, vector<256x4xf32> -> vector<256x4xf32>
    %37 = arith.addf %31, %36 : vector<256x4xf32>
    %c1_45 = arith.constant 1 : index
    %c2_46 = arith.constant 2 : index
    %c0_47 = arith.constant 0 : index
    %38 = vector.load %arg7[%c1_45, %c2_46, %c0_47] : memref<18x18x4xf32, #tpu.memory_space<vmem>>, vector<16x16x4xf32>
    %39 = vector.shape_cast %38 : vector<16x16x4xf32> to vector<256x4xf32>
    %c5 = arith.constant 5 : index
    %c0_48 = arith.constant 0 : index
    %c0_49 = arith.constant 0 : index
    %40 = vector.load %arg2[%c5, %c0_48, %c0_49] : memref<9x4x4xf32, #tpu.memory_space<vmem>>, vector<1x4x4xf32>
    %41 = vector.shape_cast %40 : vector<1x4x4xf32> to vector<4x4xf32>
    %cst_50 = arith.constant dense<0.000000e+00> : vector<256x4xf32>
    %42 = tpu.matmul %39, %41, %cst_50 {dimension_numbers = #tpu.dot_dimension_numbers<[1], [0], [0], [1], [0, 0, 1, 1], [], []>} : vector<256x4xf32>, vector<4x4xf32>, vector<256x4xf32> -> vector<256x4xf32>
    %43 = arith.addf %37, %42 : vector<256x4xf32>
    %c2_51 = arith.constant 2 : index
    %c0_52 = arith.constant 0 : index
    %c0_53 = arith.constant 0 : index
    %44 = vector.load %arg7[%c2_51, %c0_52, %c0_53] : memref<18x18x4xf32, #tpu.memory_space<vmem>>, vector<16x16x4xf32>
    %45 = vector.shape_cast %44 : vector<16x16x4xf32> to vector<256x4xf32>
    %c6 = arith.constant 6 : index
    %c0_54 = arith.constant 0 : index
    %c0_55 = arith.constant 0 : index
    %46 = vector.load %arg2[%c6, %c0_54, %c0_55] : memref<9x4x4xf32, #tpu.memory_space<vmem>>, vector<1x4x4xf32>
    %47 = vector.shape_cast %46 : vector<1x4x4xf32> to vector<4x4xf32>
    %cst_56 = arith.constant dense<0.000000e+00> : vector<256x4xf32>
    %48 = tpu.matmul %45, %47, %cst_56 {dimension_numbers = #tpu.dot_dimension_numbers<[1], [0], [0], [1], [0, 0, 1, 1], [], []>} : vector<256x4xf32>, vector<4x4xf32>, vector<256x4xf32> -> vector<256x4xf32>
    %49 = arith.addf %43, %48 : vector<256x4xf32>
    %c2_57 = arith.constant 2 : index
    %c1_58 = arith.constant 1 : index
    %c0_59 = arith.constant 0 : index
    %50 = vector.load %arg7[%c2_57, %c1_58, %c0_59] : memref<18x18x4xf32, #tpu.memory_space<vmem>>, vector<16x16x4xf32>
    %51 = vector.shape_cast %50 : vector<16x16x4xf32> to vector<256x4xf32>
    %c7 = arith.constant 7 : index
    %c0_60 = arith.constant 0 : index
    %c0_61 = arith.constant 0 : index
    %52 = vector.load %arg2[%c7, %c0_60, %c0_61] : memref<9x4x4xf32, #tpu.memory_space<vmem>>, vector<1x4x4xf32>
    %53 = vector.shape_cast %52 : vector<1x4x4xf32> to vector<4x4xf32>
    %cst_62 = arith.constant dense<0.000000e+00> : vector<256x4xf32>
    %54 = tpu.matmul %51, %53, %cst_62 {dimension_numbers = #tpu.dot_dimension_numbers<[1], [0], [0], [1], [0, 0, 1, 1], [], []>} : vector<256x4xf32>, vector<4x4xf32>, vector<256x4xf32> -> vector<256x4xf32>
    %55 = arith.addf %49, %54 : vector<256x4xf32>
    %c2_63 = arith.constant 2 : index
    %c2_64 = arith.constant 2 : index
    %c0_65 = arith.constant 0 : index
    %56 = vector.load %arg7[%c2_63, %c2_64, %c0_65] : memref<18x18x4xf32, #tpu.memory_space<vmem>>, vector<16x16x4xf32>
    %57 = vector.shape_cast %56 : vector<16x16x4xf32> to vector<256x4xf32>
    %c8 = arith.constant 8 : index
    %c0_66 = arith.constant 0 : index
    %c0_67 = arith.constant 0 : index
    %58 = vector.load %arg2[%c8, %c0_66, %c0_67] : memref<9x4x4xf32, #tpu.memory_space<vmem>>, vector<1x4x4xf32>
    %59 = vector.shape_cast %58 : vector<1x4x4xf32> to vector<4x4xf32>
    %cst_68 = arith.constant dense<0.000000e+00> : vector<256x4xf32>
    %60 = tpu.matmul %57, %59, %cst_68 {dimension_numbers = #tpu.dot_dimension_numbers<[1], [0], [0], [1], [0, 0, 1, 1], [], []>} : vector<256x4xf32>, vector<4x4xf32>, vector<256x4xf32> -> vector<256x4xf32>
    %61 = arith.addf %55, %60 : vector<256x4xf32>
    %c0_69 = arith.constant 0 : index
    %c0_70 = arith.constant 0 : index
    %62 = vector.load %arg3[%c0_69, %c0_70] : memref<1x4xf32, #tpu.memory_space<vmem>>, vector<1x4xf32>
    %63 = vector.broadcast %62 : vector<1x4xf32> to vector<256x4xf32>
    %64 = arith.addf %61, %63 : vector<256x4xf32>
    %cst_71 = arith.constant 0.000000e+00 : f32
    %65 = vector.broadcast %cst_71 : f32 to vector<256x4xf32>
    %66 = arith.maximumf %64, %65 : vector<256x4xf32>
    %67 = vector.shape_cast %66 : vector<256x4xf32> to vector<16x16x4xf32>
    %c1_72 = arith.constant 1 : index
    %c1_73 = arith.constant 1 : index
    %c0_74 = arith.constant 0 : index
    %68 = vector.load %arg8[%c1_72, %c1_73, %c0_74] : memref<18x18x4xf32, #tpu.memory_space<vmem>>, vector<16x16x4xf32>
    tpu.vector_store %arg8[%c1_72, %c1_73, %c0_74], %67 {strides = array<i32>} : memref<18x18x4xf32, #tpu.memory_space<vmem>>, vector<16x16x4xf32>,
    %cst_75 = arith.constant 0.000000e+00 : f32
    %69 = vector.broadcast %cst_75 : f32 to vector<256x4xf32>
    %c0_76 = arith.constant 0 : index
    %c0_77 = arith.constant 0 : index
    %c0_78 = arith.constant 0 : index
    %70 = vector.load %arg8[%c0_76, %c0_77, %c0_78] : memref<18x18x4xf32, #tpu.memory_space<vmem>>, vector<16x16x4xf32>
    %71 = vector.shape_cast %70 : vector<16x16x4xf32> to vector<256x4xf32>
    %c0_79 = arith.constant 0 : index
    %c0_80 = arith.constant 0 : index
    %c0_81 = arith.constant 0 : index
    %72 = vector.load %arg4[%c0_79, %c0_80, %c0_81] : memref<9x4x4xf32, #tpu.memory_space<vmem>>, vector<1x4x4xf32>
    %73 = vector.shape_cast %72 : vector<1x4x4xf32> to vector<4x4xf32>
    %cst_82 = arith.constant dense<0.000000e+00> : vector<256x4xf32>
    %74 = tpu.matmul %71, %73, %cst_82 {dimension_numbers = #tpu.dot_dimension_numbers<[1], [0], [0], [1], [0, 0, 1, 1], [], []>} : vector<256x4xf32>, vector<4x4xf32>, vector<256x4xf32> -> vector<256x4xf32>
    %75 = arith.addf %69, %74 : vector<256x4xf32>
    %c0_83 = arith.constant 0 : index
    %c1_84 = arith.constant 1 : index
    %c0_85 = arith.constant 0 : index
    %76 = vector.load %arg8[%c0_83, %c1_84, %c0_85] : memref<18x18x4xf32, #tpu.memory_space<vmem>>, vector<16x16x4xf32>
    %77 = vector.shape_cast %76 : vector<16x16x4xf32> to vector<256x4xf32>
    %c1_86 = arith.constant 1 : index
    %c0_87 = arith.constant 0 : index
    %c0_88 = arith.constant 0 : index
    %78 = vector.load %arg4[%c1_86, %c0_87, %c0_88] : memref<9x4x4xf32, #tpu.memory_space<vmem>>, vector<1x4x4xf32>
    %79 = vector.shape_cast %78 : vector<1x4x4xf32> to vector<4x4xf32>
    %cst_89 = arith.constant dense<0.000000e+00> : vector<256x4xf32>
    %80 = tpu.matmul %77, %79, %cst_89 {dimension_numbers = #tpu.dot_dimension_numbers<[1], [0], [0], [1], [0, 0, 1, 1], [], []>} : vector<256x4xf32>, vector<4x4xf32>, vector<256x4xf32> -> vector<256x4xf32>
    %81 = arith.addf %75, %80 : vector<256x4xf32>
    %c0_90 = arith.constant 0 : index
    %c2_91 = arith.constant 2 : index
    %c0_92 = arith.constant 0 : index
    %82 = vector.load %arg8[%c0_90, %c2_91, %c0_92] : memref<18x18x4xf32, #tpu.memory_space<vmem>>, vector<16x16x4xf32>
    %83 = vector.shape_cast %82 : vector<16x16x4xf32> to vector<256x4xf32>
    %c2_93 = arith.constant 2 : index
    %c0_94 = arith.constant 0 : index
    %c0_95 = arith.constant 0 : index
    %84 = vector.load %arg4[%c2_93, %c0_94, %c0_95] : memref<9x4x4xf32, #tpu.memory_space<vmem>>, vector<1x4x4xf32>
    %85 = vector.shape_cast %84 : vector<1x4x4xf32> to vector<4x4xf32>
    %cst_96 = arith.constant dense<0.000000e+00> : vector<256x4xf32>
    %86 = tpu.matmul %83, %85, %cst_96 {dimension_numbers = #tpu.dot_dimension_numbers<[1], [0], [0], [1], [0, 0, 1, 1], [], []>} : vector<256x4xf32>, vector<4x4xf32>, vector<256x4xf32> -> vector<256x4xf32>
    %87 = arith.addf %81, %86 : vector<256x4xf32>
    %c1_97 = arith.constant 1 : index
    %c0_98 = arith.constant 0 : index
    %c0_99 = arith.constant 0 : index
    %88 = vector.load %arg8[%c1_97, %c0_98, %c0_99] : memref<18x18x4xf32, #tpu.memory_space<vmem>>, vector<16x16x4xf32>
    %89 = vector.shape_cast %88 : vector<16x16x4xf32> to vector<256x4xf32>
    %c3_100 = arith.constant 3 : index
    %c0_101 = arith.constant 0 : index
    %c0_102 = arith.constant 0 : index
    %90 = vector.load %arg4[%c3_100, %c0_101, %c0_102] : memref<9x4x4xf32, #tpu.memory_space<vmem>>, vector<1x4x4xf32>
    %91 = vector.shape_cast %90 : vector<1x4x4xf32> to vector<4x4xf32>
    %cst_103 = arith.constant dense<0.000000e+00> : vector<256x4xf32>
    %92 = tpu.matmul %89, %91, %cst_103 {dimension_numbers = #tpu.dot_dimension_numbers<[1], [0], [0], [1], [0, 0, 1, 1], [], []>} : vector<256x4xf32>, vector<4x4xf32>, vector<256x4xf32> -> vector<256x4xf32>
    %93 = arith.addf %87, %92 : vector<256x4xf32>
    %c1_104 = arith.constant 1 : index
    %c1_105 = arith.constant 1 : index
    %c0_106 = arith.constant 0 : index
    %94 = vector.load %arg8[%c1_104, %c1_105, %c0_106] : memref<18x18x4xf32, #tpu.memory_space<vmem>>, vector<16x16x4xf32>
    %95 = vector.shape_cast %94 : vector<16x16x4xf32> to vector<256x4xf32>
    %c4_107 = arith.constant 4 : index
    %c0_108 = arith.constant 0 : index
    %c0_109 = arith.constant 0 : index
    %96 = vector.load %arg4[%c4_107, %c0_108, %c0_109] : memref<9x4x4xf32, #tpu.memory_space<vmem>>, vector<1x4x4xf32>
    %97 = vector.shape_cast %96 : vector<1x4x4xf32> to vector<4x4xf32>
    %cst_110 = arith.constant dense<0.000000e+00> : vector<256x4xf32>
    %98 = tpu.matmul %95, %97, %cst_110 {dimension_numbers = #tpu.dot_dimension_numbers<[1], [0], [0], [1], [0, 0, 1, 1], [], []>} : vector<256x4xf32>, vector<4x4xf32>, vector<256x4xf32> -> vector<256x4xf32>
    %99 = arith.addf %93, %98 : vector<256x4xf32>
    %c1_111 = arith.constant 1 : index
    %c2_112 = arith.constant 2 : index
    %c0_113 = arith.constant 0 : index
    %100 = vector.load %arg8[%c1_111, %c2_112, %c0_113] : memref<18x18x4xf32, #tpu.memory_space<vmem>>, vector<16x16x4xf32>
    %101 = vector.shape_cast %100 : vector<16x16x4xf32> to vector<256x4xf32>
    %c5_114 = arith.constant 5 : index
    %c0_115 = arith.constant 0 : index
    %c0_116 = arith.constant 0 : index
    %102 = vector.load %arg4[%c5_114, %c0_115, %c0_116] : memref<9x4x4xf32, #tpu.memory_space<vmem>>, vector<1x4x4xf32>
    %103 = vector.shape_cast %102 : vector<1x4x4xf32> to vector<4x4xf32>
    %cst_117 = arith.constant dense<0.000000e+00> : vector<256x4xf32>
    %104 = tpu.matmul %101, %103, %cst_117 {dimension_numbers = #tpu.dot_dimension_numbers<[1], [0], [0], [1], [0, 0, 1, 1], [], []>} : vector<256x4xf32>, vector<4x4xf32>, vector<256x4xf32> -> vector<256x4xf32>
    %105 = arith.addf %99, %104 : vector<256x4xf32>
    %c2_118 = arith.constant 2 : index
    %c0_119 = arith.constant 0 : index
    %c0_120 = arith.constant 0 : index
    %106 = vector.load %arg8[%c2_118, %c0_119, %c0_120] : memref<18x18x4xf32, #tpu.memory_space<vmem>>, vector<16x16x4xf32>
    %107 = vector.shape_cast %106 : vector<16x16x4xf32> to vector<256x4xf32>
    %c6_121 = arith.constant 6 : index
    %c0_122 = arith.constant 0 : index
    %c0_123 = arith.constant 0 : index
    %108 = vector.load %arg4[%c6_121, %c0_122, %c0_123] : memref<9x4x4xf32, #tpu.memory_space<vmem>>, vector<1x4x4xf32>
    %109 = vector.shape_cast %108 : vector<1x4x4xf32> to vector<4x4xf32>
    %cst_124 = arith.constant dense<0.000000e+00> : vector<256x4xf32>
    %110 = tpu.matmul %107, %109, %cst_124 {dimension_numbers = #tpu.dot_dimension_numbers<[1], [0], [0], [1], [0, 0, 1, 1], [], []>} : vector<256x4xf32>, vector<4x4xf32>, vector<256x4xf32> -> vector<256x4xf32>
    %111 = arith.addf %105, %110 : vector<256x4xf32>
    %c2_125 = arith.constant 2 : index
    %c1_126 = arith.constant 1 : index
    %c0_127 = arith.constant 0 : index
    %112 = vector.load %arg8[%c2_125, %c1_126, %c0_127] : memref<18x18x4xf32, #tpu.memory_space<vmem>>, vector<16x16x4xf32>
    %113 = vector.shape_cast %112 : vector<16x16x4xf32> to vector<256x4xf32>
    %c7_128 = arith.constant 7 : index
    %c0_129 = arith.constant 0 : index
    %c0_130 = arith.constant 0 : index
    %114 = vector.load %arg4[%c7_128, %c0_129, %c0_130] : memref<9x4x4xf32, #tpu.memory_space<vmem>>, vector<1x4x4xf32>
    %115 = vector.shape_cast %114 : vector<1x4x4xf32> to vector<4x4xf32>
    %cst_131 = arith.constant dense<0.000000e+00> : vector<256x4xf32>
    %116 = tpu.matmul %113, %115, %cst_131 {dimension_numbers = #tpu.dot_dimension_numbers<[1], [0], [0], [1], [0, 0, 1, 1], [], []>} : vector<256x4xf32>, vector<4x4xf32>, vector<256x4xf32> -> vector<256x4xf32>
    %117 = arith.addf %111, %116 : vector<256x4xf32>
    %c2_132 = arith.constant 2 : index
    %c2_133 = arith.constant 2 : index
    %c0_134 = arith.constant 0 : index
    %118 = vector.load %arg8[%c2_132, %c2_133, %c0_134] : memref<18x18x4xf32, #tpu.memory_space<vmem>>, vector<16x16x4xf32>
    %119 = vector.shape_cast %118 : vector<16x16x4xf32> to vector<256x4xf32>
    %c8_135 = arith.constant 8 : index
    %c0_136 = arith.constant 0 : index
    %c0_137 = arith.constant 0 : index
    %120 = vector.load %arg4[%c8_135, %c0_136, %c0_137] : memref<9x4x4xf32, #tpu.memory_space<vmem>>, vector<1x4x4xf32>
    %121 = vector.shape_cast %120 : vector<1x4x4xf32> to vector<4x4xf32>
    %cst_138 = arith.constant dense<0.000000e+00> : vector<256x4xf32>
    %122 = tpu.matmul %119, %121, %cst_138 {dimension_numbers = #tpu.dot_dimension_numbers<[1], [0], [0], [1], [0, 0, 1, 1], [], []>} : vector<256x4xf32>, vector<4x4xf32>, vector<256x4xf32> -> vector<256x4xf32>
    %123 = arith.addf %117, %122 : vector<256x4xf32>
    %c0_139 = arith.constant 0 : index
    %c0_140 = arith.constant 0 : index
    %124 = vector.load %arg5[%c0_139, %c0_140] : memref<1x4xf32, #tpu.memory_space<vmem>>, vector<1x4xf32>
    %125 = vector.broadcast %124 : vector<1x4xf32> to vector<256x4xf32>
    %126 = arith.addf %123, %125 : vector<256x4xf32>
    %127 = vector.shape_cast %5 : vector<16x16x4xf32> to vector<256x4xf32>
    %128 = arith.addf %126, %127 : vector<256x4xf32>
    %cst_141 = arith.constant 0.000000e+00 : f32
    %129 = vector.broadcast %cst_141 : f32 to vector<256x4xf32>
    %130 = arith.maximumf %128, %129 : vector<256x4xf32>
    %131 = vector.shape_cast %130 : vector<256x4xf32> to vector<16x16x4xf32>
    %c0_142 = arith.constant 0 : index
    %c0_143 = arith.constant 0 : index
    %c0_144 = arith.constant 0 : index
    %c0_145 = arith.constant 0 : index
    %132 = vector.load %arg6[%c0_142, %c0_143, %c0_144, %c0_145] : memref<1x16x16x4xf32, #tpu.memory_space<vmem>>, vector<1x16x16x4xf32>
    %133 = vector.shape_cast %132 : vector<1x16x16x4xf32> to vector<16x16x4xf32>
    %134 = vector.shape_cast %131 : vector<16x16x4xf32> to vector<1x16x16x4xf32>
    tpu.vector_store %arg6[%c0_142, %c0_143, %c0_144, %c0_145], %134 {strides = array<i32>} : memref<1x16x16x4xf32, #tpu.memory_space<vmem>>, vector<1x16x16x4xf32>,
    return
  }
  func.func @transform_0(%arg0: i32) -> (i32, i32, i32, i32) {
    %c0_i32 = arith.constant 0 : i32
    %c0_i32_0 = arith.constant 0 : i32
    %c0_i32_1 = arith.constant 0 : i32
    %c0_i32_2 = arith.constant 0 : i32
    return %arg0, %c0_i32, %c0_i32_0, %c0_i32_1 : i32, i32, i32, i32
  }
  func.func @transform_1(%arg0: i32) -> (i32, i32, i32) {
    %c0_i32 = arith.constant 0 : i32
    %c0_i32_0 = arith.constant 0 : i32
    %c0_i32_1 = arith.constant 0 : i32
    %c0_i32_2 = arith.constant 0 : i32
    return %c0_i32, %c0_i32_0, %c0_i32_1 : i32, i32, i32
  }
  func.func @transform_2(%arg0: i32) -> (i32, i32) {
    %c0_i32 = arith.constant 0 : i32
    %c0_i32_0 = arith.constant 0 : i32
    %c0_i32_1 = arith.constant 0 : i32
    return %c0_i32, %c0_i32_0 : i32, i32
  }
  func.func @transform_3(%arg0: i32) -> (i32, i32, i32) {
    %c0_i32 = arith.constant 0 : i32
    %c0_i32_0 = arith.constant 0 : i32
    %c0_i32_1 = arith.constant 0 : i32
    %c0_i32_2 = arith.constant 0 : i32
    return %c0_i32, %c0_i32_0, %c0_i32_1 : i32, i32, i32
  }
  func.func @transform_4(%arg0: i32) -> (i32, i32) {
    %c0_i32 = arith.constant 0 : i32
    %c0_i32_0 = arith.constant 0 : i32
    %c0_i32_1 = arith.constant 0 : i32
    return %c0_i32, %c0_i32_0 : i32, i32
  }
  func.func @transform_5(%arg0: i32) -> (i32, i32, i32, i32) {
    %c0_i32 = arith.constant 0 : i32
    %c0_i32_0 = arith.constant 0 : i32
    %c0_i32_1 = arith.constant 0 : i32
    %c0_i32_2 = arith.constant 0 : i32
    return %arg0, %c0_i32, %c0_i32_0, %c0_i32_1 : i32, i32, i32, i32
  }
}

</mosaic_0001>

<bundles_post_ra>
// kernel: tpu_custom_call.1
= control target key start
LH: loop header
LB: loop body
LE: loop exit
PB: predicated region body
PF: predicated region fallthrough
CT: control target
= control target key end

     0   :  { %s9754_s18 = smov 0   ;;  %s13189_s0 = inlined_call_operand.vmem [shape: f32[2,16,16,4], index: 0, kind: input, shape index: {}]   ;;  %s13190_s1 = inlined_call_operand.vmem [shape: f32[9,4,4], index: 1, kind: input, shape index: {}]   ;;  %s13191_s2 = inlined_call_operand.vmem [shape: f32[1,4], index: 2, kind: input, shape index: {}]   ;;  %s13192_s3 = inlined_call_operand.vmem [shape: f32[9,4,4], index: 3, kind: input, shape index: {}]   ;;  %s13193_s4 = inlined_call_operand.vmem [shape: f32[1,4], index: 4, kind: input, shape index: {}]   ;;  %s13194_s5 = inlined_call_operand.vmem [shape: f32[2,16,16,4], index: 5, kind: output, shape index: {}]  }
   0x1 LB: > { %s7587_s19 = sadd.s32 4294967295, %s9721_s18   ;;  %p7591_p0 = scmp.ge.s32.totalorder %s9721_s18, 1  ;;  %s9721_s18 = sphi %s9754_s18, %s15_s18  }
   0x2   : > { %p187_p1 = scmp.lt.s32.totalorder %s9721_s18, 3 }
   0x4   : > { %p188_p2 = pnand %p7591_p0, %p187_p1 }
   0x6   : > { %191 = sbr.rel (%p188_p2) target bundleno = 1059 (0x423), region = 40 }
   0xb   : > { %v7596_v0 = vld [vmem:[%s13190_s1 + $0x4] sm:$0xf]  ;;  %vm563_vm0 = vcmask 1043456   ;;  %v9768_v1 = vld [vmem:[%s13190_s1] sm:$0xf]  ;;  %vm225_vm1 = vcmask 31744  }
   0xc   : > { %8806 = vmatprep.subr.msk.mxu0 %vm563_vm0, %v7596_v0  ;;  %8856 = vmatprep.subr.msk.mxu1 %vm563_vm0, %v9768_v1  ;;  %vm228_vm2 = vcmask 25600   ;;  %v9776_v2 = vld [vmem:[%s13190_s1 + $0x8] sm:$0xf]  ;;  %p9780_p3 = scmp.lt.s32.totalorder %s7587_s19, 1  ;;  %v9723_v3 = vmov 0.0  }
   0xd   : > { %8807 = vmatpush3.msk.msra.mxu0 %vm563_vm0, %v7596_v0  ;;  %226 = vst.msk [vmem:[#allocation2] sm:$0xff] %vm225_vm1, %v9723_v3  ;;  %227 = vst.msk [vmem:[#allocation2 + $0x8] sm:$0xff] %vm225_vm1, %v9723_v3  ;;  %8857 = vmatpush3.msk.msra.mxu1 %vm563_vm0, %v9768_v1  ;;  %v7697_v4 = vld [vmem:[%s13190_s1 + $0xc] sm:$0xf]  ;;  %v10050_v11 = vld [vmem:[%s13190_s1 + $0x10] sm:$0xf] }
   0xe   : > { %230 = vst.msk [vmem:[#allocation2 + $0x18] sm:$0xff] %vm225_vm1, %v9723_v3  ;;  %231 = vst.msk [vmem:[#allocation2 + $0x20] sm:$0xff] %vm225_vm1, %v9723_v3  ;;  %8906 = vmatprep.subr.msk.mxu0 %vm563_vm0, %v9776_v2  ;;  %s13786_s19 = smov (!%p9780_p3, %s7587_s19), 1  ;;  %8956 = vmatprep.subr.msk.mxu1 %vm563_vm0, %v7697_v4 }
   0xf   : > { %233 = vst.msk [vmem:[#allocation2 + $0x30] sm:$0xff] %vm225_vm1, %v9723_v3  ;;  %234 = vst.msk [vmem:[#allocation2 + $0x38] sm:$0xff] %vm225_vm1, %v9723_v3  ;;  %s8210_s29 = sshll.u32 %s13786_s19, 8 }
  0x10   : > { %236 = vst.msk [vmem:[#allocation2 + $0x48] sm:$0xff] %vm225_vm1, %v9723_v3  ;;  %237 = vst.msk [vmem:[#allocation2 + $0x50] sm:$0xff] %vm225_vm1, %v9723_v3  ;;  %s10021_s7 = scalar_lea.vmem %s13189_s0, %s8210_s29  ;;  %s12949_s22 = scalar_lea.vmem %s13194_s5, %s8210_s29 }
  0x11   : > { %239 = vst.msk [vmem:[#allocation2 + $0x60] sm:$0xff] %vm225_vm1, %v9723_v3  ;;  %240 = vst.msk [vmem:[#allocation2 + $0x68] sm:$0xff] %vm225_vm1, %v9723_v3  ;;  %v10024_v5 = vld [vmem:[%s10021_s7] sm:$0xff]  ;;  %v10027_v6 = vld [vmem:[%s10021_s7 + $0x8] sm:$0xff] }
  0x12   : > { %242 = vst.msk [vmem:[#allocation2 + $0x78] sm:$0xff] %vm225_vm1, %v9723_v3  ;;  %243 = vst.msk [vmem:[#allocation2 + $0x80] sm:$0xff] %vm225_vm1, %v9723_v3  ;;  %v10030_v7 = vld [vmem:[%s10021_s7 + $0x10] sm:$0xff]  ;;  %v10039_v8 = vld [vmem:[%s10021_s7 + $0x18] sm:$0xff] }
  0x13   : > { %245 = vst.msk [vmem:[#allocation2 + $0x90] sm:$0xff] %vm225_vm1, %v9723_v3  ;;  %246 = vst.msk [vmem:[#allocation2 + $0x98] sm:$0xff] %vm225_vm1, %v9723_v3  ;;  %v10042_v9 = vld [vmem:[%s10021_s7 + $0x20] sm:$0xff]  ;;  %v10045_v10 = vld [vmem:[%s10021_s7 + $0x28] sm:$0xff] }
  0x14   : > { %248 = vst.msk [vmem:[#allocation2 + $0xa8] sm:$0xff] %vm225_vm1, %v9723_v3  ;;  %249 = vst.msk [vmem:[#allocation2 + $0xb0] sm:$0xff] %vm225_vm1, %v9723_v3  ;;  %v433_v12 = vld [vmem:[#allocation2 + $0x1] sm:$0xff]  ;;  %v10061_v16 = vld [vmem:[%s10021_s7 + $0x30] sm:$0xff] }
  0x15   : > { %251 = vst.msk [vmem:[#allocation2 + $0xc0] sm:$0xff] %vm225_vm1, %v9723_v3  ;;  %252 = vst.msk [vmem:[#allocation2 + $0xc8] sm:$0xff] %vm225_vm1, %v9723_v3  ;;  %v400_v13 = vld [vmem:[#allocation2] sm:$0xff]  ;;  %8808 = vmatprep.mubr.msk.f32.mxu0 %vm225_vm1, %v433_v12  ;;  %v401_v15 = vld [vmem:[#allocation2 + $0x8] sm:$0xff] }
  0x16   : > { %254 = vst.msk [vmem:[#allocation2 + $0xd8] sm:$0xff] %vm225_vm1, %v9723_v3  ;;  %255 = vst.msk [vmem:[#allocation2 + $0xe0] sm:$0xff] %vm225_vm1, %v9723_v3  ;;  %8858 = vmatprep.mubr.msk.f32.mxu1 %vm225_vm1, %v400_v13  ;;  %v10064_v17 = vld [vmem:[%s10021_s7 + $0x38] sm:$0xff]  ;;  %v10073_v18 = vld [vmem:[%s10021_s7 + $0x40] sm:$0xff] }
  0x17   : > { %257 = vst.msk [vmem:[#allocation2 + $0xf0] sm:$0xff] %vm225_vm1, %v9723_v3  ;;  %258 = vst.msk [vmem:[#allocation2 + $0xf8] sm:$0xff] %vm225_vm1, %v9723_v3  ;;  %8859 = vmatmul.mubr.msk.f32.vlgmr.msra.gmra.mxu1 %vm225_vm1, %v401_v15  ;;  %v10076_v19 = vld [vmem:[%s10021_s7 + $0x48] sm:$0xff]  ;;  %v10079_v20 = vld [vmem:[%s10021_s7 + $0x50] sm:$0xff] }
  0x18   : > { %260 = vst.msk [vmem:[#allocation2 + $0x108] sm:$0xff] %vm225_vm1, %v9723_v3  ;;  %261 = vst.msk [vmem:[#allocation2 + $0x110] sm:$0xff] %vm225_vm1, %v9723_v3  ;;  %v10090_v21 = vld [vmem:[%s10021_s7 + $0x58] sm:$0xff]  ;;  %v10093_v22 = vld [vmem:[%s10021_s7 + $0x60] sm:$0xff]  ;;  %8957 = vmatpush3.msk.msra.mxu1 %vm563_vm0, %v7697_v4 }
  0x19   : > { %263 = vst.msk [vmem:[#allocation2 + $0x120] sm:$0xff] %vm225_vm1, %v9723_v3  ;;  %264 = vst.msk [vmem:[#allocation2 + $0x128] sm:$0xff] %vm225_vm1, %v9723_v3  ;;  %v10096_v23 = vld [vmem:[%s10021_s7 + $0x68] sm:$0xff]  ;;  %v10106_v24 = vld [vmem:[%s10021_s7 + $0x70] sm:$0xff] }
  0x1a   : > { %266 = vst.msk [vmem:[#allocation2 + $0x138] sm:$0xff] %vm225_vm1, %v9723_v3  ;;  %267 = vst.msk [vmem:[#allocation2 + $0x140] sm:$0xff] %vm225_vm1, %v9723_v3  ;;  %v10109_v25 = vld [vmem:[%s10021_s7 + $0x78] sm:$0xff]  ;;  %v10112_v26 = vld [vmem:[%s10021_s7 + $0x80] sm:$0xff] }
  0x1b   : > { %269 = vst.msk [vmem:[#allocation2 + $0x150] sm:$0xff] %vm225_vm1, %v9723_v3  ;;  %270 = vst.msk [vmem:[#allocation2 + $0x158] sm:$0xff] %vm225_vm1, %v9723_v3  ;;  %v10123_v27 = vld [vmem:[%s10021_s7 + $0x88] sm:$0xff]  ;;  %v10126_v28 = vld [vmem:[%s10021_s7 + $0x90] sm:$0xff] }
  0x1c   : > { %272 = vst.msk [vmem:[#allocation2 + $0x168] sm:$0xff] %vm225_vm1, %v9723_v3  ;;  %273 = vst.msk [vmem:[#allocation2 + $0x170] sm:$0xff] %vm225_vm1, %v9723_v3  ;;  %v10129_v29 = vld [vmem:[%s10021_s7 + $0x98] sm:$0xff]  ;;  %v10206_v50 = vld [vmem:[%s10021_s7 + $0xa0] sm:$0xff] }
  0x1d   : > { %275 = vst.msk [vmem:[#allocation2 + $0x180] sm:$0xff] %vm225_vm1, %v9723_v3  ;;  %276 = vst.msk [vmem:[#allocation2 + $0x188] sm:$0xff] %vm225_vm1, %v9723_v3  ;;  %v10209_v51 = vld [vmem:[%s10021_s7 + $0xa8] sm:$0xff]  ;;  %v10222_v53 = vld [vmem:[%s10021_s7 + $0xb0] sm:$0xff] }
  0x1e   : > { %278 = vst.msk [vmem:[#allocation2 + $0x198] sm:$0xff] %vm225_vm1, %v9723_v3  ;;  %279 = vst.msk [vmem:[#allocation2 + $0x1a0] sm:$0xff] %vm225_vm1, %v9723_v3  ;;  %v10225_v54 = vld [vmem:[%s10021_s7 + $0xb8] sm:$0xff]  ;;  %v10228_v55 = vld [vmem:[%s10021_s7 + $0xc0] sm:$0xff] }
  0x1f   : > { %281 = vst.msk [vmem:[#allocation3] sm:$0xff] %vm225_vm1, %v9723_v3  ;;  %282 = vst.msk [vmem:[#allocation3 + $0x8] sm:$0xff] %vm225_vm1, %v9723_v3  ;;  %v10241_v56 = vld [vmem:[%s10021_s7 + $0xc8] sm:$0xff]  ;;  %v10244_v57 = vld [vmem:[%s10021_s7 + $0xd0] sm:$0xff] }
  0x20   : > { %284 = vst.msk [vmem:[#allocation3 + $0x18] sm:$0xff] %vm225_vm1, %v9723_v3  ;;  %285 = vst.msk [vmem:[#allocation3 + $0x20] sm:$0xff] %vm225_vm1, %v9723_v3  ;;  %v10247_v58 = vld [vmem:[%s10021_s7 + $0xd8] sm:$0xff]  ;;  %v10258_v60 = vld [vmem:[%s10021_s7 + $0xe0] sm:$0xff] }
  0x21   : > { %287 = vst.msk [vmem:[#allocation3 + $0x30] sm:$0xff] %vm225_vm1, %v9723_v3  ;;  %288 = vst.msk [vmem:[#allocation3 + $0x38] sm:$0xff] %vm225_vm1, %v9723_v3  ;;  %v10261_v61 = vld [vmem:[%s10021_s7 + $0xe8] sm:$0xff] }
  0x22   : > { %290 = vst.msk [vmem:[#allocation3 + $0x48] sm:$0xff] %vm225_vm1, %v9723_v3  ;;  %291 = vst.msk [vmem:[#allocation3 + $0x50] sm:$0xff] %vm225_vm1, %v9723_v3 }
  0x23   : > { %293 = vst.msk [vmem:[#allocation3 + $0x60] sm:$0xff] %vm225_vm1, %v9723_v3  ;;  %294 = vst.msk [vmem:[#allocation3 + $0x68] sm:$0xff] %vm225_vm1, %v9723_v3 }
  0x24   : > { %296 = vst.msk [vmem:[#allocation3 + $0x78] sm:$0xff] %vm225_vm1, %v9723_v3  ;;  %297 = vst.msk [vmem:[#allocation3 + $0x80] sm:$0xff] %vm225_vm1, %v9723_v3 }
  0x25   : > { %299 = vst.msk [vmem:[#allocation3 + $0x90] sm:$0xff] %vm225_vm1, %v9723_v3  ;;  %300 = vst.msk [vmem:[#allocation3 + $0x98] sm:$0xff] %vm225_vm1, %v9723_v3 }
  0x26   : > { %302 = vst.msk [vmem:[#allocation3 + $0xa8] sm:$0xff] %vm225_vm1, %v9723_v3  ;;  %303 = vst.msk [vmem:[#allocation3 + $0xb0] sm:$0xff] %vm225_vm1, %v9723_v3 }
  0x27   : > { %305 = vst.msk [vmem:[#allocation3 + $0xc0] sm:$0xff] %vm225_vm1, %v9723_v3  ;;  %306 = vst.msk [vmem:[#allocation3 + $0xc8] sm:$0xff] %vm225_vm1, %v9723_v3 }
  0x28   : > { %308 = vst.msk [vmem:[#allocation3 + $0xd8] sm:$0xff] %vm225_vm1, %v9723_v3  ;;  %309 = vst.msk [vmem:[#allocation3 + $0xe0] sm:$0xff] %vm225_vm1, %v9723_v3 }
  0x29   : > { %311 = vst.msk [vmem:[#allocation3 + $0xf0] sm:$0xff] %vm225_vm1, %v9723_v3  ;;  %312 = vst.msk [vmem:[#allocation3 + $0xf8] sm:$0xff] %vm225_vm1, %v9723_v3 }
  0x2a   : > { %314 = vst.msk [vmem:[#allocation3 + $0x108] sm:$0xff] %vm225_vm1, %v9723_v3  ;;  %315 = vst.msk [vmem:[#allocation3 + $0x110] sm:$0xff] %vm225_vm1, %v9723_v3 }
  0x2b   : > { %317 = vst.msk [vmem:[#allocation3 + $0x120] sm:$0xff] %vm225_vm1, %v9723_v3  ;;  %318 = vst.msk [vmem:[#allocation3 + $0x128] sm:$0xff] %vm225_vm1, %v9723_v3 }
  0x2c   : > { %320 = vst.msk [vmem:[#allocation3 + $0x138] sm:$0xff] %vm225_vm1, %v9723_v3  ;;  %321 = vst.msk [vmem:[#allocation3 + $0x140] sm:$0xff] %vm225_vm1, %v9723_v3 }
  0x2d   : > { %323 = vst.msk [vmem:[#allocation3 + $0x150] sm:$0xff] %vm225_vm1, %v9723_v3  ;;  %324 = vst.msk [vmem:[#allocation3 + $0x158] sm:$0xff] %vm225_vm1, %v9723_v3 }
  0x2e   : > { %326 = vst.msk [vmem:[#allocation3 + $0x168] sm:$0xff] %vm225_vm1, %v9723_v3  ;;  %327 = vst.msk [vmem:[#allocation3 + $0x170] sm:$0xff] %vm225_vm1, %v9723_v3 }
  0x2f   : > { %329 = vst.msk [vmem:[#allocation3 + $0x180] sm:$0xff] %vm225_vm1, %v9723_v3  ;;  %330 = vst.msk [vmem:[#allocation3 + $0x188] sm:$0xff] %vm225_vm1, %v9723_v3 }
  0x30   : > { %332 = vst.msk [vmem:[#allocation3 + $0x198] sm:$0xff] %vm225_vm1, %v9723_v3  ;;  %333 = vst.msk [vmem:[#allocation3 + $0x1a0] sm:$0xff] %vm225_vm1, %v9723_v3 }
  0x31   : > { %229 = vst.msk [vmem:[#allocation2 + $0x10] sm:$0x3] %vm228_vm2, %v9723_v3  ;;  %232 = vst.msk [vmem:[#allocation2 + $0x28] sm:$0x3] %vm228_vm2, %v9723_v3 }
  0x32   : > { %235 = vst.msk [vmem:[#allocation2 + $0x40] sm:$0x3] %vm228_vm2, %v9723_v3  ;;  %238 = vst.msk [vmem:[#allocation2 + $0x58] sm:$0x3] %vm228_vm2, %v9723_v3 }
  0x33   : > { %241 = vst.msk [vmem:[#allocation2 + $0x70] sm:$0x3] %vm228_vm2, %v9723_v3  ;;  %244 = vst.msk [vmem:[#allocation2 + $0x88] sm:$0x3] %vm228_vm2, %v9723_v3 }
  0x34   : > { %247 = vst.msk [vmem:[#allocation2 + $0xa0] sm:$0x3] %vm228_vm2, %v9723_v3  ;;  %250 = vst.msk [vmem:[#allocation2 + $0xb8] sm:$0x3] %vm228_vm2, %v9723_v3 }
  0x35   : > { %253 = vst.msk [vmem:[#allocation2 + $0xd0] sm:$0x3] %vm228_vm2, %v9723_v3  ;;  %256 = vst.msk [vmem:[#allocation2 + $0xe8] sm:$0x3] %vm228_vm2, %v9723_v3 }
  0x36   : > { %259 = vst.msk [vmem:[#allocation2 + $0x100] sm:$0x3] %vm228_vm2, %v9723_v3  ;;  %262 = vst.msk [vmem:[#allocation2 + $0x118] sm:$0x3] %vm228_vm2, %v9723_v3 }
  0x37   : > { %265 = vst.msk [vmem:[#allocation2 + $0x130] sm:$0x3] %vm228_vm2, %v9723_v3  ;;  %268 = vst.msk [vmem:[#allocation2 + $0x148] sm:$0x3] %vm228_vm2, %v9723_v3 }
  0x38   : > { %271 = vst.msk [vmem:[#allocation2 + $0x160] sm:$0x3] %vm228_vm2, %v9723_v3  ;;  %274 = vst.msk [vmem:[#allocation2 + $0x178] sm:$0x3] %vm228_vm2, %v9723_v3  ;;  %v434_v14 = vld [vmem:[#allocation2 + $0x9] sm:$0xff] }
  0x39   : > { %277 = vst.msk [vmem:[#allocation2 + $0x190] sm:$0x3] %vm228_vm2, %v9723_v3  ;;  %280 = vst.msk [vmem:[#allocation2 + $0x1a8] sm:$0x3] %vm228_vm2, %v9723_v3  ;;  %8809 = vmatmul.mubr.msk.f32.vlgmr.msra.gmra.mxu0 %vm225_vm1, %v434_v14 }
  0x3a   : > { %283 = vst.msk [vmem:[#allocation3 + $0x10] sm:$0x3] %vm228_vm2, %v9723_v3  ;;  %286 = vst.msk [vmem:[#allocation3 + $0x28] sm:$0x3] %vm228_vm2, %v9723_v3  ;;  %8907 = vmatpush3.msk.msra.mxu0 %vm563_vm0, %v9776_v2 }
  0x3b   : > { %289 = vst.msk [vmem:[#allocation3 + $0x40] sm:$0x3] %vm228_vm2, %v9723_v3  ;;  %292 = vst.msk [vmem:[#allocation3 + $0x58] sm:$0x3] %vm228_vm2, %v9723_v3  ;;  %9006 = vmatprep.subr.msk.mxu0 %vm563_vm0, %v10050_v11 }
  0x3c   : > { %295 = vst.msk [vmem:[#allocation3 + $0x70] sm:$0x3] %vm228_vm2, %v9723_v3  ;;  %298 = vst.msk [vmem:[#allocation3 + $0x88] sm:$0x3] %vm228_vm2, %v9723_v3 }
  0x3d   : > { %301 = vst.msk [vmem:[#allocation3 + $0xa0] sm:$0x3] %vm228_vm2, %v9723_v3  ;;  %304 = vst.msk [vmem:[#allocation3 + $0xb8] sm:$0x3] %vm228_vm2, %v9723_v3 }
  0x3e   : > { %307 = vst.msk [vmem:[#allocation3 + $0xd0] sm:$0x3] %vm228_vm2, %v9723_v3  ;;  %310 = vst.msk [vmem:[#allocation3 + $0xe8] sm:$0x3] %vm228_vm2, %v9723_v3 }
  0x3f   : > { %313 = vst.msk [vmem:[#allocation3 + $0x100] sm:$0x3] %vm228_vm2, %v9723_v3  ;;  %316 = vst.msk [vmem:[#allocation3 + $0x118] sm:$0x3] %vm228_vm2, %v9723_v3 }
  0x40   : > { %319 = vst.msk [vmem:[#allocation3 + $0x130] sm:$0x3] %vm228_vm2, %v9723_v3  ;;  %322 = vst.msk [vmem:[#allocation3 + $0x148] sm:$0x3] %vm228_vm2, %v9723_v3 }
  0x41   : > { %325 = vst.msk [vmem:[#allocation3 + $0x160] sm:$0x3] %vm228_vm2, %v9723_v3  ;;  %328 = vst.msk [vmem:[#allocation3 + $0x178] sm:$0x3] %vm228_vm2, %v9723_v3 }
  0x42   : > { %331 = vst.msk [vmem:[#allocation3 + $0x190] sm:$0x3] %vm228_vm2, %v9723_v3  ;;  %334 = vst.msk [vmem:[#allocation3 + $0x1a8] sm:$0x3] %vm228_vm2, %v9723_v3 }
  0x43   : > { %13293 = vst [vmem:[#allocation4_spill] sm:$0xff] %v10024_v5  ;;  %13294 = vst [vmem:[#allocation5_spill] sm:$0xff] %v10027_v6 }
  0x44   : > { %13295 = vst [vmem:[#allocation6_spill] sm:$0xff] %v10030_v7  ;;  %368 = vst.msk [vmem:[#allocation2 + $0x19] sm:$0xff] %vm225_vm1, %v10024_v5  ;;  %v1116_v5 = vld [vmem:[#allocation2 + $0x2] sm:$0xff] }
  0x45   : > { %369 = vst.msk [vmem:[#allocation2 + $0x21] sm:$0xff] %vm225_vm1, %v10027_v6  ;;  %370 = vst.msk [vmem:[#allocation2 + $0x31] sm:$0xff] %vm225_vm1, %v10030_v7  ;;  %v1117_v6 = vld [vmem:[#allocation2 + $0xa] sm:$0xff] }
  0x46   : > { %13296 = vst [vmem:[#allocation7_spill] sm:$0xff] %v10039_v8  ;;  %13297 = vst [vmem:[#allocation8_spill] sm:$0xff] %v10042_v9 }
  0x47   : > { %13298 = vst [vmem:[#allocation9_spill] sm:$0xff] %v10045_v10  ;;  %371 = vst.msk [vmem:[#allocation2 + $0x39] sm:$0xff] %vm225_vm1, %v10039_v8 }
  0x48   : > { %372 = vst.msk [vmem:[#allocation2 + $0x49] sm:$0xff] %vm225_vm1, %v10042_v9  ;;  %373 = vst.msk [vmem:[#allocation2 + $0x51] sm:$0xff] %vm225_vm1, %v10045_v10 }
  0x49   : > { %13299 = vst [vmem:[#allocation10_spill] sm:$0xff] %v10061_v16  ;;  %13300 = vst [vmem:[#allocation11_spill] sm:$0xff] %v10064_v17 }
  0x4a   : > { %374 = vst.msk [vmem:[#allocation2 + $0x61] sm:$0xff] %vm225_vm1, %v10061_v16  ;;  %375 = vst.msk [vmem:[#allocation2 + $0x69] sm:$0xff] %vm225_vm1, %v10064_v17 }
  0x4b   : > { %13301 = vst [vmem:[#allocation12_spill] sm:$0xff] %v10073_v18  ;;  %13302 = vst [vmem:[#allocation13_spill] sm:$0xff] %v10076_v19  ;;  %v10131_v30 = vld [vmem:[#allocation2 + $0x19] sm:$0xff] }
  0x4c   : > { %13303 = vst [vmem:[#allocation14_spill] sm:$0xff] %v10079_v20  ;;  %376 = vst.msk [vmem:[#allocation2 + $0x79] sm:$0xff] %vm225_vm1, %v10073_v18  ;;  %v10133_v31 = vld [vmem:[#allocation2 + $0x18] sm:$0xff]  ;;  %v10135_v32 = vld [vmem:[#allocation2 + $0x21] sm:$0xff]  ;;  %8811 = vmatprep.mubr.msk.f32.mxu0 %vm225_vm1, %v10131_v30 }
  0x4d   : > { %377 = vst.msk [vmem:[#allocation2 + $0x81] sm:$0xff] %vm225_vm1, %v10076_v19  ;;  %378 = vst.msk [vmem:[#allocation2 + $0x91] sm:$0xff] %vm225_vm1, %v10079_v20  ;;  %8861 = vmatprep.mubr.msk.f32.mxu1 %vm225_vm1, %v10133_v31  ;;  %v10147_v33 = vld [vmem:[#allocation2 + $0x20] sm:$0xff]  ;;  %v10149_v34 = vld [vmem:[#allocation2 + $0x31] sm:$0xff]  ;;  %8812 = vmatmul.mubr.msk.f32.gmra.mxu0 %vm225_vm1, %v10135_v32 }
  0x4e   : > { %13304 = vst [vmem:[#allocation15_spill] sm:$0xff] %v10090_v21  ;;  %13305 = vst [vmem:[#allocation16_spill] sm:$0xff] %v10093_v22  ;;  %v10151_v35 = vld [vmem:[#allocation2 + $0x30] sm:$0xff]  ;;  %8862 = vmatmul.mubr.msk.f32.gmra.mxu1 %vm225_vm1, %v10147_v33  ;;  %8814 = vmatprep.mubr.msk.f32.mxu0 %vm225_vm1, %v10149_v34  ;;  %v10161_v36 = vld [vmem:[#allocation2 + $0x39] sm:$0xff] }
  0x4f   : > { %13306 = vst [vmem:[#allocation17_spill] sm:$0xff] %v10096_v23  ;;  %379 = vst.msk [vmem:[#allocation2 + $0x99] sm:$0xff] %vm225_vm1, %v10090_v21  ;;  %8864 = vmatprep.mubr.msk.f32.mxu1 %vm225_vm1, %v10151_v35  ;;  %v10163_v37 = vld [vmem:[#allocation2 + $0x38] sm:$0xff]  ;;  %v10165_v38 = vld [vmem:[#allocation2 + $0x49] sm:$0xff] }
  0x50   : > { %380 = vst.msk [vmem:[#allocation2 + $0xa9] sm:$0xff] %vm225_vm1, %v10093_v22  ;;  %381 = vst.msk [vmem:[#allocation2 + $0xb1] sm:$0xff] %vm225_vm1, %v10096_v23  ;;  %v10167_v39 = vld [vmem:[#allocation2 + $0x48] sm:$0xff]  ;;  %v10177_v40 = vld [vmem:[#allocation2 + $0x51] sm:$0xff] }
  0x51   : > { %13307 = vst [vmem:[#allocation18_spill] sm:$0xff] %v10106_v24  ;;  %13308 = vst [vmem:[#allocation19_spill] sm:$0xff] %v10109_v25  ;;  %8815 = vmatmul.mubr.msk.f32.gmra.mxu0 %vm225_vm1, %v10161_v36  ;;  %v10179_v41 = vld [vmem:[#allocation2 + $0x50] sm:$0xff]  ;;  %v10181_v42 = vld [vmem:[#allocation2 + $0x61] sm:$0xff] }
  0x52   : > { %13309 = vst [vmem:[#allocation20_spill] sm:$0xff] %v10112_v26  ;;  %382 = vst.msk [vmem:[#allocation2 + $0xc1] sm:$0xff] %vm225_vm1, %v10106_v24  ;;  %8865 = vmatmul.mubr.msk.f32.gmra.mxu1 %vm225_vm1, %v10163_v37  ;;  %8817 = vmatprep.mubr.msk.f32.mxu0 %vm225_vm1, %v10165_v38  ;;  %v10183_v43 = vld [vmem:[#allocation2 + $0x60] sm:$0xff]  ;;  %v10193_v44 = vld [vmem:[#allocation2 + $0x69] sm:$0xff] }
  0x53   : > { %383 = vst.msk [vmem:[#allocation2 + $0xc9] sm:$0xff] %vm225_vm1, %v10109_v25  ;;  %384 = vst.msk [vmem:[#allocation2 + $0xd9] sm:$0xff] %vm225_vm1, %v10112_v26  ;;  %8867 = vmatprep.mubr.msk.f32.mxu1 %vm225_vm1, %v10167_v39  ;;  %v10195_v45 = vld [vmem:[#allocation2 + $0x68] sm:$0xff]  ;;  %v10197_v46 = vld [vmem:[#allocation2 + $0x79] sm:$0xff] }
  0x54   : > { %13310 = vst [vmem:[#allocation21_spill] sm:$0xff] %v10123_v27  ;;  %13311 = vst [vmem:[#allocation22_spill] sm:$0xff] %v10126_v28  ;;  %v10199_v47 = vld [vmem:[#allocation2 + $0x78] sm:$0xff]  ;;  %v10201_v48 = vld [vmem:[#allocation2 + $0x81] sm:$0xff] }
  0x55   : > { %13312 = vst [vmem:[#allocation23_spill] sm:$0xff] %v10129_v29  ;;  %385 = vst.msk [vmem:[#allocation2 + $0xe1] sm:$0xff] %vm225_vm1, %v10123_v27  ;;  %8818 = vmatmul.mubr.msk.f32.gmra.mxu0 %vm225_vm1, %v10177_v40  ;;  %v10203_v49 = vld [vmem:[#allocation2 + $0x80] sm:$0xff]  ;;  %v10215_v52 = vld [vmem:[#allocation2 + $0x91] sm:$0xff] }
  0x56   : > { %386 = vst.msk [vmem:[#allocation2 + $0xf1] sm:$0xff] %vm225_vm1, %v10126_v28  ;;  %387 = vst.msk [vmem:[#allocation2 + $0xf9] sm:$0xff] %vm225_vm1, %v10129_v29  ;;  %8868 = vmatmul.mubr.msk.f32.gmra.mxu1 %vm225_vm1, %v10179_v41  ;;  %8820 = vmatprep.mubr.msk.f32.mxu0 %vm225_vm1, %v10181_v42  ;;  %v10249_v59 = vld [vmem:[#allocation2 + $0x90] sm:$0xff]  ;;  %v10275_v62 = vld [vmem:[#allocation2 + $0x99] sm:$0xff] }
  0x57   : > { %13313 = vst [vmem:[#allocation24_spill] sm:$0xff] %v10151_v35  ;;  %13314 = vst [vmem:[#allocation25_spill] sm:$0xff] %v10163_v37  ;;  %8870 = vmatprep.mubr.msk.f32.mxu1 %vm225_vm1, %v10183_v43  ;;  %v10277_v63 = vld [vmem:[#allocation2 + $0x98] sm:$0xff]  ;;  %v10279_v0 = vld [vmem:[#allocation2 + $0xa9] sm:$0xff] }
  0x58   : > { %13315 = vst [vmem:[#allocation26_spill] sm:$0xff] %v10167_v39  ;;  %13316 = vst [vmem:[#allocation27_spill] sm:$0xff] %v10179_v41  ;;  %v10281_v1 = vld [vmem:[#allocation2 + $0xa8] sm:$0xff]  ;;  %v10291_v2 = vld [vmem:[#allocation2 + $0xb1] sm:$0xff] }
  0x59   : > { %13317 = vst [vmem:[#allocation28_spill] sm:$0xff] %v10183_v43  ;;  %13318 = vst [vmem:[#allocation29_spill] sm:$0xff] %v10195_v45  ;;  %8821 = vmatmul.mubr.msk.f32.gmra.mxu0 %vm225_vm1, %v10193_v44  ;;  %v10293_v3 = vld [vmem:[#allocation2 + $0xb0] sm:$0xff]  ;;  %v10295_v4 = vld [vmem:[#allocation2 + $0xc1] sm:$0xff] }
  0x5a   : > { %13319 = vst [vmem:[#allocation30_spill] sm:$0xff] %v10199_v47  ;;  %13320 = vst [vmem:[#allocation31_spill] sm:$0xff] %v10203_v49  ;;  %8871 = vmatmul.mubr.msk.f32.gmra.mxu1 %vm225_vm1, %v10195_v45  ;;  %8823 = vmatprep.mubr.msk.f32.mxu0 %vm225_vm1, %v10197_v46  ;;  %v10297_v12 = vld [vmem:[#allocation2 + $0xc0] sm:$0xff]  ;;  %v10307_v13 = vld [vmem:[#allocation2 + $0xc9] sm:$0xff] }
  0x5b   : > { %13321 = vst [vmem:[#allocation32_spill] sm:$0xff] %v10206_v50  ;;  %13322 = vst [vmem:[#allocation33_spill] sm:$0xff] %v10209_v51  ;;  %8873 = vmatprep.mubr.msk.f32.mxu1 %vm225_vm1, %v10199_v47  ;;  %v10309_v14 = vld [vmem:[#allocation2 + $0xc8] sm:$0xff]  ;;  %v10311_v15 = vld [vmem:[#allocation2 + $0xd9] sm:$0xff] }
  0x5c   : > { %388 = vst.msk [vmem:[#allocation2 + $0x109] sm:$0xff] %vm225_vm1, %v10206_v50  ;;  %389 = vst.msk [vmem:[#allocation2 + $0x111] sm:$0xff] %vm225_vm1, %v10209_v51 }
  0x5d   : > { %13323 = vst [vmem:[#allocation34_spill] sm:$0xff] %v10222_v53  ;;  %13324 = vst [vmem:[#allocation35_spill] sm:$0xff] %v10225_v54  ;;  %8824 = vmatmul.mubr.msk.f32.gmra.mxu0 %vm225_vm1, %v10201_v48  ;;  %v10350_v50 = vld [vmem:[#allocation2 + $0xf9] sm:$0xff] }
  0x5e   : > { %13325 = vst [vmem:[#allocation36_spill] sm:$0xff] %v10228_v55  ;;  %390 = vst.msk [vmem:[#allocation2 + $0x121] sm:$0xff] %vm225_vm1, %v10222_v53  ;;  %8874 = vmatmul.mubr.msk.f32.gmra.mxu1 %vm225_vm1, %v10203_v49  ;;  %8826 = vmatprep.mubr.msk.f32.mxu0 %vm225_vm1, %v10215_v52  ;;  %v10341_v53 = vld [vmem:[%s13190_s1 + $0x14] sm:$0xf]  ;;  %v10352_v51 = vld [vmem:[#allocation2 + $0xf8] sm:$0xff] }
  0x5f   : > { %391 = vst.msk [vmem:[#allocation2 + $0x129] sm:$0xff] %vm225_vm1, %v10225_v54  ;;  %392 = vst.msk [vmem:[#allocation2 + $0x139] sm:$0xff] %vm225_vm1, %v10228_v55  ;;  %8876 = vmatprep.mubr.msk.f32.mxu1 %vm225_vm1, %v10249_v59  ;;  %v10329_v55 = vld [vmem:[#allocation2 + $0xf0] sm:$0xff]  ;;  %v10344_v54 = vld [vmem:[%s10021_s7 + $0xf8] sm:$0xff]  ;;  %9056 = vmatprep.subr.msk.mxu1 %vm563_vm0, %v10341_v53 }
  0x60   : > { %13326 = vst [vmem:[#allocation37_spill] sm:$0xff] %v10241_v56  ;;  %13327 = vst [vmem:[#allocation38_spill] sm:$0xff] %v10244_v57 }
  0x61   : > { %13328 = vst [vmem:[#allocation39_spill] sm:$0xff] %v10247_v58  ;;  %13329 = vst [vmem:[#allocation40_spill] sm:$0xff] %v10249_v59  ;;  %8827 = vmatmul.mubr.msk.f32.gmra.mxu0 %vm225_vm1, %v10275_v62 }
  0x62   : > { %393 = vst.msk [vmem:[#allocation2 + $0x141] sm:$0xff] %vm225_vm1, %v10241_v56  ;;  %394 = vst.msk [vmem:[#allocation2 + $0x151] sm:$0xff] %vm225_vm1, %v10244_v57  ;;  %8877 = vmatmul.mubr.msk.f32.gmra.mxu1 %vm225_vm1, %v10277_v63  ;;  %8829 = vmatprep.mubr.msk.f32.mxu0 %vm225_vm1, %v10279_v0  ;;  %v10325_v57 = vld [vmem:[#allocation2 + $0xe0] sm:$0xff]  ;;  %v10336_v56 = vld [vmem:[%s10021_s7 + $0xf0] sm:$0xff] }
  0x63   : > { %395 = vst.msk [vmem:[#allocation2 + $0x159] sm:$0xff] %vm225_vm1, %v10247_v58  ;;  %13330 = vst [vmem:[#allocation41_spill] sm:$0xff] %v10258_v60  ;;  %8879 = vmatprep.mubr.msk.f32.mxu1 %vm225_vm1, %v10281_v1  ;;  %v10327_v58 = vld [vmem:[#allocation2 + $0xf1] sm:$0xff]  ;;  %v10358_v28 = vld [vmem:[#allocation2 + $0x109] sm:$0xff] }
  0x64   : > { %13331 = vst [vmem:[#allocation42_spill] sm:$0xff] %v10261_v61  ;;  %396 = vst.msk [vmem:[#allocation2 + $0x169] sm:$0xff] %vm225_vm1, %v10258_v60  ;;  %v10313_v60 = vld [vmem:[#allocation2 + $0xd8] sm:$0xff]  ;;  %v10360_v29 = vld [vmem:[#allocation2 + $0x108] sm:$0xff] }
  0x65   : > { %397 = vst.msk [vmem:[#allocation2 + $0x171] sm:$0xff] %vm225_vm1, %v10261_v61  ;;  %13332 = vst [vmem:[#allocation43_spill] sm:$0xff] %v10277_v63  ;;  %8830 = vmatmul.mubr.msk.f32.gmra.mxu0 %vm225_vm1, %v10291_v2  ;;  %v10323_v61 = vld [vmem:[#allocation2 + $0xe1] sm:$0xff] }
  0x66   : > { %13333 = vst [vmem:[#allocation44_spill] sm:$0xff] %v10281_v1  ;;  %13334 = vst [vmem:[#allocation45_spill] sm:$0xff] %v10293_v3  ;;  %8880 = vmatmul.mubr.msk.f32.gmra.mxu1 %vm225_vm1, %v10293_v3  ;;  %8832 = vmatprep.mubr.msk.f32.mxu0 %vm225_vm1, %v10295_v4  ;;  %v10376_v26 = vld [vmem:[#allocation2 + $0x121] sm:$0xff]  ;;  %v10388_v24 = vld [vmem:[#allocation2 + $0x129] sm:$0xff] }
  0x67   : > { %13335 = vst [vmem:[#allocation46_spill] sm:$0xff] %v10297_v12  ;;  %8882 = vmatprep.mubr.msk.f32.mxu1 %vm225_vm1, %v10297_v12  ;;  %13336 = vst [vmem:[#allocation47_spill] sm:$0xff] %v10309_v14  ;;  %v10378_v27 = vld [vmem:[#allocation2 + $0x120] sm:$0xff]  ;;  %v10390_v25 = vld [vmem:[#allocation2 + $0x128] sm:$0xff] }
  0x68   : > { %13337 = vst [vmem:[#allocation48_spill] sm:$0xff] %v10313_v60  ;;  %13338 = vst [vmem:[#allocation49_spill] sm:$0xff] %v10325_v57  ;;  %v10392_v22 = vld [vmem:[#allocation2 + $0x139] sm:$0xff] }
  0x69   : > { %8833 = vmatmul.mubr.msk.f32.gmra.mxu0 %vm225_vm1, %v10307_v13  ;;  %13339 = vst [vmem:[#allocation50_spill] sm:$0xff] %v10329_v55  ;;  %13340 = vst [vmem:[#allocation51_spill] sm:$0xff] %v10336_v56  ;;  %v10394_v23 = vld [vmem:[#allocation2 + $0x138] sm:$0xff]  ;;  %v10404_v20 = vld [vmem:[#allocation2 + $0x141] sm:$0xff] }
  0x6a   : > { %8883 = vmatmul.mubr.msk.f32.gmra.mxu1 %vm225_vm1, %v10309_v14  ;;  %8835 = vmatprep.mubr.msk.f32.mxu0 %vm225_vm1, %v10311_v15  ;;  %13341 = vst [vmem:[#allocation52_spill] sm:$0xff] %v10344_v54  ;;  %13342 = vst [vmem:[#allocation53_spill] sm:$0xff] %v10352_v51  ;;  %v10406_v21 = vld [vmem:[#allocation2 + $0x140] sm:$0xff]  ;;  %v10408_v18 = vld [vmem:[#allocation2 + $0x151] sm:$0xff] }
  0x6b   : > { %8885 = vmatprep.mubr.msk.f32.mxu1 %vm225_vm1, %v10313_v60  ;;  %398 = vst.msk [vmem:[#allocation2 + $0x181] sm:$0xff] %vm225_vm1, %v10336_v56  ;;  %399 = vst.msk [vmem:[#allocation2 + $0x189] sm:$0xff] %vm225_vm1, %v10344_v54  ;;  %v10372_v56 = vld [vmem:[#allocation2 + $0x111] sm:$0xff]  ;;  %v10420_v16 = vld [vmem:[#allocation2 + $0x159] sm:$0xff] }
  0x6c   : > { %13343 = vst [vmem:[#allocation54_spill] sm:$0xff] %v10360_v29  ;;  %v10374_v54 = vld [vmem:[#allocation2 + $0x110] sm:$0xff]  ;;  %13345 = vst [vmem:[#allocation56_spill] sm:$0xff] %v10378_v27  ;;  %v10422_v17 = vld [vmem:[#allocation2 + $0x158] sm:$0xff] }
  0x6d   : > { %8836 = vmatmul.mubr.msk.f32.gmra.mxu0 %vm225_vm1, %v10323_v61  ;;  %13344 = vst [vmem:[#allocation55_spill] sm:$0xff] %v10374_v54  ;;  %13346 = vst [vmem:[#allocation57_spill] sm:$0xff] %v10390_v25  ;;  %v10410_v19 = vld [vmem:[#allocation2 + $0x150] sm:$0xff]  ;;  %v10426_v10 = vld [vmem:[#allocation2 + $0x168] sm:$0xff] }
  0x6e   : > { %8886 = vmatmul.mubr.msk.f32.gmra.mxu1 %vm225_vm1, %v10325_v57  ;;  %8838 = vmatprep.mubr.msk.f32.mxu0 %vm225_vm1, %v10327_v58  ;;  %13347 = vst [vmem:[#allocation58_spill] sm:$0xff] %v10394_v23  ;;  %13348 = vst [vmem:[#allocation59_spill] sm:$0xff] %v10406_v21  ;;  %v10424_v9 = vld [vmem:[#allocation2 + $0x169] sm:$0xff]  ;;  %v10436_v7 = vld [vmem:[#allocation2 + $0x171] sm:$0xff] }
  0x6f   : > { %8888 = vmatprep.mubr.msk.f32.mxu1 %vm225_vm1, %v10329_v55  ;;  %13349 = vst [vmem:[#allocation60_spill] sm:$0xff] %v10410_v19  ;;  %13350 = vst [vmem:[#allocation61_spill] sm:$0xff] %v10422_v17  ;;  %v10438_v8 = vld [vmem:[#allocation2 + $0x170] sm:$0xff] }
  0x70   : > { %13351 = vst [vmem:[#allocation62_spill] sm:$0xff] %v10424_v9  ;;  %13352 = vst [vmem:[#allocation63_spill] sm:$0xff] %v10436_v7 }
  0x71   : > { %8839 = vmatmul.mubr.msk.f32.gmra.mxu0 %vm225_vm1, %v10350_v50 }
  0x72   : > { %8889 = vmatmul.mubr.msk.f32.gmra.mxu1 %vm225_vm1, %v10352_v51  ;;  %8841 = vmatprep.mubr.msk.f32.mxu0 %vm225_vm1, %v10358_v28 }
  0x73   : > { %8891 = vmatprep.mubr.msk.f32.mxu1 %vm225_vm1, %v10360_v29 }
  0x75   : > { %8842 = vmatmul.mubr.msk.f32.gmra.mxu0 %vm225_vm1, %v10372_v56 }
  0x76   : > { %8892 = vmatmul.mubr.msk.f32.gmra.mxu1 %vm225_vm1, %v10374_v54  ;;  %8844 = vmatprep.mubr.msk.f32.mxu0 %vm225_vm1, %v10376_v26 }
  0x77   : > { %8894 = vmatprep.mubr.msk.f32.mxu1 %vm225_vm1, %v10378_v27 }
  0x79   : > { %8845 = vmatmul.mubr.msk.f32.gmra.mxu0 %vm225_vm1, %v10388_v24 }
  0x7a   : > { %8895 = vmatmul.mubr.msk.f32.gmra.mxu1 %vm225_vm1, %v10390_v25  ;;  %8847 = vmatprep.mubr.msk.f32.mxu0 %vm225_vm1, %v10392_v22 }
  0x7b   : > { %8897 = vmatprep.mubr.msk.f32.mxu1 %vm225_vm1, %v10394_v23 }
  0x7d   : > { %8848 = vmatmul.mubr.msk.f32.gmra.mxu0 %vm225_vm1, %v10404_v20 }
  0x7e   : > { %8898 = vmatmul.mubr.msk.f32.gmra.mxu1 %vm225_vm1, %v10406_v21  ;;  %8850 = vmatprep.mubr.msk.f32.mxu0 %vm225_vm1, %v10408_v18 }
  0x7f   : > { %8900 = vmatprep.mubr.msk.f32.mxu1 %vm225_vm1, %v10410_v19 }
  0x81   : > { %8851 = vmatmul.mubr.msk.f32.gmra.mxu0 %vm225_vm1, %v10420_v16 }
  0x82   : > { %8901 = vmatmul.mubr.msk.f32.gmra.mxu1 %vm225_vm1, %v10422_v17  ;;  %8853 = vmatprep.mubr.msk.f32.mxu0 %vm225_vm1, %v10424_v9  ;;  %v10447_v9 = vld [vmem:[#allocation2 + $0x1a] sm:$0xff] }
  0x83   : > { %8903 = vmatprep.mubr.msk.f32.mxu1 %vm225_vm1, %v10426_v10 }
  0x85   : > { %8854 = vmatmul.mubr.msk.f32.gmra.mxu0 %vm225_vm1, %v10436_v7  ;;  %v10455_v7 = vld [vmem:[%s13190_s1 + $0x18] sm:$0xf] }
  0x86   : > { %8904 = vmatmul.mubr.msk.f32.gmra.mxu1 %vm225_vm1, %v10438_v8  ;;  %8908 = vmatprep.mubr.msk.f32.mxu0 %vm225_vm1, %v1116_v5  ;;  %v10460_v5 = vld [vmem:[%s13190_s1 + $0x1c] sm:$0xf] }
  0x87   : > { %8958 = vmatprep.mubr.msk.f32.mxu1 %vm225_vm1, %v10133_v31  ;;  %v10470_v31 = vld [vmem:[#allocation2 + $0x32] sm:$0xff] }
  0x89   : > { %8909 = vmatmul.mubr.msk.f32.vlgmr.msra.gmra.mxu0 %vm225_vm1, %v1117_v6  ;;  %v10466_v6 = vld [vmem:[#allocation2 + $0x22] sm:$0xff] }
  0x8a   : > { %8959 = vmatmul.mubr.msk.f32.vlgmr.msra.gmra.mxu1 %vm225_vm1, %v10147_v33  ;;  %9007 = vmatpush3.msk.msra.mxu0 %vm563_vm0, %v10050_v11  ;;  %v10484_v11 = vld [vmem:[#allocation2 + $0x3a] sm:$0xff]  ;;  %v10488_v33 = vld [vmem:[#allocation2 + $0x4a] sm:$0xff] }
  0x8b   : > { %8911 = vmatprep.mubr.msk.f32.mxu0 %vm225_vm1, %v10447_v9  ;;  %8961 = vmatprep.mubr.msk.f32.mxu1 %vm225_vm1, %v10151_v35  ;;  %v10634_v35 = vld [vmem:[#allocation2 + $0x180] sm:$0xff] }
  0x8c   : > { %9057 = vmatpush3.msk.msra.mxu1 %vm563_vm0, %v10341_v53  ;;  %9106 = vmatprep.subr.msk.mxu0 %vm563_vm0, %v10455_v7  ;;  %v10496_v53 = vld [vmem:[#allocation2 + $0x52] sm:$0xff]  ;;  %13353 = vst [vmem:[#allocation64_spill] sm:$0xff] %v10634_v35 }
  0x8d   : > { %9156 = vmatprep.subr.msk.mxu1 %vm563_vm0, %v10460_v5  ;;  %8912 = vmatmul.mubr.msk.f32.gmra.mxu0 %vm225_vm1, %v10466_v6 }
  0x8e   : > { %8962 = vmatmul.mubr.msk.f32.gmra.mxu1 %vm225_vm1, %v10163_v37  ;;  %8914 = vmatprep.mubr.msk.f32.mxu0 %vm225_vm1, %v10470_v31  ;;  %v10500_v37 = vld [vmem:[#allocation2 + $0x62] sm:$0xff] }
  0x8f   : > { %8964 = vmatprep.mubr.msk.f32.mxu1 %vm225_vm1, %v10167_v39  ;;  %v10512_v39 = vld [vmem:[#allocation2 + $0x7a] sm:$0xff] }
  0x91   : > { %8915 = vmatmul.mubr.msk.f32.gmra.mxu0 %vm225_vm1, %v10484_v11 }
  0x92   : > { %8965 = vmatmul.mubr.msk.f32.gmra.mxu1 %vm225_vm1, %v10179_v41  ;;  %8917 = vmatprep.mubr.msk.f32.mxu0 %vm225_vm1, %v10488_v33  ;;  %v10508_v41 = vld [vmem:[#allocation2 + $0x6a] sm:$0xff] }
  0x93   : > { %8967 = vmatprep.mubr.msk.f32.mxu1 %vm225_vm1, %v10183_v43  ;;  %v10524_v43 = vld [vmem:[#allocation2 + $0x92] sm:$0xff] }
  0x95   : > { %8918 = vmatmul.mubr.msk.f32.gmra.mxu0 %vm225_vm1, %v10496_v53 }
  0x96   : > { %8968 = vmatmul.mubr.msk.f32.gmra.mxu1 %vm225_vm1, %v10195_v45  ;;  %8920 = vmatprep.mubr.msk.f32.mxu0 %vm225_vm1, %v10500_v37  ;;  %v10520_v45 = vld [vmem:[#allocation2 + $0x82] sm:$0xff] }
  0x97   : > { %8970 = vmatprep.mubr.msk.f32.mxu1 %vm225_vm1, %v10199_v47  ;;  %v10536_v47 = vld [vmem:[#allocation2 + $0xaa] sm:$0xff] }
  0x99   : > { %8921 = vmatmul.mubr.msk.f32.gmra.mxu0 %vm225_vm1, %v10508_v41 }
  0x9a   : > { %8971 = vmatmul.mubr.msk.f32.gmra.mxu1 %vm225_vm1, %v10203_v49  ;;  %8923 = vmatprep.mubr.msk.f32.mxu0 %vm225_vm1, %v10512_v39  ;;  %v10532_v49 = vld [vmem:[#allocation2 + $0x9a] sm:$0xff] }
  0x9b   : > { %8973 = vmatprep.mubr.msk.f32.mxu1 %vm225_vm1, %v10249_v59  ;;  %v10548_v59 = vld [vmem:[#allocation2 + $0xc2] sm:$0xff] }
  0x9d   : > { %8924 = vmatmul.mubr.msk.f32.gmra.mxu0 %vm225_vm1, %v10520_v45 }
  0x9e   : > { %8974 = vmatmul.mubr.msk.f32.gmra.mxu1 %vm225_vm1, %v10277_v63  ;;  %8926 = vmatprep.mubr.msk.f32.mxu0 %vm225_vm1, %v10524_v43  ;;  %v10544_v63 = vld [vmem:[#allocation2 + $0xb2] sm:$0xff] }
  0x9f   : > { %8976 = vmatprep.mubr.msk.f32.mxu1 %vm225_vm1, %v10281_v1  ;;  %v10560_v1 = vld [vmem:[#allocation2 + $0xda] sm:$0xff] }
  0xa1   : > { %8927 = vmatmul.mubr.msk.f32.gmra.mxu0 %vm225_vm1, %v10532_v49 }
  0xa2   : > { %8977 = vmatmul.mubr.msk.f32.gmra.mxu1 %vm225_vm1, %v10293_v3  ;;  %8929 = vmatprep.mubr.msk.f32.mxu0 %vm225_vm1, %v10536_v47  ;;  %v10556_v3 = vld [vmem:[#allocation2 + $0xca] sm:$0xff] }
  0xa3   : > { %8979 = vmatprep.mubr.msk.f32.mxu1 %vm225_vm1, %v10297_v12  ;;  %v10572_v12 = vld [vmem:[#allocation2 + $0xf2] sm:$0xff] }
  0xa5   : > { %8930 = vmatmul.mubr.msk.f32.gmra.mxu0 %vm225_vm1, %v10544_v63 }
  0xa6   : > { %8980 = vmatmul.mubr.msk.f32.gmra.mxu1 %vm225_vm1, %v10309_v14  ;;  %8932 = vmatprep.mubr.msk.f32.mxu0 %vm225_vm1, %v10548_v59  ;;  %v10568_v14 = vld [vmem:[#allocation2 + $0xe2] sm:$0xff] }
  0xa7   : > { %8982 = vmatprep.mubr.msk.f32.mxu1 %vm225_vm1, %v10313_v60  ;;  %v10584_v60 = vld [vmem:[#allocation2 + $0x10a] sm:$0xff] }
  0xa9   : > { %8933 = vmatmul.mubr.msk.f32.gmra.mxu0 %vm225_vm1, %v10556_v3 }
  0xaa   : > { %8983 = vmatmul.mubr.msk.f32.gmra.mxu1 %vm225_vm1, %v10325_v57  ;;  %8935 = vmatprep.mubr.msk.f32.mxu0 %vm225_vm1, %v10560_v1  ;;  %v10580_v57 = vld [vmem:[#allocation2 + $0xfa] sm:$0xff] }
  0xab   : > { %8985 = vmatprep.mubr.msk.f32.mxu1 %vm225_vm1, %v10329_v55  ;;  %v10596_v55 = vld [vmem:[#allocation2 + $0x122] sm:$0xff] }
  0xad   : > { %8936 = vmatmul.mubr.msk.f32.gmra.mxu0 %vm225_vm1, %v10568_v14 }
  0xae   : > { %8986 = vmatmul.mubr.msk.f32.gmra.mxu1 %vm225_vm1, %v10352_v51  ;;  %8938 = vmatprep.mubr.msk.f32.mxu0 %vm225_vm1, %v10572_v12  ;;  %v10592_v51 = vld [vmem:[#allocation2 + $0x112] sm:$0xff] }
  0xaf   : > { %8988 = vmatprep.mubr.msk.f32.mxu1 %vm225_vm1, %v10360_v29  ;;  %v10608_v29 = vld [vmem:[#allocation2 + $0x13a] sm:$0xff] }
  0xb1   : > { %8939 = vmatmul.mubr.msk.f32.gmra.mxu0 %vm225_vm1, %v10580_v57 }
  0xb2   : > { %8989 = vmatmul.mubr.msk.f32.gmra.mxu1 %vm225_vm1, %v10374_v54  ;;  %8941 = vmatprep.mubr.msk.f32.mxu0 %vm225_vm1, %v10584_v60  ;;  %v10604_v54 = vld [vmem:[#allocation2 + $0x12a] sm:$0xff] }
  0xb3   : > { %8991 = vmatprep.mubr.msk.f32.mxu1 %vm225_vm1, %v10378_v27  ;;  %v10620_v27 = vld [vmem:[#allocation2 + $0x152] sm:$0xff] }
  0xb5   : > { %8942 = vmatmul.mubr.msk.f32.gmra.mxu0 %vm225_vm1, %v10592_v51 }
  0xb6   : > { %8992 = vmatmul.mubr.msk.f32.gmra.mxu1 %vm225_vm1, %v10390_v25  ;;  %8944 = vmatprep.mubr.msk.f32.mxu0 %vm225_vm1, %v10596_v55  ;;  %v10616_v25 = vld [vmem:[#allocation2 + $0x142] sm:$0xff] }
  0xb7   : > { %8994 = vmatprep.mubr.msk.f32.mxu1 %vm225_vm1, %v10394_v23  ;;  %v10632_v23 = vld [vmem:[#allocation2 + $0x16a] sm:$0xff] }
  0xb9   : > { %8945 = vmatmul.mubr.msk.f32.gmra.mxu0 %vm225_vm1, %v10604_v54 }
  0xba   : > { %8995 = vmatmul.mubr.msk.f32.gmra.mxu1 %vm225_vm1, %v10406_v21  ;;  %8947 = vmatprep.mubr.msk.f32.mxu0 %vm225_vm1, %v10608_v29  ;;  %v10628_v21 = vld [vmem:[#allocation2 + $0x15a] sm:$0xff] }
  0xbb   : > { %8997 = vmatprep.mubr.msk.f32.mxu1 %vm225_vm1, %v10410_v19  ;;  %v10646_v19 = vld [vmem:[#allocation2 + $0x188] sm:$0xff] }
  0xbd   : > { %8948 = vmatmul.mubr.msk.f32.gmra.mxu0 %vm225_vm1, %v10616_v25 }
  0xbe   : > { %8998 = vmatmul.mubr.msk.f32.gmra.mxu1 %vm225_vm1, %v10422_v17  ;;  %8950 = vmatprep.mubr.msk.f32.mxu0 %vm225_vm1, %v10620_v27  ;;  %v10642_v17 = vld [vmem:[#allocation2 + $0x172] sm:$0xff] }
  0xbf   : > { %9000 = vmatprep.mubr.msk.f32.mxu1 %vm225_vm1, %v10426_v10 }
  0xc1   : > { %8951 = vmatmul.mubr.msk.f32.gmra.mxu0 %vm225_vm1, %v10628_v21 }
  0xc2   : > { %9001 = vmatmul.mubr.msk.f32.gmra.mxu1 %vm225_vm1, %v10438_v8  ;;  %8953 = vmatprep.mubr.msk.f32.mxu0 %vm225_vm1, %v10632_v23 }
  0xc3   : > { %9003 = vmatprep.mubr.msk.f32.mxu1 %vm225_vm1, %v10634_v35  ;;  %v10663_v35 = vld [vmem:[%s13190_s1 + $0x20] sm:$0xf] }
  0xc5   : > { %8954 = vmatmul.mubr.msk.f32.gmra.mxu0 %vm225_vm1, %v10642_v17 }
  0xc6   : > { %9004 = vmatmul.mubr.msk.f32.gmra.mxu1 %vm225_vm1, %v10646_v19  ;;  %9008 = vmatprep.mubr.msk.f32.mxu0 %vm225_vm1, %v10131_v30 }
  0xc7   : > { %9058 = vmatprep.mubr.msk.f32.mxu1 %vm225_vm1, %v10447_v9  ;;  %v10779_v9 = vld [vmem:[#allocation2 + $0x181] sm:$0xff] }
  0xc9   : > { %9009 = vmatmul.mubr.msk.f32.vlgmr.msra.gmra.mxu0 %vm225_vm1, %v10135_v32 }
  0xca   : > { %9059 = vmatmul.mubr.msk.f32.vlgmr.msra.gmra.mxu1 %vm225_vm1, %v10466_v6  ;;  %9107 = vmatpush3.msk.msra.mxu0 %vm563_vm0, %v10455_v7  ;;  %v13354_v7 = vld [vmem:[#allocation62_spill] sm:$0xff]  ;;  %v13359_v6 = vld [vmem:[#allocation27_spill] sm:$0xff] }
  0xcb   : > { %9011 = vmatprep.mubr.msk.f32.mxu0 %vm225_vm1, %v10149_v34  ;;  %9061 = vmatprep.mubr.msk.f32.mxu1 %vm225_vm1, %v10470_v31 }
  0xcc   : > { %9157 = vmatpush3.msk.msra.mxu1 %vm563_vm0, %v10460_v5  ;;  %9206 = vmatprep.subr.msk.mxu0 %vm563_vm0, %v10663_v35 }
  0xcd   : > { %9012 = vmatmul.mubr.msk.f32.gmra.mxu0 %vm225_vm1, %v10161_v36 }
  0xce   : > { %9062 = vmatmul.mubr.msk.f32.gmra.mxu1 %vm225_vm1, %v10484_v11  ;;  %9014 = vmatprep.mubr.msk.f32.mxu0 %vm225_vm1, %v10165_v38 }
  0xcf   : > { %9064 = vmatprep.mubr.msk.f32.mxu1 %vm225_vm1, %v10488_v33 }
  0xd1   : > { %9015 = vmatmul.mubr.msk.f32.gmra.mxu0 %vm225_vm1, %v10177_v40 }
  0xd2   : > { %9065 = vmatmul.mubr.msk.f32.gmra.mxu1 %vm225_vm1, %v10496_v53  ;;  %9017 = vmatprep.mubr.msk.f32.mxu0 %vm225_vm1, %v10181_v42 }
  0xd3   : > { %9067 = vmatprep.mubr.msk.f32.mxu1 %vm225_vm1, %v10500_v37 }
  0xd5   : > { %9018 = vmatmul.mubr.msk.f32.gmra.mxu0 %vm225_vm1, %v10193_v44 }
  0xd6   : > { %9068 = vmatmul.mubr.msk.f32.gmra.mxu1 %vm225_vm1, %v10508_v41  ;;  %9020 = vmatprep.mubr.msk.f32.mxu0 %vm225_vm1, %v10197_v46 }
  0xd7   : > { %9070 = vmatprep.mubr.msk.f32.mxu1 %vm225_vm1, %v10512_v39  ;;  %v8860_v30 = vpop.f32.mrf.mxu1 }
  0xd9   : > { %9021 = vmatmul.mubr.msk.f32.gmra.mxu0 %vm225_vm1, %v10201_v48 }
  0xda   : > { %9071 = vmatmul.mubr.msk.f32.gmra.mxu1 %vm225_vm1, %v10520_v45  ;;  %9023 = vmatprep.mubr.msk.f32.mxu0 %vm225_vm1, %v10215_v52 }
  0xdb   : > { %9073 = vmatprep.mubr.msk.f32.mxu1 %vm225_vm1, %v10524_v43 }
  0xdd   : > { %9024 = vmatmul.mubr.msk.f32.gmra.mxu0 %vm225_vm1, %v10275_v62 }
  0xde   : > { %9074 = vmatmul.mubr.msk.f32.gmra.mxu1 %vm225_vm1, %v10532_v49  ;;  %9026 = vmatprep.mubr.msk.f32.mxu0 %vm225_vm1, %v10279_v0 }
  0xdf   : > { %9076 = vmatprep.mubr.msk.f32.mxu1 %vm225_vm1, %v10536_v47 }
  0xe1   : > { %9027 = vmatmul.mubr.msk.f32.gmra.mxu0 %vm225_vm1, %v10291_v2 }
  0xe2   : > { %9077 = vmatmul.mubr.msk.f32.gmra.mxu1 %vm225_vm1, %v10544_v63  ;;  %9029 = vmatprep.mubr.msk.f32.mxu0 %vm225_vm1, %v10295_v4 }
  0xe3   : > { %9079 = vmatprep.mubr.msk.f32.mxu1 %vm225_vm1, %v10548_v59 }
  0xe5   : > { %9030 = vmatmul.mubr.msk.f32.gmra.mxu0 %vm225_vm1, %v10307_v13 }
  0xe6   : > { %9080 = vmatmul.mubr.msk.f32.gmra.mxu1 %vm225_vm1, %v10556_v3  ;;  %9032 = vmatprep.mubr.msk.f32.mxu0 %vm225_vm1, %v10311_v15 }
  0xe7   : > { %9082 = vmatprep.mubr.msk.f32.mxu1 %vm225_vm1, %v10560_v1 }
  0xe9   : > { %9033 = vmatmul.mubr.msk.f32.gmra.mxu0 %vm225_vm1, %v10323_v61 }
  0xea   : > { %9083 = vmatmul.mubr.msk.f32.gmra.mxu1 %vm225_vm1, %v10568_v14  ;;  %9035 = vmatprep.mubr.msk.f32.mxu0 %vm225_vm1, %v10327_v58 }
  0xeb   : > { %9085 = vmatprep.mubr.msk.f32.mxu1 %vm225_vm1, %v10572_v12 }
  0xed   : > { %9036 = vmatmul.mubr.msk.f32.gmra.mxu0 %vm225_vm1, %v10350_v50 }
  0xee   : > { %9086 = vmatmul.mubr.msk.f32.gmra.mxu1 %vm225_vm1, %v10580_v57  ;;  %9038 = vmatprep.mubr.msk.f32.mxu0 %vm225_vm1, %v10358_v28 }
  0xef   : > { %9088 = vmatprep.mubr.msk.f32.mxu1 %vm225_vm1, %v10584_v60  ;;  %v13358_v60 = vld [vmem:[#allocation26_spill] sm:$0xff] }
  0xf1   : > { %9039 = vmatmul.mubr.msk.f32.gmra.mxu0 %vm225_vm1, %v10372_v56 }
  0xf2   : > { %9089 = vmatmul.mubr.msk.f32.gmra.mxu1 %vm225_vm1, %v10592_v51  ;;  %9041 = vmatprep.mubr.msk.f32.mxu0 %vm225_vm1, %v10376_v26 }
  0xf3   : > { %9091 = vmatprep.mubr.msk.f32.mxu1 %vm225_vm1, %v10596_v55  ;;  %v13357_v55 = vld [vmem:[#allocation25_spill] sm:$0xff] }
  0xf5   : > { %9042 = vmatmul.mubr.msk.f32.gmra.mxu0 %vm225_vm1, %v10388_v24 }
  0xf6   : > { %9092 = vmatmul.mubr.msk.f32.gmra.mxu1 %vm225_vm1, %v10604_v54  ;;  %9044 = vmatprep.mubr.msk.f32.mxu0 %vm225_vm1, %v10392_v22  ;;  %v957_v54 = vpop.f32.mrf.mxu1 }
  0xf7   : > { %9094 = vmatprep.mubr.msk.f32.mxu1 %vm225_vm1, %v10608_v29  ;;  %v13355_v29 = vld [vmem:[#allocation63_spill] sm:$0xff] }
  0xf9   : > { %9045 = vmatmul.mubr.msk.f32.gmra.mxu0 %vm225_vm1, %v10404_v20 }
  0xfa   : > { %9095 = vmatmul.mubr.msk.f32.gmra.mxu1 %vm225_vm1, %v10616_v25  ;;  %9047 = vmatprep.mubr.msk.f32.mxu0 %vm225_vm1, %v10408_v18  ;;  %v10781_v25 = vld [vmem:[#allocation2 + $0x182] sm:$0xff] }
  0xfb   : > { %9097 = vmatprep.mubr.msk.f32.mxu1 %vm225_vm1, %v10620_v27  ;;  %v10793_v27 = vld [vmem:[#allocation2 + $0x18a] sm:$0xff] }
  0xfd   : > { %9048 = vmatmul.mubr.msk.f32.gmra.mxu0 %vm225_vm1, %v10420_v16 }
  0xfe   : > { %9098 = vmatmul.mubr.msk.f32.gmra.mxu1 %vm225_vm1, %v10628_v21  ;;  %9050 = vmatprep.mubr.msk.f32.mxu0 %vm225_vm1, %v13354_v7  ;;  %v10789_v21 = vld [vmem:[#allocation2 + $0x189] sm:$0xff] }
  0xff   : > { %9100 = vmatprep.mubr.msk.f32.mxu1 %vm225_vm1, %v10632_v23  ;;  %v13356_v23 = vld [vmem:[#allocation24_spill] sm:$0xff] }
 0x101   : > { %9051 = vmatmul.mubr.msk.f32.gmra.mxu0 %vm225_vm1, %v13355_v29 }
 0x102   : > { %9101 = vmatmul.mubr.msk.f32.gmra.mxu1 %vm225_vm1, %v10642_v17  ;;  %9053 = vmatprep.mubr.msk.f32.mxu0 %vm225_vm1, %v10779_v9  ;;  %v8810_v17 = vpop.f32.mrf.mxu0 }
 0x103   : > { %9103 = vmatprep.mubr.msk.f32.mxu1 %vm225_vm1, %v10781_v25  ;;  %v10803_v32 = vadd.f32 %v8860_v30, %v8810_v17 }
 0x104   : > { %v633_v51 = vpop.f32.mrf.mxu0 }
 0x105   : > { %9054 = vmatmul.mubr.msk.f32.gmra.mxu0 %vm225_vm1, %v10789_v21  ;;  %v10809_v57 = vadd.f32 %v957_v54, %v633_v51  ;;  %v13361_v54 = vld [vmem:[#allocation29_spill] sm:$0xff] }
 0x106   : > { %9104 = vmatmul.mubr.msk.f32.gmra.mxu1 %vm225_vm1, %v10793_v27  ;;  %9108 = vmatprep.mubr.msk.f32.mxu0 %vm225_vm1, %v13356_v23  ;;  %v13360_v23 = vld [vmem:[#allocation28_spill] sm:$0xff] }
 0x107   : > { %9158 = vmatprep.mubr.msk.f32.mxu1 %vm225_vm1, %v10149_v34 }
 0x109   : > { %9109 = vmatmul.mubr.msk.f32.vlgmr.msra.gmra.mxu0 %vm225_vm1, %v13357_v55  ;;  %v13362_v55 = vld [vmem:[#allocation30_spill] sm:$0xff] }
 0x10a   : > { %9159 = vmatmul.mubr.msk.f32.vlgmr.msra.gmra.mxu1 %vm225_vm1, %v10161_v36  ;;  %9207 = vmatpush3.msk.msra.mxu0 %vm563_vm0, %v10663_v35 }
 0x10b   : > { %9111 = vmatprep.mubr.msk.f32.mxu0 %vm225_vm1, %v13358_v60  ;;  %9161 = vmatprep.mubr.msk.f32.mxu1 %vm225_vm1, %v10165_v38 }
 0x10d   : > { %v8813_v34 = vpop.f32.mrf.mxu0  ;;  %9112 = vmatmul.mubr.msk.f32.gmra.mxu0 %vm225_vm1, %v13359_v6 }
 0x10e   : > { %v8863_v5 = vpop.f32.mrf.mxu1  ;;  %9162 = vmatmul.mubr.msk.f32.gmra.mxu1 %vm225_vm1, %v10177_v40  ;;  %9114 = vmatprep.mubr.msk.f32.mxu0 %vm225_vm1, %v13360_v23  ;;  %v13363_v23 = vld [vmem:[#allocation31_spill] sm:$0xff] }
 0x10f   : > { %v10821_v36 = vadd.f32 %v8863_v5, %v8813_v34  ;;  %9164 = vmatprep.mubr.msk.f32.mxu1 %vm225_vm1, %v10181_v42  ;;  %v643_v35 = vpop.f32.mrf.mxu0 }
 0x110   : > { %v967_v17 = vpop.f32.mrf.mxu1 }
 0x111   : > { %v10827_v30 = vadd.f32 %v967_v17, %v643_v35  ;;  %v8816_v38 = vpop.f32.mrf.mxu0  ;;  %9115 = vmatmul.mubr.msk.f32.gmra.mxu0 %vm225_vm1, %v13361_v54  ;;  %v13364_v35 = vld [vmem:[#allocation40_spill] sm:$0xff] }
 0x112   : > { %v8866_v51 = vpop.f32.mrf.mxu1  ;;  %9165 = vmatmul.mubr.msk.f32.gmra.mxu1 %vm225_vm1, %v10193_v44  ;;  %9117 = vmatprep.mubr.msk.f32.mxu0 %vm225_vm1, %v13362_v55  ;;  %v13365_v55 = vld [vmem:[#allocation43_spill] sm:$0xff] }
 0x113   : > { %v10833_v40 = vadd.f32 %v8866_v51, %v8816_v38  ;;  %9167 = vmatprep.mubr.msk.f32.mxu1 %vm225_vm1, %v10197_v46  ;;  %v653_v42 = vpop.f32.mrf.mxu0 }
 0x114   : > { %v977_v60 = vpop.f32.mrf.mxu1 }
 0x115   : > { %v10839_v34 = vadd.f32 %v977_v60, %v653_v42  ;;  %v8819_v5 = vpop.f32.mrf.mxu0  ;;  %9118 = vmatmul.mubr.msk.f32.gmra.mxu0 %vm225_vm1, %v13363_v23  ;;  %v13366_v42 = vld [vmem:[#allocation44_spill] sm:$0xff] }
 0x116   : > { %v8869_v6 = vpop.f32.mrf.mxu1  ;;  %9168 = vmatmul.mubr.msk.f32.gmra.mxu1 %vm225_vm1, %v10201_v48  ;;  %9120 = vmatprep.mubr.msk.f32.mxu0 %vm225_vm1, %v13364_v35  ;;  %v13367_v35 = vld [vmem:[#allocation45_spill] sm:$0xff] }
 0x117   : > { %v10845_v44 = vadd.f32 %v8869_v6, %v8819_v5  ;;  %9170 = vmatprep.mubr.msk.f32.mxu1 %vm225_vm1, %v10215_v52  ;;  %v663_v46 = vpop.f32.mrf.mxu0 }
 0x118   : > { %v987_v17 = vpop.f32.mrf.mxu1 }
 0x119   : > { %v10851_v38 = vadd.f32 %v987_v17, %v663_v46  ;;  %v8822_v51 = vpop.f32.mrf.mxu0  ;;  %9121 = vmatmul.mubr.msk.f32.gmra.mxu0 %vm225_vm1, %v13365_v55  ;;  %v13368_v46 = vld [vmem:[#allocation46_spill] sm:$0xff] }
 0x11a   : > { %v8872_v54 = vpop.f32.mrf.mxu1  ;;  %9171 = vmatmul.mubr.msk.f32.gmra.mxu1 %vm225_vm1, %v10275_v62  ;;  %9123 = vmatprep.mubr.msk.f32.mxu0 %vm225_vm1, %v13366_v42  ;;  %v13369_v42 = vld [vmem:[#allocation47_spill] sm:$0xff] }
 0x11b   : > { %v10857_v48 = vadd.f32 %v8872_v54, %v8822_v51  ;;  %9173 = vmatprep.mubr.msk.f32.mxu1 %vm225_vm1, %v10279_v0  ;;  %v673_v52 = vpop.f32.mrf.mxu0 }
 0x11c   : > { %v997_v60 = vpop.f32.mrf.mxu1 }
 0x11d   : > { %v10863_v5 = vadd.f32 %v997_v60, %v673_v52  ;;  %v8825_v6 = vpop.f32.mrf.mxu0  ;;  %9124 = vmatmul.mubr.msk.f32.gmra.mxu0 %vm225_vm1, %v13367_v35  ;;  %v13370_v52 = vld [vmem:[#allocation48_spill] sm:$0xff] }
 0x11e   : > { %v8875_v23 = vpop.f32.mrf.mxu1  ;;  %9174 = vmatmul.mubr.msk.f32.gmra.mxu1 %vm225_vm1, %v10291_v2  ;;  %9126 = vmatprep.mubr.msk.f32.mxu0 %vm225_vm1, %v13368_v46  ;;  %v13371_v46 = vld [vmem:[#allocation49_spill] sm:$0xff] }
 0x11f   : > { %v10869_v62 = vadd.f32 %v8875_v23, %v8825_v6  ;;  %9176 = vmatprep.mubr.msk.f32.mxu1 %vm225_vm1, %v10295_v4  ;;  %v683_v0 = vpop.f32.mrf.mxu0 }
 0x120   : > { %v1007_v17 = vpop.f32.mrf.mxu1 }
 0x121   : > { %v10875_v51 = vadd.f32 %v1007_v17, %v683_v0  ;;  %v8828_v54 = vpop.f32.mrf.mxu0  ;;  %9127 = vmatmul.mubr.msk.f32.gmra.mxu0 %vm225_vm1, %v13369_v42  ;;  %v13372_v0 = vld [vmem:[#allocation50_spill] sm:$0xff] }
 0x122   : > { %v8878_v55 = vpop.f32.mrf.mxu1  ;;  %9177 = vmatmul.mubr.msk.f32.gmra.mxu1 %vm225_vm1, %v10307_v13  ;;  %9129 = vmatprep.mubr.msk.f32.mxu0 %vm225_vm1, %v13370_v52  ;;  %v13373_v52 = vld [vmem:[#allocation53_spill] sm:$0xff] }
 0x123   : > { %v10881_v2 = vadd.f32 %v8878_v55, %v8828_v54  ;;  %9179 = vmatprep.mubr.msk.f32.mxu1 %vm225_vm1, %v10311_v15  ;;  %v693_v4 = vpop.f32.mrf.mxu0 }
 0x124   : > { %v1017_v60 = vpop.f32.mrf.mxu1 }
 0x125   : > { %v10887_v6 = vadd.f32 %v1017_v60, %v693_v4  ;;  %v8831_v23 = vpop.f32.mrf.mxu0  ;;  %9130 = vmatmul.mubr.msk.f32.gmra.mxu0 %vm225_vm1, %v13371_v46  ;;  %v13374_v4 = vld [vmem:[#allocation54_spill] sm:$0xff]  ;;  %v13375_v46 = vld [vmem:[#allocation55_spill] sm:$0xff] }
 0x126   : > { %v8881_v35 = vpop.f32.mrf.mxu1  ;;  %9180 = vmatmul.mubr.msk.f32.gmra.mxu1 %vm225_vm1, %v10323_v61  ;;  %9132 = vmatprep.mubr.msk.f32.mxu0 %vm225_vm1, %v13372_v0  ;;  %v13376_v0 = vld [vmem:[#allocation56_spill] sm:$0xff] }
 0x127   : > { %v10893_v13 = vadd.f32 %v8881_v35, %v8831_v23  ;;  %9182 = vmatprep.mubr.msk.f32.mxu1 %vm225_vm1, %v10327_v58  ;;  %v703_v15 = vpop.f32.mrf.mxu0 }
 0x128   : > { %v1027_v17 = vpop.f32.mrf.mxu1 }
 0x129   : > { %v10899_v54 = vadd.f32 %v1027_v17, %v703_v15  ;;  %v8834_v55 = vpop.f32.mrf.mxu0  ;;  %9133 = vmatmul.mubr.msk.f32.gmra.mxu0 %vm225_vm1, %v13373_v52  ;;  %v13378_v52 = vld [vmem:[#allocation58_spill] sm:$0xff] }
 0x12a   : > { %v8884_v42 = vpop.f32.mrf.mxu1  ;;  %9183 = vmatmul.mubr.msk.f32.gmra.mxu1 %vm225_vm1, %v10350_v50  ;;  %9135 = vmatprep.mubr.msk.f32.mxu0 %vm225_vm1, %v13374_v4 }
 0x12b   : > { %v10905_v61 = vadd.f32 %v8884_v42, %v8834_v55  ;;  %9185 = vmatprep.mubr.msk.f32.mxu1 %vm225_vm1, %v10358_v28  ;;  %v10911_v58 = vpop.f32.mrf.mxu0  ;;  %v13377_v42 = vld [vmem:[#allocation57_spill] sm:$0xff] }
 0x12c   : > { %v10913_v60 = vpop.f32.mrf.mxu1 }
 0x12d   : > { %v8837_v23 = vpop.f32.mrf.mxu0  ;;  %9136 = vmatmul.mubr.msk.f32.gmra.mxu0 %vm225_vm1, %v13375_v46  ;;  %v13379_v46 = vld [vmem:[#allocation59_spill] sm:$0xff] }
 0x12e   : > { %v8887_v35 = vpop.f32.mrf.mxu1  ;;  %9186 = vmatmul.mubr.msk.f32.gmra.mxu1 %vm225_vm1, %v10372_v56  ;;  %9138 = vmatprep.mubr.msk.f32.mxu0 %vm225_vm1, %v13376_v0  ;;  %v13380_v0 = vld [vmem:[#allocation60_spill] sm:$0xff] }
 0x12f   : > { %v10919_v50 = vadd.f32 %v8887_v35, %v8837_v23  ;;  %9188 = vmatprep.mubr.msk.f32.mxu1 %vm225_vm1, %v10376_v26  ;;  %v10925_v28 = vpop.f32.mrf.mxu0 }
 0x130   : > { %v10927_v15 = vpop.f32.mrf.mxu1 }
 0x131   : > { %v8840_v17 = vpop.f32.mrf.mxu0  ;;  %9139 = vmatmul.mubr.msk.f32.gmra.mxu0 %vm225_vm1, %v13377_v42 }
 0x132   : > { %v8890_v55 = vpop.f32.mrf.mxu1  ;;  %9189 = vmatmul.mubr.msk.f32.gmra.mxu1 %vm225_vm1, %v10388_v24  ;;  %9141 = vmatprep.mubr.msk.f32.mxu0 %vm225_vm1, %v13378_v52  ;;  %v13381_v52 = vld [vmem:[#allocation61_spill] sm:$0xff] }
 0x133   : > { %v10933_v56 = vadd.f32 %v8890_v55, %v8840_v17  ;;  %9191 = vmatprep.mubr.msk.f32.mxu1 %vm225_vm1, %v10392_v22  ;;  %v10939_v26 = vpop.f32.mrf.mxu0 }
 0x134   : > { %v10941_v4 = vpop.f32.mrf.mxu1 }
 0x135   : > { %v8843_v23 = vpop.f32.mrf.mxu0  ;;  %9142 = vmatmul.mubr.msk.f32.gmra.mxu0 %vm225_vm1, %v13379_v46 }
 0x136   : > { %v8893_v35 = vpop.f32.mrf.mxu1  ;;  %9192 = vmatmul.mubr.msk.f32.gmra.mxu1 %vm225_vm1, %v10404_v20  ;;  %9144 = vmatprep.mubr.msk.f32.mxu0 %vm225_vm1, %v13380_v0  ;;  %v13383_v0 = vld [vmem:[#allocation64_spill] sm:$0xff] }
 0x137   : > { %v10947_v24 = vadd.f32 %v8893_v35, %v8843_v23  ;;  %9194 = vmatprep.mubr.msk.f32.mxu1 %vm225_vm1, %v10408_v18  ;;  %v10953_v22 = vpop.f32.mrf.mxu0 }
 0x138   : > { %v10955_v17 = vpop.f32.mrf.mxu1 }
 0x139   : > { %v8846_v55 = vpop.f32.mrf.mxu0  ;;  %9145 = vmatmul.mubr.msk.f32.gmra.mxu0 %vm225_vm1, %v13381_v52 }
 0x13a   : > { %v8896_v42 = vpop.f32.mrf.mxu1  ;;  %9195 = vmatmul.mubr.msk.f32.gmra.mxu1 %vm225_vm1, %v10420_v16  ;;  %9147 = vmatprep.mubr.msk.f32.mxu0 %vm225_vm1, %v10426_v10 }
 0x13b   : > { %v10961_v20 = vadd.f32 %v8896_v42, %v8846_v55  ;;  %9197 = vmatprep.mubr.msk.f32.mxu1 %vm225_vm1, %v13354_v7  ;;  %v10967_v18 = vpop.f32.mrf.mxu0  ;;  %v2707_v55 = vld [vmem:[#allocation2 + $0x198] sm:$0xff] }
 0x13c   : > { %v10969_v23 = vpop.f32.mrf.mxu1  ;;  %v3097_v42 = vld [vmem:[#allocation2 + $0x199] sm:$0xff] }
 0x13d   : > { %13382 = vst [vmem:[#allocation62_spill] sm:$0xff] %v10969_v23  ;;  %v8849_v35 = vpop.f32.mrf.mxu0  ;;  %9148 = vmatmul.mubr.msk.f32.gmra.mxu0 %vm225_vm1, %v10438_v8 }
 0x13e   : > { %v8899_v46 = vpop.f32.mrf.mxu1  ;;  %9198 = vmatmul.mubr.msk.f32.gmra.mxu1 %vm225_vm1, %v13355_v29  ;;  %9150 = vmatprep.mubr.msk.f32.mxu0 %vm225_vm1, %v13383_v0  ;;  %v2708_v29 = vld [vmem:[#allocation2 + $0x1a0] sm:$0xff] }
 0x13f   : > { %v10975_v16 = vadd.f32 %v8899_v46, %v8849_v35  ;;  %9200 = vmatprep.mubr.msk.f32.mxu1 %vm225_vm1, %v10779_v9  ;;  %v10981_v10 = vpop.f32.mrf.mxu0  ;;  %v3098_v9 = vld [vmem:[#allocation2 + $0x1a1] sm:$0xff] }
 0x140   : > { %13384 = vst [vmem:[#allocation63_spill] sm:$0xff] %v10981_v10  ;;  %v10983_v7 = vpop.f32.mrf.mxu1 }
 0x141   : > { %13385 = vst [vmem:[#allocation24_spill] sm:$0xff] %v10983_v7  ;;  %v8852_v52 = vpop.f32.mrf.mxu0  ;;  %9151 = vmatmul.mubr.msk.f32.gmra.mxu0 %vm225_vm1, %v10646_v19 }
 0x142   : > { %v8902_v23 = vpop.f32.mrf.mxu1  ;;  %9201 = vmatmul.mubr.msk.f32.gmra.mxu1 %vm225_vm1, %v10789_v21  ;;  %9153 = vmatprep.mubr.msk.f32.mxu0 %vm225_vm1, %v2707_v55 }
 0x143   : > { %v10989_v8 = vadd.f32 %v8902_v23, %v8852_v52  ;;  %9203 = vmatprep.mubr.msk.f32.mxu1 %vm225_vm1, %v3097_v42  ;;  %v10993_v35 = vpop.f32.mrf.mxu0 }
 0x144   : > { %13386 = vst [vmem:[#allocation25_spill] sm:$0xff] %v10993_v35  ;;  %v10995_v46 = vpop.f32.mrf.mxu1 }
 0x145   : > { %13387 = vst [vmem:[#allocation26_spill] sm:$0xff] %v10995_v46  ;;  %v8855_v0 = vpop.f32.mrf.mxu0  ;;  %9154 = vmatmul.mubr.msk.f32.gmra.mxu0 %vm225_vm1, %v2708_v29 }
 0x146   : > { %v8905_v7 = vpop.f32.mrf.mxu1  ;;  %9204 = vmatmul.mubr.msk.f32.gmra.mxu1 %vm225_vm1, %v3098_v9  ;;  %9208 = vmatprep.mubr.msk.f32.mxu0 %vm225_vm1, %v10470_v31 }
 0x147   : > { %v10999_v19 = vadd.f32 %v8905_v7, %v8855_v0  ;;  %v11003_v21 = vpop.f32.mrf.mxu0 }
 0x148   : > { %13388 = vst [vmem:[#allocation27_spill] sm:$0xff] %v11003_v21  ;;  %v11005_v23 = vpop.f32.mrf.mxu1 }
 0x149   : > { %13389 = vst [vmem:[#allocation28_spill] sm:$0xff] %v11005_v23  ;;  %v8910_v55 = vpop.f32.mrf.mxu0  ;;  %9209 = vmatmul.mubr.msk.f32.vlgmr.msra.gmra.mxu0 %vm225_vm1, %v10484_v11 }
 0x14a   : > { %v8960_v42 = vpop.f32.mrf.mxu1  ;;  %v1475_v52 = vadd.f32 %v8910_v55, %v10803_v32  ;;  %9211 = vmatprep.mubr.msk.f32.mxu0 %vm225_vm1, %v10488_v33 }
 0x14b   : > { %v1315_v29 = vpop.f32.mrf.mxu0 }
 0x14c   : > { %v11012_v7 = vpop.f32.mrf.mxu1  ;;  %v11015_v9 = vadd.f32 %v1315_v29, %v10809_v57  ;;  %v11017_v31 = vadd.f32 %v8960_v42, %v1475_v52 }
 0x14d   : > { %v8913_v0 = vpop.f32.mrf.mxu0  ;;  %9212 = vmatmul.mubr.msk.f32.gmra.mxu0 %vm225_vm1, %v10496_v53 }
 0x14e   : > { %v8963_v23 = vpop.f32.mrf.mxu1  ;;  %v1477_v11 = vadd.f32 %v8913_v0, %v10821_v36  ;;  %9214 = vmatprep.mubr.msk.f32.mxu0 %vm225_vm1, %v10500_v37 }
 0x14f   : > { %v1325_v32 = vpop.f32.mrf.mxu0 }
 0x150   : > { %v11024_v33 = vpop.f32.mrf.mxu1  ;;  %v11027_v55 = vadd.f32 %v1325_v32, %v10827_v30  ;;  %v11029_v57 = vadd.f32 %v8963_v23, %v1477_v11 }
 0x151   : > { %v8916_v42 = vpop.f32.mrf.mxu0  ;;  %9215 = vmatmul.mubr.msk.f32.gmra.mxu0 %vm225_vm1, %v10508_v41 }
 0x152   : > { %v8966_v52 = vpop.f32.mrf.mxu1  ;;  %v1479_v53 = vadd.f32 %v8916_v42, %v10833_v40  ;;  %9217 = vmatprep.mubr.msk.f32.mxu0 %vm225_vm1, %v10512_v39  ;;  %v7902_v39 = vld [vmem:[%s13192_s3 + $0x4] sm:$0xf] }
 0x153   : > { %v1335_v36 = vpop.f32.mrf.mxu0  ;;  %9256 = vmatprep.subr.msk.mxu1 %vm563_vm0, %v7902_v39 }
 0x154   : > { %v11036_v37 = vpop.f32.mrf.mxu1  ;;  %v11039_v29 = vadd.f32 %v1335_v36, %v10839_v34  ;;  %v11041_v30 = vadd.f32 %v8966_v52, %v1479_v53  ;;  %9257 = vmatpush3.msk.msra.mxu1 %vm563_vm0, %v7902_v39 }
 0x155   : > { %v8919_v23 = vpop.f32.mrf.mxu0  ;;  %9218 = vmatmul.mubr.msk.f32.gmra.mxu0 %vm225_vm1, %v10520_v45 }
 0x156   : > { %v8969_v0 = vpop.f32.mrf.mxu1  ;;  %v1481_v41 = vadd.f32 %v8919_v23, %v10845_v44  ;;  %9220 = vmatprep.mubr.msk.f32.mxu0 %vm225_vm1, %v10524_v43 }
 0x157   : > { %v1345_v40 = vpop.f32.mrf.mxu0 }
 0x158   : > { %v11051_v11 = vpop.f32.mrf.mxu1  ;;  %v11055_v34 = vadd.f32 %v1345_v40, %v10851_v38  ;;  %v11057_v32 = vadd.f32 %v8969_v0, %v1481_v41 }
 0x159   : > { %v8922_v45 = vpop.f32.mrf.mxu0  ;;  %9221 = vmatmul.mubr.msk.f32.gmra.mxu0 %vm225_vm1, %v10532_v49 }
 0x15a   : > { %v8972_v43 = vpop.f32.mrf.mxu1  ;;  %v1483_v44 = vadd.f32 %v8922_v45, %v10857_v48  ;;  %9223 = vmatprep.mubr.msk.f32.mxu0 %vm225_vm1, %v10536_v47 }
 0x15b   : > { %v1355_v42 = vpop.f32.mrf.mxu0 }
 0x15c   : > { %v11065_v52 = vpop.f32.mrf.mxu1  ;;  %v11068_v38 = vadd.f32 %v1355_v42, %v10863_v5  ;;  %v11070_v53 = vadd.f32 %v8972_v43, %v1483_v44  ;;  %v3475_v42 = vld [vmem:[#allocation2 + $0x10a] sm:$0xff] }
 0x15d   : > { %v8925_v36 = vpop.f32.mrf.mxu0  ;;  %9224 = vmatmul.mubr.msk.f32.gmra.mxu0 %vm225_vm1, %v10544_v63 }
 0x15e   : > { %v8975_v23 = vpop.f32.mrf.mxu1  ;;  %v1485_v49 = vadd.f32 %v8925_v36, %v10869_v62  ;;  %9226 = vmatprep.mubr.msk.f32.mxu0 %vm225_vm1, %v10548_v59 }
 0x15f   : > { %v1365_v48 = vpop.f32.mrf.mxu0 }
 0x160   : > { %v11077_v47 = vpop.f32.mrf.mxu1  ;;  %v11080_v0 = vadd.f32 %v1365_v48, %v10875_v51  ;;  %v11082_v5 = vadd.f32 %v8975_v23, %v1485_v49 }
 0x161   : > { %v8928_v41 = vpop.f32.mrf.mxu0  ;;  %9227 = vmatmul.mubr.msk.f32.gmra.mxu0 %vm225_vm1, %v10556_v3 }
 0x162   : > { %v8978_v39 = vpop.f32.mrf.mxu1  ;;  %v1487_v63 = vadd.f32 %v8928_v41, %v10881_v2  ;;  %9229 = vmatprep.mubr.msk.f32.mxu0 %vm225_vm1, %v10560_v1  ;;  %v3474_v2 = vld [vmem:[#allocation2 + $0xfa] sm:$0xff] }
 0x163   : > { %v1375_v62 = vpop.f32.mrf.mxu0 }
 0x164   : > { %v11089_v59 = vpop.f32.mrf.mxu1  ;;  %v11092_v40 = vadd.f32 %v1375_v62, %v10887_v6  ;;  %v11094_v51 = vadd.f32 %v8978_v39, %v1487_v63  ;;  %v3477_v39 = vld [vmem:[#allocation2 + $0x122] sm:$0xff] }
 0x165   : > { %13390 = vst [vmem:[#allocation29_spill] sm:$0xff] %v11089_v59  ;;  %v8931_v45 = vpop.f32.mrf.mxu0  ;;  %9230 = vmatmul.mubr.msk.f32.gmra.mxu0 %vm225_vm1, %v10568_v14 }
 0x166   : > { %13391 = vst [vmem:[#allocation30_spill] sm:$0xff] %v11092_v40  ;;  %v8981_v43 = vpop.f32.mrf.mxu1  ;;  %v1489_v3 = vadd.f32 %v8931_v45, %v10893_v13  ;;  %9232 = vmatprep.mubr.msk.f32.mxu0 %vm225_vm1, %v10572_v12  ;;  %v1038_v13 = vadd.f32 %v10913_v60, %v10911_v58  ;;  %v3476_v12 = vld [vmem:[#allocation2 + $0x112] sm:$0xff] }
 0x167   : > { %v1385_v1 = vpop.f32.mrf.mxu0 }
 0x168   : > { %v11101_v44 = vpop.f32.mrf.mxu1  ;;  %v11104_v6 = vadd.f32 %v1385_v1, %v10899_v54  ;;  %v11106_v36 = vadd.f32 %v8981_v43, %v1489_v3  ;;  %v3479_v3 = vld [vmem:[#allocation2 + $0x13a] sm:$0xff] }
 0x169   : > { %13392 = vst [vmem:[#allocation31_spill] sm:$0xff] %v11101_v44  ;;  %v8934_v23 = vpop.f32.mrf.mxu0  ;;  %9233 = vmatmul.mubr.msk.f32.gmra.mxu0 %vm225_vm1, %v3474_v2 }
 0x16a   : > { %13393 = vst [vmem:[#allocation40_spill] sm:$0xff] %v11104_v6  ;;  %v8984_v14 = vpop.f32.mrf.mxu1  ;;  %v1491_v49 = vadd.f32 %v8934_v23, %v10905_v61  ;;  %9235 = vmatprep.mubr.msk.f32.mxu0 %vm225_vm1, %v3475_v42  ;;  %v3478_v61 = vld [vmem:[#allocation2 + $0x12a] sm:$0xff] }
 0x16b   : > { %v1395_v48 = vpop.f32.mrf.mxu0 }
 0x16c   : > { %v11113_v41 = vpop.f32.mrf.mxu1  ;;  %v11115_v54 = vadd.f32 %v1395_v48, %v1038_v13  ;;  %v11117_v63 = vadd.f32 %v8984_v14, %v1491_v49  ;;  %v3480_v14 = vld [vmem:[#allocation2 + $0x142] sm:$0xff]  ;;  %v3481_v49 = vld [vmem:[#allocation2 + $0x152] sm:$0xff] }
 0x16d   : > { %13394 = vst [vmem:[#allocation43_spill] sm:$0xff] %v11113_v41  ;;  %v8937_v62 = vpop.f32.mrf.mxu0  ;;  %9236 = vmatmul.mubr.msk.f32.gmra.mxu0 %vm225_vm1, %v3476_v12 }
 0x16e   : > { %13395 = vst [vmem:[#allocation44_spill] sm:$0xff] %v11115_v54  ;;  %v8987_v45 = vpop.f32.mrf.mxu1  ;;  %v1493_v43 = vadd.f32 %v8937_v62, %v10919_v50  ;;  %9238 = vmatprep.mubr.msk.f32.mxu0 %vm225_vm1, %v3477_v39 }
 0x16f   : > { %v11122_v58 = vpop.f32.mrf.mxu0 }
 0x170   : > { %13396 = vst [vmem:[#allocation45_spill] sm:$0xff] %v11122_v58  ;;  %v11124_v60 = vpop.f32.mrf.mxu1  ;;  %v11126_v2 = vadd.f32 %v8987_v45, %v1493_v43  ;;  %v3482_v45 = vld [vmem:[#allocation2 + $0x15a] sm:$0xff] }
 0x171   : > { %13397 = vst [vmem:[#allocation46_spill] sm:$0xff] %v11124_v60  ;;  %v8940_v1 = vpop.f32.mrf.mxu0  ;;  %9239 = vmatmul.mubr.msk.f32.gmra.mxu0 %vm225_vm1, %v3478_v61  ;;  %v3483_v61 = vld [vmem:[#allocation2 + $0x16a] sm:$0xff] }
 0x172   : > { %v8990_v42 = vpop.f32.mrf.mxu1  ;;  %v1495_v23 = vadd.f32 %v8940_v1, %v10933_v56  ;;  %9241 = vmatprep.mubr.msk.f32.mxu0 %vm225_vm1, %v3479_v3 }
 0x173   : > { %v11131_v50 = vpop.f32.mrf.mxu0 }
 0x174   : > { %13398 = vst [vmem:[#allocation47_spill] sm:$0xff] %v11131_v50  ;;  %v11133_v13 = vpop.f32.mrf.mxu1  ;;  %v11135_v12 = vadd.f32 %v8990_v42, %v1495_v23 }
 0x175   : > { %13399 = vst [vmem:[#allocation48_spill] sm:$0xff] %v11133_v13  ;;  %v8943_v48 = vpop.f32.mrf.mxu0  ;;  %9242 = vmatmul.mubr.msk.f32.gmra.mxu0 %vm225_vm1, %v3480_v14  ;;  %v3484_v14 = vld [vmem:[#allocation2 + $0x172] sm:$0xff] }
 0x176   : > { %v8993_v39 = vpop.f32.mrf.mxu1  ;;  %v1497_v62 = vadd.f32 %v8943_v48, %v10947_v24  ;;  %9244 = vmatprep.mubr.msk.f32.mxu0 %vm225_vm1, %v3481_v49  ;;  %v3952_v13 = vld [vmem:[#allocation3 + $0x8] sm:$0xff] }
 0x177   : > { %v11140_v56 = vpop.f32.mrf.mxu0 }
 0x178   : > { %13400 = vst [vmem:[#allocation49_spill] sm:$0xff] %v11140_v56  ;;  %v11142_v43 = vpop.f32.mrf.mxu1  ;;  %v11144_v3 = vadd.f32 %v8993_v39, %v1497_v62 }
 0x179   : > { %13401 = vst [vmem:[#allocation50_spill] sm:$0xff] %v11142_v43  ;;  %v8946_v1 = vpop.f32.mrf.mxu0  ;;  %9245 = vmatmul.mubr.msk.f32.gmra.mxu0 %vm225_vm1, %v3482_v45  ;;  %v3985_v43 = vld [vmem:[#allocation3 + $0x9] sm:$0xff] }
 0x17a   : > { %v8996_v42 = vpop.f32.mrf.mxu1  ;;  %v1499_v23 = vadd.f32 %v8946_v1, %v10961_v20  ;;  %9247 = vmatprep.mubr.msk.f32.mxu0 %vm225_vm1, %v3483_v61  ;;  %v3487_v61 = vld [vmem:[#allocation2 + $0x19a] sm:$0xff] }
 0x17b   : > { %v11149_v24 = vpop.f32.mrf.mxu0 }
 0x17c   : > { %13402 = vst [vmem:[#allocation53_spill] sm:$0xff] %v11149_v24  ;;  %v11151_v49 = vpop.f32.mrf.mxu1  ;;  %v11153_v48 = vadd.f32 %v8996_v42, %v1499_v23 }
 0x17d   : > { %13403 = vst [vmem:[#allocation54_spill] sm:$0xff] %v11151_v49  ;;  %v8949_v56 = vpop.f32.mrf.mxu0  ;;  %9248 = vmatmul.mubr.msk.f32.gmra.mxu0 %vm225_vm1, %v3484_v14 }
 0x17e   : > { %v8999_v39 = vpop.f32.mrf.mxu1  ;;  %v1501_v62 = vadd.f32 %v8949_v56, %v10975_v16  ;;  %9250 = vmatprep.mubr.msk.f32.mxu0 %vm225_vm1, %v10781_v25  ;;  %v3488_v16 = vld [vmem:[#allocation2 + $0x1a2] sm:$0xff] }
 0x17f   : > { %v11159_v45 = vpop.f32.mrf.mxu0 }
 0x180   : > { %13404 = vst [vmem:[#allocation55_spill] sm:$0xff] %v11159_v45  ;;  %v11161_v20 = vpop.f32.mrf.mxu1  ;;  %v11163_v1 = vadd.f32 %v8999_v39, %v1501_v62 }
 0x181   : > { %13405 = vst [vmem:[#allocation56_spill] sm:$0xff] %v11161_v20  ;;  %v8952_v24 = vpop.f32.mrf.mxu0  ;;  %9251 = vmatmul.mubr.msk.f32.gmra.mxu0 %vm225_vm1, %v10793_v27 }
 0x182   : > { %v9002_v42 = vpop.f32.mrf.mxu1  ;;  %v1503_v23 = vadd.f32 %v8952_v24, %v10989_v8  ;;  %9253 = vmatprep.mubr.msk.f32.mxu0 %vm225_vm1, %v3487_v61 }
 0x183   : > { %v11169_v56 = vpop.f32.mrf.mxu0 }
 0x184   : > { %13406 = vst [vmem:[#allocation57_spill] sm:$0xff] %v11169_v56  ;;  %v11171_v25 = vpop.f32.mrf.mxu1  ;;  %v11173_v14 = vadd.f32 %v9002_v42, %v1503_v23 }
 0x185   : > { %13407 = vst [vmem:[#allocation58_spill] sm:$0xff] %v11171_v25  ;;  %v8955_v20 = vpop.f32.mrf.mxu0  ;;  %9254 = vmatmul.mubr.msk.f32.gmra.mxu0 %vm225_vm1, %v3488_v16 }
 0x186   : > { %v9005_v39 = vpop.f32.mrf.mxu1  ;;  %v1505_v62 = vadd.f32 %v8955_v20, %v10999_v19 }
 0x187   : > { %v11177_v45 = vpop.f32.mrf.mxu0 }
 0x188   : > { %13408 = vst [vmem:[#allocation59_spill] sm:$0xff] %v11177_v45  ;;  %v11179_v27 = vpop.f32.mrf.mxu1  ;;  %v11181_v8 = vadd.f32 %v9005_v39, %v1505_v62 }
 0x189   : > { %13409 = vst [vmem:[#allocation60_spill] sm:$0xff] %v11179_v27  ;;  %v9010_v24 = vpop.f32.mrf.mxu0 }
 0x18a   : > { %v11183_v61 = vpop.f32.mrf.mxu1  ;;  %v11186_v56 = vadd.f32 %v9010_v24, %v11017_v31  ;;  %v3983_v24 = vld [vmem:[%s13192_s3] sm:$0xf] }
 0x18b   : > { %v11188_v42 = vpop.f32.mrf.mxu0  ;;  %9306 = vmatprep.subr.msk.mxu0 %vm563_vm0, %v3983_v24 }
 0x18c   : > { %v11190_v23 = vpop.f32.mrf.mxu1  ;;  %9307 = vmatpush3.msk.msra.mxu0 %vm563_vm0, %v3983_v24 }
 0x18d   : > { %v9013_v16 = vpop.f32.mrf.mxu0 }
 0x18e   : > { %v11192_v25 = vpop.f32.mrf.mxu1  ;;  %v11195_v19 = vadd.f32 %v9013_v16, %v11029_v57  ;;  %v3984_v57 = vld [vmem:[#allocation3 + $0x1] sm:$0xff] }
 0x18f   : > { %v11197_v20 = vpop.f32.mrf.mxu0  ;;  %v3951_v16 = vld [vmem:[#allocation3] sm:$0xff]  ;;  %9258 = vmatprep.mubr.msk.f32.mxu1 %vm225_vm1, %v3984_v57 }
 0x190   : > { %v11199_v39 = vpop.f32.mrf.mxu1  ;;  %9308 = vmatprep.mubr.msk.f32.mxu0 %vm225_vm1, %v3951_v16  ;;  %9259 = vmatmul.mubr.msk.f32.vlgmr.msra.gmra.mxu1 %vm225_vm1, %v3985_v43 }
 0x191   : > { %v9016_v62 = vpop.f32.mrf.mxu0  ;;  %9309 = vmatmul.mubr.msk.f32.vlgmr.msra.gmra.mxu0 %vm225_vm1, %v3952_v13 }
 0x192   : > { %v11201_v27 = vpop.f32.mrf.mxu1  ;;  %v11204_v31 = vadd.f32 %v9016_v62, %v11041_v30 }
 0x193   : > { %v11209_v45 = vpop.f32.mrf.mxu0 }
 0x194   : > { %v11211_v49 = vpop.f32.mrf.mxu1 }
 0x195   : > { %v9019_v30 = vpop.f32.mrf.mxu0 }
 0x196   : > { %v11216_v62 = vpop.f32.mrf.mxu1  ;;  %v11221_v50 = vadd.f32 %v9019_v30, %v11057_v32  ;;  %v7969_v32 = vld [vmem:[%s13192_s3 + $0x8] sm:$0xf] }
 0x197   : > { %v11224_v60 = vpop.f32.mrf.mxu0  ;;  %9356 = vmatprep.subr.msk.mxu1 %vm563_vm0, %v7969_v32 }
 0x198   : > { %v11226_v58 = vpop.f32.mrf.mxu1  ;;  %9357 = vmatpush3.msk.msra.mxu1 %vm563_vm0, %v7969_v32 }
 0x199   : > { %v9022_v57 = vpop.f32.mrf.mxu0 }
 0x19a   : > { %v11228_v24 = vpop.f32.mrf.mxu1  ;;  %v11231_v41 = vadd.f32 %v9022_v57, %v11070_v53 }
 0x19b   : > { %v11233_v54 = vpop.f32.mrf.mxu0 }
 0x19c   : > { %v11235_v16 = vpop.f32.mrf.mxu1 }
 0x19d   : > { %v9025_v43 = vpop.f32.mrf.mxu0 }
 0x19e   : > { %v11240_v13 = vpop.f32.mrf.mxu1  ;;  %v11244_v30 = vadd.f32 %v9025_v43, %v11082_v5 }
 0x19f   : > { %13410 = vst [vmem:[#allocation61_spill] sm:$0xff] %v11240_v13  ;;  %v11247_v53 = vpop.f32.mrf.mxu0 }
 0x1a0   : > { %13411 = vst [vmem:[#allocation64_spill] sm:$0xff] %v11244_v30  ;;  %13412 = vst [vmem:[#allocation65_spill] sm:$0xff] %v11247_v53  ;;  %v11249_v57 = vpop.f32.mrf.mxu1 }
 0x1a1   : > { %13413 = vst [vmem:[#allocation66_spill] sm:$0xff] %v11249_v57  ;;  %v9028_v44 = vpop.f32.mrf.mxu0 }
 0x1a2   : > { %v11251_v6 = vpop.f32.mrf.mxu1  ;;  %v11254_v21 = vadd.f32 %v9028_v44, %v11094_v51 }
 0x1a3   : > { %13414 = vst [vmem:[#allocation67_spill] sm:$0xff] %v11251_v6  ;;  %v11256_v46 = vpop.f32.mrf.mxu0 }
 0x1a4   : > { %13415 = vst [vmem:[#allocation68_spill] sm:$0xff] %v11254_v21  ;;  %13416 = vst [vmem:[#allocation69_spill] sm:$0xff] %v11256_v46  ;;  %v11258_v35 = vpop.f32.mrf.mxu1 }
 0x1a5   : > { %13417 = vst [vmem:[#allocation70_spill] sm:$0xff] %v11258_v35  ;;  %v9031_v13 = vpop.f32.mrf.mxu0 }
 0x1a6   : > { %v11260_v59 = vpop.f32.mrf.mxu1  ;;  %v11263_v5 = vadd.f32 %v9031_v13, %v11106_v36 }
 0x1a7   : > { %13418 = vst [vmem:[#allocation71_spill] sm:$0xff] %v11260_v59  ;;  %v11265_v32 = vpop.f32.mrf.mxu0 }
 0x1a8   : > { %13419 = vst [vmem:[#allocation72_spill] sm:$0xff] %v11263_v5  ;;  %13420 = vst [vmem:[#allocation73_spill] sm:$0xff] %v11265_v32  ;;  %v11267_v43 = vpop.f32.mrf.mxu1 }
 0x1a9   : > { %13421 = vst [vmem:[#allocation74_spill] sm:$0xff] %v11267_v43  ;;  %v9034_v57 = vpop.f32.mrf.mxu0 }
 0x1aa   : > { %v11269_v30 = vpop.f32.mrf.mxu1  ;;  %v11272_v51 = vadd.f32 %v9034_v57, %v11117_v63 }
 0x1ab   : > { %13422 = vst [vmem:[#allocation75_spill] sm:$0xff] %v11269_v30  ;;  %v11274_v44 = vpop.f32.mrf.mxu0 }
 0x1ac   : > { %13423 = vst [vmem:[#allocation76_spill] sm:$0xff] %v11272_v51  ;;  %13424 = vst [vmem:[#allocation77_spill] sm:$0xff] %v11274_v44  ;;  %v11276_v6 = vpop.f32.mrf.mxu1 }
 0x1ad   : > { %13425 = vst [vmem:[#allocation78_spill] sm:$0xff] %v11276_v6  ;;  %v9037_v35 = vpop.f32.mrf.mxu0 }
 0x1ae   : > { %v11278_v21 = vpop.f32.mrf.mxu1  ;;  %v11281_v36 = vadd.f32 %v9037_v35, %v11126_v2 }
 0x1af   : > { %13426 = vst [vmem:[#allocation79_spill] sm:$0xff] %v11278_v21  ;;  %v11283_v13 = vpop.f32.mrf.mxu0 }
 0x1b0   : > { %13427 = vst [vmem:[#allocation80_spill] sm:$0xff] %v11281_v36  ;;  %13428 = vst [vmem:[#allocation81_spill] sm:$0xff] %v11283_v13  ;;  %v11285_v59 = vpop.f32.mrf.mxu1 }
 0x1b1   : > { %13429 = vst [vmem:[#allocation82_spill] sm:$0xff] %v11285_v59  ;;  %v9040_v43 = vpop.f32.mrf.mxu0 }
 0x1b2   : > { %v11287_v5 = vpop.f32.mrf.mxu1  ;;  %v11290_v63 = vadd.f32 %v9040_v43, %v11135_v12 }
 0x1b3   : > { %13430 = vst [vmem:[#allocation83_spill] sm:$0xff] %v11287_v5  ;;  %v11292_v57 = vpop.f32.mrf.mxu0 }
 0x1b4   : > { %13431 = vst [vmem:[#allocation84_spill] sm:$0xff] %v11290_v63  ;;  %13432 = vst [vmem:[#allocation85_spill] sm:$0xff] %v11292_v57  ;;  %v11294_v30 = vpop.f32.mrf.mxu1 }
 0x1b5   : > { %13433 = vst [vmem:[#allocation86_spill] sm:$0xff] %v11294_v30  ;;  %v9043_v6 = vpop.f32.mrf.mxu0 }
 0x1b6   : > { %v11296_v51 = vpop.f32.mrf.mxu1  ;;  %v11299_v35 = vadd.f32 %v9043_v6, %v11144_v3 }
 0x1b7   : > { %13434 = vst [vmem:[#allocation87_spill] sm:$0xff] %v11296_v51  ;;  %v11301_v2 = vpop.f32.mrf.mxu0 }
 0x1b8   : > { %13435 = vst [vmem:[#allocation88_spill] sm:$0xff] %v11299_v35  ;;  %13436 = vst [vmem:[#allocation89_spill] sm:$0xff] %v11301_v2  ;;  %v11303_v21 = vpop.f32.mrf.mxu1 }
 0x1b9   : > { %13437 = vst [vmem:[#allocation90_spill] sm:$0xff] %v11303_v21  ;;  %v9046_v59 = vpop.f32.mrf.mxu0 }
 0x1ba   : > { %v11305_v36 = vpop.f32.mrf.mxu1  ;;  %v11308_v12 = vadd.f32 %v9046_v59, %v11153_v48 }
 0x1bb   : > { %13438 = vst [vmem:[#allocation91_spill] sm:$0xff] %v11305_v36  ;;  %v11310_v43 = vpop.f32.mrf.mxu0 }
 0x1bc   : > { %13439 = vst [vmem:[#allocation92_spill] sm:$0xff] %v11308_v12  ;;  %13440 = vst [vmem:[#allocation93_spill] sm:$0xff] %v11310_v43  ;;  %v11312_v5 = vpop.f32.mrf.mxu1 }
 0x1bd   : > { %13441 = vst [vmem:[#allocation94_spill] sm:$0xff] %v11312_v5  ;;  %v9049_v30 = vpop.f32.mrf.mxu0 }
 0x1be   : > { %v11314_v63 = vpop.f32.mrf.mxu1  ;;  %v11317_v6 = vadd.f32 %v9049_v30, %v11163_v1 }
 0x1bf   : > { %13442 = vst [vmem:[#allocation95_spill] sm:$0xff] %v11314_v63  ;;  %v11319_v3 = vpop.f32.mrf.mxu0 }
 0x1c0   : > { %13443 = vst [vmem:[#allocation96_spill] sm:$0xff] %v11317_v6  ;;  %13444 = vst [vmem:[#allocation97_spill] sm:$0xff] %v11319_v3  ;;  %v11321_v51 = vpop.f32.mrf.mxu1 }
 0x1c1   : > { %13445 = vst [vmem:[#allocation98_spill] sm:$0xff] %v11321_v51  ;;  %v9052_v21 = vpop.f32.mrf.mxu0 }
 0x1c2   : > { %v11323_v35 = vpop.f32.mrf.mxu1  ;;  %v11326_v59 = vadd.f32 %v9052_v21, %v11173_v14 }
 0x1c3   : > { %13446 = vst [vmem:[#allocation99_spill] sm:$0xff] %v11323_v35  ;;  %v11328_v48 = vpop.f32.mrf.mxu0 }
 0x1c4   : > { %13447 = vst [vmem:[#allocation100_spill] sm:$0xff] %v11326_v59  ;;  %13448 = vst [vmem:[#allocation101_spill] sm:$0xff] %v11328_v48  ;;  %v11330_v36 = vpop.f32.mrf.mxu1 }
 0x1c5   : > { %13449 = vst [vmem:[#allocation102_spill] sm:$0xff] %v11330_v36  ;;  %v9055_v5 = vpop.f32.mrf.mxu0 }
 0x1c6   : > { %v11332_v12 = vpop.f32.mrf.mxu1  ;;  %v11335_v1 = vadd.f32 %v9055_v5, %v11181_v8 }
 0x1c7   : > { %13450 = vst [vmem:[#allocation103_spill] sm:$0xff] %v11332_v12  ;;  %v11337_v30 = vpop.f32.mrf.mxu0 }
 0x1c8   : > { %13451 = vst [vmem:[#allocation104_spill] sm:$0xff] %v11335_v1  ;;  %13452 = vst [vmem:[#allocation105_spill] sm:$0xff] %v11337_v30  ;;  %v11339_v63 = vpop.f32.mrf.mxu1  ;;  %v11364_v1 = vld [vmem:[%s13192_s3 + $0x10] sm:$0xf] }
 0x1c9   : > { %13453 = vst [vmem:[#allocation106_spill] sm:$0xff] %v11339_v63  ;;  %v9110_v51 = vpop.f32.mrf.mxu0  ;;  %v8003_v63 = vld [vmem:[%s13192_s3 + $0xc] sm:$0xf]  ;;  %13454 = vst [vmem:[#allocation107_spill] sm:$0xff] %v11364_v1  ;;  %9456 = vmatprep.subr.msk.mxu1 %vm563_vm0, %v11364_v1 }
 0x1ca   : > { %v11341_v6 = vpop.f32.mrf.mxu1  ;;  %9406 = vmatprep.subr.msk.mxu0 %vm563_vm0, %v8003_v63 }
 0x1cb   : > { %v2876_v35 = vpop.f32.mrf.mxu0  ;;  %9407 = vmatpush3.msk.msra.mxu0 %vm563_vm0, %v8003_v63 }
 0x1cc   : > { %v11343_v21 = vpop.f32.mrf.mxu1 }
 0x1cd   : > { %v11345_v14 = vpop.f32.mrf.mxu0 }
 0x1ce   : > { %v11349_v36 = vpop.f32.mrf.mxu1 }
 0x1cf   : > { %v11347_v59 = vpop.f32.mrf.mxu0 }
 0x1d0   : > { %v11353_v8 = vpop.f32.mrf.mxu1 }
 0x1d1   : > { %v11351_v12 = vpop.f32.mrf.mxu0 }
 0x1d2   : > { %v11371_v48 = vpop.f32.mrf.mxu1 }
 0x1d3   : > { %v11355_v5 = vpop.f32.mrf.mxu0 }
 0x1d4   : > { %v11377_v2 = vpop.f32.mrf.mxu1 }
 0x1d5   : > { %v11366_v30 = vpop.f32.mrf.mxu0 }
 0x1d6   : > { %v11383_v44 = vpop.f32.mrf.mxu1 }
 0x1d7   : > { %v11373_v3 = vpop.f32.mrf.mxu0  ;;  %13458 = vst [vmem:[#allocation111_spill] sm:$0xff] %v11383_v44 }
 0x1d8   : > { %v11389_v46 = vpop.f32.mrf.mxu1 }
 0x1d9   : > { %v11375_v43 = vpop.f32.mrf.mxu0  ;;  %13461 = vst [vmem:[#allocation114_spill] sm:$0xff] %v11389_v46 }
 0x1da   : > { %13455 = vst [vmem:[#allocation108_spill] sm:$0xff] %v11375_v43  ;;  %v11395_v10 = vpop.f32.mrf.mxu1 }
 0x1db   : > { %v11379_v57 = vpop.f32.mrf.mxu0  ;;  %13464 = vst [vmem:[#allocation117_spill] sm:$0xff] %v11395_v10 }
 0x1dc   : > { %13456 = vst [vmem:[#allocation109_spill] sm:$0xff] %v11379_v57  ;;  %v11401_v57 = vpop.f32.mrf.mxu1 }
 0x1dd   : > { %v11381_v13 = vpop.f32.mrf.mxu0  ;;  %13467 = vst [vmem:[#allocation120_spill] sm:$0xff] %v11401_v57 }
 0x1de   : > { %13457 = vst [vmem:[#allocation110_spill] sm:$0xff] %v11381_v13 }
 0x1df   : > { %v11385_v32 = vpop.f32.mrf.mxu0 }
 0x1e0   : > { %13459 = vst [vmem:[#allocation112_spill] sm:$0xff] %v11385_v32  ;;  %v11407_v32 = vpop.f32.mrf.mxu1 }
 0x1e1   : > { %v11387_v63 = vpop.f32.mrf.mxu0  ;;  %13470 = vst [vmem:[#allocation123_spill] sm:$0xff] %v11407_v32 }
 0x1e2   : > { %13460 = vst [vmem:[#allocation113_spill] sm:$0xff] %v11387_v63 }
 0x1e3   : > { %v11391_v1 = vpop.f32.mrf.mxu0 }
 0x1e4   : > { %13462 = vst [vmem:[#allocation115_spill] sm:$0xff] %v11391_v1  ;;  %v11413_v1 = vpop.f32.mrf.mxu1 }
 0x1e5   : > { %v11393_v40 = vpop.f32.mrf.mxu0 }
 0x1e6   : > { %13463 = vst [vmem:[#allocation116_spill] sm:$0xff] %v11393_v40 }
 0x1e7   : > { %v11397_v43 = vpop.f32.mrf.mxu0 }
 0x1e8   : > { %13465 = vst [vmem:[#allocation118_spill] sm:$0xff] %v11397_v43  ;;  %v11419_v43 = vpop.f32.mrf.mxu1 }
 0x1e9   : > { %v11399_v53 = vpop.f32.mrf.mxu0  ;;  %13475 = vst [vmem:[#allocation128_spill] sm:$0xff] %v11419_v43 }
 0x1ea   : > { %13466 = vst [vmem:[#allocation119_spill] sm:$0xff] %v11399_v53 }
 0x1eb   : > { %v11403_v13 = vpop.f32.mrf.mxu0 }
 0x1ec   : > { %13468 = vst [vmem:[#allocation121_spill] sm:$0xff] %v11403_v13  ;;  %v11425_v13 = vpop.f32.mrf.mxu1 }
 0x1ed   : > { %v11405_v44 = vpop.f32.mrf.mxu0 }
 0x1ee   : > { %13469 = vst [vmem:[#allocation122_spill] sm:$0xff] %v11405_v44 }
 0x1ef   : > { %v11409_v63 = vpop.f32.mrf.mxu0 }
 0x1f0   : > { %13471 = vst [vmem:[#allocation124_spill] sm:$0xff] %v11409_v63  ;;  %v11433_v63 = vpop.f32.mrf.mxu1 }
 0x1f1   : > { %v11411_v46 = vpop.f32.mrf.mxu0  ;;  %13480 = vst [vmem:[#allocation133_spill] sm:$0xff] %v11433_v63 }
 0x1f2   : > { %13472 = vst [vmem:[#allocation125_spill] sm:$0xff] %v11411_v46  ;;  %v1864_v46 = vadd.f32 %v11012_v7, %v11015_v9 }
 0x1f3   : > { %v11415_v40 = vpop.f32.mrf.mxu0 }
 0x1f4   : > { %13473 = vst [vmem:[#allocation126_spill] sm:$0xff] %v11415_v40 }
 0x1f5   : > { %v11417_v10 = vpop.f32.mrf.mxu0 }
 0x1f6   : > { %13474 = vst [vmem:[#allocation127_spill] sm:$0xff] %v11417_v10  ;;  %v2254_v10 = vadd.f32 %v11188_v42, %v1864_v46  ;;  %v1868_v46 = vadd.f32 %v11036_v37, %v11039_v29  ;;  %v1870_v37 = vadd.f32 %v11051_v11, %v11055_v34  ;;  %v2649_v29 = vadd.f32 %v11201_v27, %v11204_v31 }
 0x1f7   : > { %v11421_v53 = vpop.f32.mrf.mxu0 }
 0x1f8   : > { %13476 = vst [vmem:[#allocation129_spill] sm:$0xff] %v11421_v53  ;;  %v2645_v53 = vadd.f32 %v11183_v61, %v11186_v56  ;;  %v2644_v7 = vadd.f32 %v11190_v23, %v2254_v10  ;;  %v2258_v56 = vadd.f32 %v11209_v45, %v1868_v46  ;;  %v11471_v45 = vld [vmem:[%s13191_s2] ss:$0 sm:$0xff]  ;;  %v3040_v11 = vadd.f32 %v11351_v12, %v2649_v29 }
 0x1f9   : > { %v11423_v57 = vpop.f32.mrf.mxu0 }
 0x1fa   : > { %13477 = vst [vmem:[#allocation130_spill] sm:$0xff] %v11423_v57  ;;  %v1866_v57 = vadd.f32 %v11024_v33, %v11027_v55  ;;  %v3036_v63 = vadd.f32 %v9110_v51, %v2645_v53  ;;  %v2647_v33 = vadd.f32 %v11192_v25, %v11195_v19  ;;  %v3035_v55 = vadd.f32 %v2876_v35, %v2644_v7 }
 0x1fb   : > { %v11427_v44 = vpop.f32.mrf.mxu0  ;;  %v2648_v51 = vadd.f32 %v11211_v49, %v2258_v56 }
 0x1fc   : > { %13478 = vst [vmem:[#allocation131_spill] sm:$0xff] %v11427_v44  ;;  %v11444_v44 = vpop.f32.mrf.mxu1  ;;  %v2256_v9 = vadd.f32 %v11197_v20, %v1866_v57  ;;  %v3426_v23 = vadd.f32 %v11341_v6, %v3036_v63  ;;  %v3038_v20 = vadd.f32 %v11345_v14, %v2647_v33  ;;  %v3425_v19 = vadd.f32 %v11343_v21, %v3035_v55 }
 0x1fd   : > { %v11429_v32 = vpop.f32.mrf.mxu0  ;;  %v2260_v57 = vadd.f32 %v11224_v60, %v1870_v37  ;;  %v11484_v21 = vadd.f32 %v10927_v15, %v10925_v28  ;;  %v2651_v60 = vadd.f32 %v11216_v62, %v11221_v50  ;;  %v3039_v49 = vadd.f32 %v11355_v5, %v2648_v51  ;;  %v13489_v51 = vld [vmem:[#allocation29_spill] sm:$0xff] }
 0x1fe   : > { %13479 = vst [vmem:[#allocation132_spill] sm:$0xff] %v11429_v32  ;;  %v11457_v61 = vpop.f32.mrf.mxu1  ;;  %v2646_v10 = vadd.f32 %v11199_v39, %v2256_v9  ;;  %v3428_v31 = vadd.f32 %v11349_v36, %v3038_v20  ;;  %v11495_v9 = vadd.f32 %v10941_v4, %v10939_v26  ;;  %v11507_v26 = vadd.f32 %v10955_v17, %v10953_v22  ;;  %v13482_v22 = vld [vmem:[#allocation62_spill] sm:$0xff] }
 0x1ff   : > { %v11435_v40 = vpop.f32.mrf.mxu0  ;;  %v2650_v28 = vadd.f32 %v11226_v58, %v2260_v57  ;;  %v3042_v62 = vadd.f32 %v11366_v30, %v2651_v60  ;;  %v1874_v4 = vadd.f32 %v11077_v47, %v11080_v0  ;;  %v3429_v58 = vadd.f32 %v11377_v2, %v3039_v49  ;;  %v13483_v0 = vld [vmem:[#allocation65_spill] sm:$0xff]  ;;  %v13493_v60 = vld [vmem:[#allocation114_spill] sm:$0xff] }
 0x200   : > { %v3037_v39 = vadd.f32 %v11347_v59, %v2646_v10  ;;  %v11478_v34 = vpop.f32.mrf.mxu1  ;;  %v1872_v59 = vadd.f32 %v11065_v52, %v11068_v38  ;;  %v3430_v52 = vadd.f32 %v11371_v48, %v3040_v11  ;;  %v11519_v17 = vadd.f32 %v13482_v22, %v10967_v18  ;;  %v11532_v18 = vld [vmem:[%s13192_s3 + $0x14] sm:$0xf]  ;;  %v13490_v11 = vld [vmem:[#allocation64_spill] sm:$0xff] }
 0x201   : > { %v11438_v43 = vpop.f32.mrf.mxu0  ;;  %v3041_v30 = vadd.f32 %v11373_v3, %v2650_v28  ;;  %v2264_v10 = vadd.f32 %v13483_v0, %v1874_v4  ;;  %v13485_v3 = vld [vmem:[#allocation111_spill] sm:$0xff]  ;;  %9506 = vmatprep.subr.msk.mxu0 %vm563_vm0, %v11532_v18 }
 0x202   : > { %13481 = vst [vmem:[#allocation134_spill] sm:$0xff] %v11438_v43  ;;  %v3427_v14 = vadd.f32 %v11353_v8, %v3037_v39  ;;  %v2262_v15 = vadd.f32 %v11233_v54, %v1872_v59  ;;  %v11500_v38 = vpop.f32.mrf.mxu1  ;;  %v2653_v54 = vadd.f32 %v11228_v24, %v11231_v41  ;;  %v13484_v41 = vld [vmem:[#allocation108_spill] sm:$0xff]  ;;  %v3432_v20 = vadd.f32 %v13485_v3, %v3042_v62  ;;  %v13503_v0 = vld [vmem:[#allocation31_spill] sm:$0xff] }
 0x203   : > { %v11446_v32 = vpop.f32.mrf.mxu0  ;;  %v3431_v49 = vadd.f32 %v13493_v60, %v3041_v30  ;;  %v13506_v3 = vld [vmem:[#allocation120_spill] sm:$0xff]  ;;  %v13510_v60 = vld [vmem:[#allocation113_spill] sm:$0xff] }
 0x204   : > { %v2652_v47 = vadd.f32 %v11235_v16, %v2262_v15  ;;  %v3044_v24 = vadd.f32 %v13484_v41, %v2653_v54  ;;  %v11524_v2 = vpop.f32.mrf.mxu1  ;;  %v13486_v16 = vld [vmem:[#allocation63_spill] sm:$0xff]  ;;  %v13496_v15 = vld [vmem:[#allocation66_spill] sm:$0xff]  ;;  %v13504_v41 = vld [vmem:[#allocation68_spill] sm:$0xff] }
 0x205   : > { %v11452_v42 = vpop.f32.mrf.mxu0  ;;  %v13499_v54 = vld [vmem:[#allocation110_spill] sm:$0xff] }
 0x207   : > { %v11459_v43 = vpop.f32.mrf.mxu0 }
 0x209   : > { %v9210_v25 = vpop.f32.mrf.mxu0 }
 0x20a   : > { %v3816_v53 = vadd.f32 %v9210_v25, %v3426_v23 }
 0x20b   : > { %v3656_v27 = vpop.f32.mrf.mxu0 }
 0x20c   : > { %v3855_v35 = vadd.f32 %v11471_v45, %v3816_v53  ;;  %v3815_v6 = vadd.f32 %v3656_v27, %v3425_v19  ;;  %v13487_v19 = vld [vmem:[#allocation24_spill] sm:$0xff]  ;;  %v13488_v53 = vld [vmem:[#allocation30_spill] sm:$0xff]  ;;  %v13491_v27 = vld [vmem:[#allocation61_spill] sm:$0xff] }
 0x20d   : > { %v9213_v12 = vpop.f32.mrf.mxu0  ;;  %v11536_v39 = vadd.f32 %v13487_v19, %v13486_v16  ;;  %v1876_v57 = vadd.f32 %v13489_v51, %v13488_v53  ;;  %v13507_v19 = vld [vmem:[#allocation112_spill] sm:$0xff] }
 0x20e   : > { %v3887_v63 = vmax.f32 %v3855_v35, 0.0  ;;  %v3854_v36 = vadd.f32 %v11471_v45, %v3815_v6  ;;  %v3818_v7 = vadd.f32 %v9213_v12, %v3428_v31  ;;  %v2655_v31 = vadd.f32 %v13491_v27, %v13490_v11  ;;  %v13492_v35 = vld [vmem:[#allocation109_spill] sm:$0xff] }
 0x20f   : > { %v3666_v50 = vpop.f32.mrf.mxu0  ;;  %v3043_v6 = vadd.f32 %v13492_v35, %v2652_v47  ;;  %v13502_v47 = vld [vmem:[#allocation40_spill] sm:$0xff] }
 0x210   : > { %3920 = vst.msk [vmem:[#allocation3 + $0x21] sm:$0xff] %vm225_vm1, %v3887_v63  ;;  %v3886_v8 = vmax.f32 %v3854_v36, 0.0  ;;  %v3857_v5 = vadd.f32 %v11471_v45, %v3818_v7  ;;  %v3817_v46 = vadd.f32 %v3666_v50, %v3427_v14  ;;  %v13494_v36 = vld [vmem:[#allocation25_spill] sm:$0xff]  ;;  %v13495_v7 = vld [vmem:[#allocation26_spill] sm:$0xff] }
 0x211   : > { %v9216_v48 = vpop.f32.mrf.mxu0  ;;  %v11550_v28 = vadd.f32 %v13495_v7, %v13494_v36  ;;  %v13497_v50 = vld [vmem:[#allocation69_spill] sm:$0xff] }
 0x212   : > { %3919 = vst.msk [vmem:[#allocation3 + $0x19] sm:$0xff] %vm225_vm1, %v3886_v8  ;;  %v3889_v33 = vmax.f32 %v3857_v5, 0.0  ;;  %v3856_v55 = vadd.f32 %v11471_v45, %v3817_v46  ;;  %v3820_v56 = vadd.f32 %v9216_v48, %v3430_v52  ;;  %v2654_v52 = vadd.f32 %v13496_v15, %v2264_v10  ;;  %v13498_v8 = vld [vmem:[#allocation117_spill] sm:$0xff]  ;;  %v11555_v46 = vpop.f32.mrf.mxu1 }
 0x213   : > { %v3676_v23 = vpop.f32.mrf.mxu0  ;;  %v2266_v62 = vadd.f32 %v13497_v50, %v1876_v57  ;;  %v3434_v5 = vadd.f32 %v13498_v8, %v3044_v24  ;;  %v1878_v10 = vadd.f32 %v13503_v0, %v13502_v47  ;;  %v13505_v24 = vld [vmem:[#allocation67_spill] sm:$0xff]  ;;  %v13512_v50 = vld [vmem:[#allocation44_spill] sm:$0xff] }
 0x214   : > { %3922 = vst.msk [vmem:[#allocation3 + $0x39] sm:$0xff] %vm225_vm1, %v3889_v33  ;;  %v3888_v37 = vmax.f32 %v3856_v55, 0.0  ;;  %v3859_v29 = vadd.f32 %v11471_v45, %v3820_v56  ;;  %v3819_v25 = vadd.f32 %v3676_v23, %v3429_v58  ;;  %v3046_v58 = vadd.f32 %v13499_v54, %v2655_v31  ;;  %v13500_v55 = vld [vmem:[#allocation27_spill] sm:$0xff]  ;;  %v13501_v56 = vld [vmem:[#allocation28_spill] sm:$0xff]  ;;  %v13508_v31 = vld [vmem:[#allocation70_spill] sm:$0xff] }
 0x215   : > { %v9219_v59 = vpop.f32.mrf.mxu0  ;;  %v11562_v22 = vadd.f32 %v13501_v56, %v13500_v55  ;;  %v2657_v23 = vadd.f32 %v13505_v24, %v13504_v41  ;;  %v3045_v53 = vadd.f32 %v13507_v19, %v2654_v52  ;;  %v2656_v35 = vadd.f32 %v13508_v31, %v2266_v62  ;;  %v13513_v62 = vld [vmem:[#allocation43_spill] sm:$0xff]  ;;  %v13515_v54 = vld [vmem:[#allocation72_spill] sm:$0xff] }
 0x216   : > { %3921 = vst.msk [vmem:[#allocation3 + $0x31] sm:$0xff] %vm225_vm1, %v3888_v37  ;;  %v3891_v12 = vmax.f32 %v3859_v29, 0.0  ;;  %v3858_v14 = vadd.f32 %v11471_v45, %v3819_v25  ;;  %v3822_v63 = vadd.f32 %v9219_v59, %v3432_v20  ;;  %v3433_v20 = vadd.f32 %v13506_v3, %v3043_v6  ;;  %v13509_v6 = vld [vmem:[#allocation73_spill] sm:$0xff]  ;;  %v13518_v3 = vld [vmem:[#allocation74_spill] sm:$0xff] }
 0x217   : > { %v3686_v4 = vpop.f32.mrf.mxu0  ;;  %v11582_v27 = vld [vmem:[#allocation3 + $0x21] sm:$0xff]  ;;  %v2268_v59 = vadd.f32 %v13509_v6, %v1878_v10  ;;  %v1880_v8 = vadd.f32 %v13513_v62, %v13512_v50  ;;  %v3435_v10 = vadd.f32 %v11413_v1, %v3045_v53 }
 0x218   : > { %3924 = vst.msk [vmem:[#allocation3 + $0x51] sm:$0xff] %vm225_vm1, %v3891_v12  ;;  %v3890_v48 = vmax.f32 %v3858_v14, 0.0  ;;  %v3861_v30 = vadd.f32 %v11471_v45, %v3822_v63  ;;  %v3821_v33 = vadd.f32 %v3686_v4, %v3431_v49  ;;  %v3048_v49 = vadd.f32 %v13510_v60, %v2657_v23  ;;  %v11587_v12 = vpop.f32.mrf.mxu1  ;;  %v13511_v63 = vld [vmem:[#allocation123_spill] sm:$0xff]  ;;  %v13522_v60 = vld [vmem:[#allocation46_spill] sm:$0xff] }
 0x219   : > { %v9222_v37 = vpop.f32.mrf.mxu0  ;;  %v11569_v29 = vld [vmem:[#allocation3 + $0x19] sm:$0xff]  ;;  %v3436_v36 = vadd.f32 %v13511_v63, %v3046_v58 }
 0x21a   : > { %v11571_v25 = vld [vmem:[#allocation3 + $0x18] sm:$0xff]  ;;  %v11573_v16 = vld [vmem:[#allocation3 + $0x20] sm:$0xff]  ;;  %3923 = vst.msk [vmem:[#allocation3 + $0x49] sm:$0xff] %vm225_vm1, %v3890_v48  ;;  %v3893_v51 = vmax.f32 %v3861_v30, 0.0  ;;  %v3860_v57 = vadd.f32 %v11471_v45, %v3821_v33  ;;  %v3824_v11 = vadd.f32 %v9222_v37, %v3434_v5  ;;  %9261 = vmatprep.mubr.msk.f32.mxu1 %vm225_vm1, %v11569_v29  ;;  %v13516_v48 = vld [vmem:[#allocation71_spill] sm:$0xff]  ;;  %v11621_v53 = vpop.f32.mrf.mxu1 }
 0x21b   : > { %9311 = vmatprep.mubr.msk.f32.mxu0 %vm225_vm1, %v11571_v25  ;;  %v3696_v14 = vpop.f32.mrf.mxu0  ;;  %9262 = vmatmul.mubr.msk.f32.gmra.mxu1 %vm225_vm1, %v11582_v27  ;;  %v13514_v5 = vld [vmem:[#allocation45_spill] sm:$0xff]  ;;  %v2659_v30 = vadd.f32 %v13516_v48, %v13515_v54  ;;  %v13517_v33 = vld [vmem:[#allocation115_spill] sm:$0xff]  ;;  %v13527_v54 = vld [vmem:[#allocation118_spill] sm:$0xff] }
 0x21c   : > { %9312 = vmatmul.mubr.msk.f32.gmra.mxu0 %vm225_vm1, %v11573_v16  ;;  %3926 = vst.msk [vmem:[#allocation3 + $0x69] sm:$0xff] %vm225_vm1, %v3893_v51  ;;  %v3892_v7 = vmax.f32 %v3860_v57, 0.0  ;;  %v3863_v15 = vadd.f32 %v11471_v45, %v3824_v11  ;;  %v3823_v52 = vadd.f32 %v3696_v14, %v3433_v20  ;;  %v1492_v4 = vadd.f32 %v13514_v5, %v11484_v21  ;;  %v11616_v23 = vld [vmem:[#allocation3 + $0x39] sm:$0xff]  ;;  %v13520_v51 = vld [vmem:[#allocation128_spill] sm:$0xff] }
 0x21d   : > { %v3047_v55 = vadd.f32 %v13517_v33, %v2656_v35  ;;  %v9225_v56 = vpop.f32.mrf.mxu0  ;;  %v11603_v47 = vld [vmem:[#allocation3 + $0x31] sm:$0xff]  ;;  %v2658_v20 = vadd.f32 %v13518_v3, %v2268_v59  ;;  %v3438_v1 = vadd.f32 %v13520_v51, %v3048_v49  ;;  %v13523_v49 = vld [vmem:[#allocation47_spill] sm:$0xff]  ;;  %v13528_v33 = vld [vmem:[#allocation78_spill] sm:$0xff] }
 0x21e   : > { %v11605_v58 = vld [vmem:[#allocation3 + $0x30] sm:$0xff]  ;;  %v11607_v0 = vld [vmem:[#allocation3 + $0x38] sm:$0xff]  ;;  %3925 = vst.msk [vmem:[#allocation3 + $0x61] sm:$0xff] %vm225_vm1, %v3892_v7  ;;  %v3895_v41 = vmax.f32 %v3863_v15, 0.0  ;;  %v3862_v24 = vadd.f32 %v11471_v45, %v3823_v52  ;;  %v3826_v21 = vadd.f32 %v9225_v56, %v3436_v36  ;;  %9264 = vmatprep.mubr.msk.f32.mxu1 %vm225_vm1, %v11603_v47  ;;  %v1882_v14 = vadd.f32 %v13522_v60, %v1492_v4  ;;  %v13525_v7 = vld [vmem:[#allocation75_spill] sm:$0xff] }
 0x21f   : > { %9314 = vmatprep.mubr.msk.f32.mxu0 %vm225_vm1, %v11605_v58  ;;  %v13519_v37 = vld [vmem:[#allocation77_spill] sm:$0xff]  ;;  %v3706_v57 = vpop.f32.mrf.mxu0  ;;  %9265 = vmatmul.mubr.msk.f32.gmra.mxu1 %vm225_vm1, %v11616_v23  ;;  %v13521_v11 = vld [vmem:[#allocation116_spill] sm:$0xff]  ;;  %v1494_v63 = vadd.f32 %v13523_v49, %v11495_v9  ;;  %v3437_v52 = vadd.f32 %v11425_v13, %v3047_v55  ;;  %v3049_v48 = vadd.f32 %v13527_v54, %v2658_v20  ;;  %v13535_v60 = vld [vmem:[#allocation79_spill] sm:$0xff] }
 0x220   : > { %v2270_v19 = vadd.f32 %v13519_v37, %v1880_v8  ;;  %9315 = vmatmul.mubr.msk.f32.gmra.mxu0 %vm225_vm1, %v11607_v0  ;;  %v3050_v31 = vadd.f32 %v13521_v11, %v2659_v30  ;;  %3928 = vst.msk [vmem:[#allocation3 + $0x81] sm:$0xff] %vm225_vm1, %v3895_v41  ;;  %v3894_v35 = vmax.f32 %v3862_v24, 0.0  ;;  %v3865_v6 = vadd.f32 %v11471_v45, %v3826_v21  ;;  %v13524_v36 = vld [vmem:[#allocation76_spill] sm:$0xff]  ;;  %v13529_v56 = vld [vmem:[#allocation81_spill] sm:$0xff]  ;;  %v13530_v41 = vld [vmem:[#allocation119_spill] sm:$0xff]  ;;  %v11654_v21 = vpop.f32.mrf.mxu1 }
 0x221   : > { %v3825_v59 = vadd.f32 %v3706_v57, %v3435_v10  ;;  %v2661_v15 = vadd.f32 %v13525_v7, %v13524_v36  ;;  %v9228_v50 = vpop.f32.mrf.mxu0  ;;  %v11636_v62 = vld [vmem:[#allocation3 + $0x49] sm:$0xff]  ;;  %v11649_v13 = vld [vmem:[#allocation3 + $0x51] sm:$0xff]  ;;  %v2272_v10 = vadd.f32 %v13529_v56, %v1882_v14  ;;  %v3439_v54 = vadd.f32 %v11444_v44, %v3049_v48 }
 0x222   : > { %v11638_v8 = vld [vmem:[#allocation3 + $0x48] sm:$0xff]  ;;  %v11640_v5 = vld [vmem:[#allocation3 + $0x50] sm:$0xff]  ;;  %3927 = vst.msk [vmem:[#allocation3 + $0x79] sm:$0xff] %vm225_vm1, %v3894_v35  ;;  %v3897_v4 = vmax.f32 %v3865_v6, 0.0  ;;  %v3828_v9 = vadd.f32 %v9228_v50, %v3438_v1  ;;  %9267 = vmatprep.mubr.msk.f32.mxu1 %vm225_vm1, %v11636_v62  ;;  %v2660_v55 = vadd.f32 %v13528_v33, %v2270_v19  ;;  %v13531_v20 = vld [vmem:[#allocation133_spill] sm:$0xff]  ;;  %v11687_v48 = vpop.f32.mrf.mxu1 }
 0x223   : > { %13526 = vst [vmem:[#allocation62_spill] sm:$0xff] %v11640_v5  ;;  %v3864_v30 = vadd.f32 %v11471_v45, %v3825_v59  ;;  %9317 = vmatprep.mubr.msk.f32.mxu0 %vm225_vm1, %v11638_v8  ;;  %v3052_v24 = vadd.f32 %v13530_v41, %v2661_v15  ;;  %v3716_v3 = vpop.f32.mrf.mxu0  ;;  %9268 = vmatmul.mubr.msk.f32.gmra.mxu1 %vm225_vm1, %v11649_v13  ;;  %v13532_v57 = vld [vmem:[#allocation48_spill] sm:$0xff]  ;;  %v13533_v35 = vld [vmem:[#allocation49_spill] sm:$0xff]  ;;  %v13541_v41 = vld [vmem:[#allocation122_spill] sm:$0xff] }
 0x224   : > { %9318 = vmatmul.mubr.msk.f32.gmra.mxu0 %vm225_vm1, %v11640_v5  ;;  %v3440_v37 = vadd.f32 %v13531_v20, %v3050_v31  ;;  %3930 = vst.msk [vmem:[#allocation3 + $0x99] sm:$0xff] %vm225_vm1, %v3897_v4  ;;  %v3867_v19 = vadd.f32 %v11471_v45, %v3828_v9  ;;  %v3827_v1 = vadd.f32 %v3716_v3, %v3437_v52  ;;  %v13534_v59 = vld [vmem:[#allocation80_spill] sm:$0xff]  ;;  %v13536_v49 = vld [vmem:[#allocation121_spill] sm:$0xff] }
 0x225   : > { %v3896_v51 = vmax.f32 %v3864_v30, 0.0  ;;  %v1884_v11 = vadd.f32 %v13532_v57, %v1494_v63  ;;  %v1496_v6 = vadd.f32 %v13533_v35, %v11507_v26  ;;  %v2663_v14 = vadd.f32 %v13535_v60, %v13534_v59  ;;  %v9231_v7 = vpop.f32.mrf.mxu0  ;;  %v11669_v15 = vld [vmem:[#allocation3 + $0x61] sm:$0xff]  ;;  %v11682_v4 = vld [vmem:[#allocation3 + $0x69] sm:$0xff]  ;;  %v13540_v33 = vld [vmem:[#allocation85_spill] sm:$0xff] }
 0x226   : > { %v3051_v36 = vadd.f32 %v13536_v49, %v2660_v55  ;;  %v11671_v31 = vld [vmem:[#allocation3 + $0x60] sm:$0xff]  ;;  %v11673_v50 = vld [vmem:[#allocation3 + $0x68] sm:$0xff]  ;;  %v3899_v63 = vmax.f32 %v3867_v19, 0.0  ;;  %v3866_v52 = vadd.f32 %v11471_v45, %v3827_v1  ;;  %v3830_v26 = vadd.f32 %v9231_v7, %v3440_v37  ;;  %9270 = vmatprep.mubr.msk.f32.mxu1 %vm225_vm1, %v11669_v15  ;;  %v13544_v1 = vld [vmem:[#allocation84_spill] sm:$0xff] }
 0x227   : > { %13537 = vst [vmem:[#allocation65_spill] sm:$0xff] %v11671_v31  ;;  %13538 = vst [vmem:[#allocation108_spill] sm:$0xff] %v11673_v50  ;;  %9320 = vmatprep.mubr.msk.f32.mxu0 %vm225_vm1, %v11671_v31  ;;  %v13539_v30 = vld [vmem:[#allocation82_spill] sm:$0xff]  ;;  %v2274_v55 = vadd.f32 %v13540_v33, %v1884_v11  ;;  %v3442_v44 = vadd.f32 %v11457_v61, %v3052_v24  ;;  %v3726_v56 = vpop.f32.mrf.mxu0  ;;  %9271 = vmatmul.mubr.msk.f32.gmra.mxu1 %vm225_vm1, %v11682_v4  ;;  %v13543_v61 = vld [vmem:[#allocation53_spill] sm:$0xff] }
 0x228   : > { %3929 = vst.msk [vmem:[#allocation3 + $0x91] sm:$0xff] %vm225_vm1, %v3896_v51  ;;  %v2662_v9 = vadd.f32 %v13539_v30, %v2272_v10  ;;  %9321 = vmatmul.mubr.msk.f32.gmra.mxu0 %vm225_vm1, %v11673_v50  ;;  %v3054_v3 = vadd.f32 %v13541_v41, %v2663_v14  ;;  %3932 = vst.msk [vmem:[#allocation3 + $0xb1] sm:$0xff] %vm225_vm1, %v3899_v63  ;;  %v3898_v20 = vmax.f32 %v3866_v52, 0.0  ;;  %v13542_v51 = vld [vmem:[#allocation50_spill] sm:$0xff]  ;;  %v13545_v57 = vld [vmem:[#allocation83_spill] sm:$0xff] }
 0x229   : > { %v3869_v10 = vadd.f32 %v11471_v45, %v3830_v26  ;;  %v3829_v37 = vadd.f32 %v3726_v56, %v3439_v54  ;;  %v1886_v19 = vadd.f32 %v13542_v51, %v1496_v6  ;;  %v1498_v24 = vadd.f32 %v13543_v61, %v11519_v17  ;;  %v9234_v59 = vpop.f32.mrf.mxu0  ;;  %v11702_v60 = vld [vmem:[#allocation3 + $0x79] sm:$0xff]  ;;  %v13548_v7 = vld [vmem:[#allocation124_spill] sm:$0xff]  ;;  %v11720_v56 = vpop.f32.mrf.mxu1 }
 0x22a   : > { %v2665_v11 = vadd.f32 %v13545_v57, %v13544_v1  ;;  %v3441_v35 = vadd.f32 %v11478_v34, %v3051_v36  ;;  %v11704_v14 = vld [vmem:[#allocation3 + $0x78] sm:$0xff]  ;;  %v11706_v49 = vld [vmem:[#allocation3 + $0x80] sm:$0xff]  ;;  %v3053_v63 = vadd.f32 %v13548_v7, %v2662_v9  ;;  %3931 = vst.msk [vmem:[#allocation3 + $0xa9] sm:$0xff] %vm225_vm1, %v3898_v20  ;;  %v3832_v17 = vadd.f32 %v9234_v59, %v3442_v44  ;;  %v13554_v1 = vld [vmem:[#allocation88_spill] sm:$0xff] }
 0x22b   : > { %13546 = vst [vmem:[#allocation111_spill] sm:$0xff] %v11704_v14  ;;  %13547 = vst [vmem:[#allocation63_spill] sm:$0xff] %v11706_v49  ;;  %v3901_v6 = vmax.f32 %v3869_v10, 0.0  ;;  %v3868_v54 = vadd.f32 %v11471_v45, %v3829_v37  ;;  %9273 = vmatprep.mubr.msk.f32.mxu1 %vm225_vm1, %v11702_v60  ;;  %9323 = vmatprep.mubr.msk.f32.mxu0 %vm225_vm1, %v11704_v14  ;;  %v11715_v34 = vld [vmem:[#allocation3 + $0x81] sm:$0xff]  ;;  %v13550_v26 = vld [vmem:[#allocation89_spill] sm:$0xff]  ;;  %v3736_v41 = vpop.f32.mrf.mxu0  ;;  %v3444_v44 = vadd.f32 %v11500_v38, %v3054_v3 }
 0x22c   : > { %v13549_v36 = vld [vmem:[#allocation86_spill] sm:$0xff]  ;;  %v2276_v30 = vadd.f32 %v13550_v26, %v1886_v19  ;;  %v13551_v33 = vld [vmem:[#allocation125_spill] sm:$0xff]  ;;  %9274 = vmatmul.mubr.msk.f32.gmra.mxu1 %vm225_vm1, %v11715_v34  ;;  %9324 = vmatmul.mubr.msk.f32.gmra.mxu0 %vm225_vm1, %v11706_v49  ;;  %v3831_v10 = vadd.f32 %v3736_v41, %v3441_v35  ;;  %v13553_v19 = vld [vmem:[#allocation55_spill] sm:$0xff] }
 0x22d   : > { %v2664_v52 = vadd.f32 %v13549_v36, %v2274_v55  ;;  %v3056_v9 = vadd.f32 %v13551_v33, %v2665_v11  ;;  %3934 = vst.msk [vmem:[#allocation3 + $0xc9] sm:$0xff] %vm225_vm1, %v3901_v6  ;;  %v3900_v20 = vmax.f32 %v3868_v54, 0.0  ;;  %v3871_v55 = vadd.f32 %v11471_v45, %v3832_v17  ;;  %v13552_v37 = vld [vmem:[#allocation54_spill] sm:$0xff]  ;;  %v13555_v57 = vld [vmem:[#allocation87_spill] sm:$0xff]  ;;  %v9237_v36 = vpop.f32.mrf.mxu0  ;;  %v13561_v33 = vld [vmem:[#allocation93_spill] sm:$0xff] }
 0x22e   : > { %v1888_v51 = vadd.f32 %v13552_v37, %v1498_v24  ;;  %v1500_v61 = vadd.f32 %v13553_v19, %v11536_v39  ;;  %v2667_v11 = vadd.f32 %v13555_v57, %v13554_v1  ;;  %v13556_v59 = vld [vmem:[#allocation126_spill] sm:$0xff]  ;;  %v3443_v6 = vadd.f32 %v11524_v2, %v3053_v63  ;;  %v11753_v63 = vpop.f32.mrf.mxu1  ;;  %v13565_v1 = vld [vmem:[#allocation92_spill] sm:$0xff]  ;;  %v13566_v57 = vld [vmem:[#allocation91_spill] sm:$0xff] }
 0x22f   : > { %v3055_v7 = vadd.f32 %v13556_v59, %v2664_v52  ;;  %v11735_v26 = vld [vmem:[#allocation3 + $0x91] sm:$0xff]  ;;  %3933 = vst.msk [vmem:[#allocation3 + $0xc1] sm:$0xff] %vm225_vm1, %v3900_v20  ;;  %v3903_v24 = vmax.f32 %v3871_v55, 0.0  ;;  %v3870_v35 = vadd.f32 %v11471_v45, %v3831_v10  ;;  %v3834_v39 = vadd.f32 %v9237_v36, %v3444_v44  ;;  %v11748_v54 = vld [vmem:[#allocation3 + $0x99] sm:$0xff]  ;;  %v3746_v20 = vpop.f32.mrf.mxu0  ;;  %v13562_v44 = vld [vmem:[#allocation127_spill] sm:$0xff] }
 0x230   : > { %v11737_v38 = vld [vmem:[#allocation3 + $0x90] sm:$0xff]  ;;  %v11739_v3 = vld [vmem:[#allocation3 + $0x98] sm:$0xff]  ;;  %9276 = vmatprep.mubr.msk.f32.mxu1 %vm225_vm1, %v11735_v26  ;;  %13559 = vst [vmem:[#allocation29_spill] sm:$0xff] %v11748_v54  ;;  %v13560_v17 = vld [vmem:[#allocation90_spill] sm:$0xff]  ;;  %v2278_v41 = vadd.f32 %v13561_v33, %v1888_v51  ;;  %v3446_v2 = vadd.f32 %v11555_v46, %v3056_v9  ;;  %v3058_v55 = vadd.f32 %v13562_v44, %v2667_v11 }
 0x231   : > { %13557 = vst [vmem:[#allocation24_spill] sm:$0xff] %v11737_v38  ;;  %13558 = vst [vmem:[#allocation30_spill] sm:$0xff] %v11739_v3  ;;  %9326 = vmatprep.mubr.msk.f32.mxu0 %vm225_vm1, %v11737_v38  ;;  %v2666_v52 = vadd.f32 %v13560_v17, %v2276_v30  ;;  %9277 = vmatmul.mubr.msk.f32.gmra.mxu1 %vm225_vm1, %v11748_v54  ;;  %v3902_v10 = vmax.f32 %v3870_v35, 0.0  ;;  %v3873_v30 = vadd.f32 %v11471_v45, %v3834_v39  ;;  %v13563_v51 = vld [vmem:[#allocation56_spill] sm:$0xff]  ;;  %v13564_v46 = vld [vmem:[#allocation57_spill] sm:$0xff]  ;;  %v9240_v17 = vpop.f32.mrf.mxu0 }
 0x232   : > { %9327 = vmatmul.mubr.msk.f32.gmra.mxu0 %vm225_vm1, %v11739_v3  ;;  %3936 = vst.msk [vmem:[#allocation3 + $0xe1] sm:$0xff] %vm225_vm1, %v3903_v24  ;;  %v3833_v37 = vadd.f32 %v3746_v20, %v3443_v6  ;;  %v1890_v19 = vadd.f32 %v13563_v51, %v1500_v61  ;;  %v1502_v9 = vadd.f32 %v13564_v46, %v11550_v28  ;;  %v11768_v33 = vld [vmem:[#allocation3 + $0xa9] sm:$0xff]  ;;  %v13570_v35 = vld [vmem:[#allocation129_spill] sm:$0xff]  ;;  %v13574_v46 = vld [vmem:[#allocation130_spill] sm:$0xff] }
 0x233   : > { %v2669_v59 = vadd.f32 %v13566_v57, %v13565_v1  ;;  %v3445_v36 = vadd.f32 %v11587_v12, %v3055_v7  ;;  %13567 = vst [vmem:[#allocation64_spill] sm:$0xff] %v11768_v33  ;;  %v11770_v11 = vld [vmem:[#allocation3 + $0xa8] sm:$0xff]  ;;  %v11772_v24 = vld [vmem:[#allocation3 + $0xb0] sm:$0xff]  ;;  %v3057_v39 = vadd.f32 %v13570_v35, %v2666_v52  ;;  %3935 = vst.msk [vmem:[#allocation3 + $0xd9] sm:$0xff] %vm225_vm1, %v3902_v10  ;;  %v3905_v61 = vmax.f32 %v3873_v30, 0.0  ;;  %v11786_v1 = vpop.f32.mrf.mxu1  ;;  %v3756_v10 = vpop.f32.mrf.mxu0 }
 0x234   : > { %13568 = vst [vmem:[#allocation61_spill] sm:$0xff] %v11770_v11  ;;  %13569 = vst [vmem:[#allocation109_spill] sm:$0xff] %v11772_v24  ;;  %v3872_v6 = vadd.f32 %v11471_v45, %v3833_v37  ;;  %v3836_v28 = vadd.f32 %v9240_v17, %v3446_v2  ;;  %9279 = vmatprep.mubr.msk.f32.mxu1 %vm225_vm1, %v11768_v33  ;;  %9329 = vmatprep.mubr.msk.f32.mxu0 %vm225_vm1, %v11770_v11  ;;  %v11781_v12 = vld [vmem:[#allocation3 + $0xb1] sm:$0xff]  ;;  %v13572_v7 = vld [vmem:[#allocation94_spill] sm:$0xff] }
 0x235   : > { %13571 = vst [vmem:[#allocation114_spill] sm:$0xff] %v11781_v12  ;;  %v2668_v20 = vadd.f32 %v13572_v7, %v2278_v41  ;;  %v13573_v44 = vld [vmem:[#allocation97_spill] sm:$0xff]  ;;  %v3060_v52 = vadd.f32 %v13574_v46, %v2669_v59  ;;  %9280 = vmatmul.mubr.msk.f32.gmra.mxu1 %vm225_vm1, %v11781_v12  ;;  %v3448_v2 = vadd.f32 %v11621_v53, %v3058_v55  ;;  %3938 = vst.msk [vmem:[#allocation3 + $0xf9] sm:$0xff] %vm225_vm1, %v3905_v61  ;;  %v13576_v59 = vld [vmem:[#allocation59_spill] sm:$0xff]  ;;  %v9243_v33 = vpop.f32.mrf.mxu0 }
 0x236   : > { %v2280_v51 = vadd.f32 %v13573_v44, %v1890_v19  ;;  %9330 = vmatmul.mubr.msk.f32.gmra.mxu0 %vm225_vm1, %v11772_v24  ;;  %v3904_v30 = vmax.f32 %v3872_v6, 0.0  ;;  %v3875_v41 = vadd.f32 %v11471_v45, %v3836_v28  ;;  %v3835_v37 = vadd.f32 %v3756_v10, %v3445_v36  ;;  %v13575_v19 = vld [vmem:[#allocation58_spill] sm:$0xff]  ;;  %v13577_v35 = vld [vmem:[#allocation96_spill] sm:$0xff]  ;;  %v13578_v7 = vld [vmem:[#allocation95_spill] sm:$0xff] }
 0x237   : > { %v1892_v57 = vadd.f32 %v13575_v19, %v1502_v9  ;;  %v1504_v17 = vadd.f32 %v13576_v59, %v11562_v22  ;;  %v2671_v44 = vadd.f32 %v13578_v7, %v13577_v35  ;;  %v13579_v46 = vld [vmem:[#allocation131_spill] sm:$0xff]  ;;  %v11803_v53 = vld [vmem:[#allocation3 + $0xc0] sm:$0xff]  ;;  %v3447_v61 = vadd.f32 %v11654_v21, %v3057_v39  ;;  %v13584_v10 = vld [vmem:[#allocation101_spill] sm:$0xff]  ;;  %v9202_v39 = vpop.f32.mrf.mxu1 }
 0x238   : > { %v3059_v12 = vadd.f32 %v13579_v46, %v2668_v20  ;;  %v11801_v54 = vld [vmem:[#allocation3 + $0xc1] sm:$0xff]  ;;  %13580 = vst [vmem:[#allocation25_spill] sm:$0xff] %v11803_v53  ;;  %3937 = vst.msk [vmem:[#allocation3 + $0xf1] sm:$0xff] %vm225_vm1, %v3904_v30  ;;  %v3907_v9 = vmax.f32 %v3875_v41, 0.0  ;;  %v3874_v36 = vadd.f32 %v11471_v45, %v3835_v37  ;;  %v3838_v22 = vadd.f32 %v9243_v33, %v3448_v2  ;;  %v11814_v6 = vld [vmem:[#allocation3 + $0xc9] sm:$0xff]  ;;  %v3766_v30 = vpop.f32.mrf.mxu0 }
 0x239   : > { %v11805_v55 = vld [vmem:[#allocation3 + $0xc8] sm:$0xff]  ;;  %9282 = vmatprep.mubr.msk.f32.mxu1 %vm225_vm1, %v11801_v54  ;;  %9332 = vmatprep.mubr.msk.f32.mxu0 %vm225_vm1, %v11803_v53  ;;  %13582 = vst [vmem:[#allocation66_spill] sm:$0xff] %v11814_v6  ;;  %v13583_v28 = vld [vmem:[#allocation98_spill] sm:$0xff]  ;;  %v2282_v19 = vadd.f32 %v13584_v10, %v1892_v57  ;;  %v3450_v21 = vadd.f32 %v11687_v48, %v3060_v52  ;;  %v13585_v33 = vld [vmem:[#allocation132_spill] sm:$0xff] }
 0x23a   : > { %13581 = vst [vmem:[#allocation26_spill] sm:$0xff] %v11805_v55  ;;  %v2670_v20 = vadd.f32 %v13583_v28, %v2280_v51  ;;  %9283 = vmatmul.mubr.msk.f32.gmra.mxu1 %vm225_vm1, %v11814_v6  ;;  %9333 = vmatmul.mubr.msk.f32.gmra.mxu0 %vm225_vm1, %v11805_v55  ;;  %v3062_v2 = vadd.f32 %v13585_v33, %v2671_v44  ;;  %3940 = vst.msk [vmem:[#allocation3 + $0x111] sm:$0xff] %vm225_vm1, %v3907_v9  ;;  %v3906_v41 = vmax.f32 %v3874_v36, 0.0  ;;  %v13586_v59 = vld [vmem:[#allocation60_spill] sm:$0xff]  ;;  %v13588_v48 = vld [vmem:[#allocation99_spill] sm:$0xff]  ;;  %v9246_v46 = vpop.f32.mrf.mxu0 }
 0x23b   : > { %v3877_v37 = vadd.f32 %v11471_v45, %v3838_v22  ;;  %v3837_v51 = vadd.f32 %v3766_v30, %v3447_v61  ;;  %v1894_v57 = vadd.f32 %v13586_v59, %v1504_v17  ;;  %v13587_v35 = vld [vmem:[#allocation100_spill] sm:$0xff]  ;;  %v3449_v7 = vadd.f32 %v11720_v56, %v3059_v12  ;;  %v11830_v28 = vld [vmem:[#allocation3 + $0xd9] sm:$0xff]  ;;  %v11843_v56 = vld [vmem:[#allocation3 + $0xe1] sm:$0xff] }
 0x23c   : > { %v2673_v52 = vadd.f32 %v13588_v48, %v13587_v35  ;;  %v11832_v10 = vld [vmem:[#allocation3 + $0xd8] sm:$0xff]  ;;  %v11834_v6 = vld [vmem:[#allocation3 + $0xe0] sm:$0xff]  ;;  %v3061_v44 = vadd.f32 %v11435_v40, %v2670_v20  ;;  %3939 = vst.msk [vmem:[#allocation3 + $0x109] sm:$0xff] %vm225_vm1, %v3906_v41  ;;  %v3840_v17 = vadd.f32 %v9246_v46, %v3450_v21  ;;  %9285 = vmatprep.mubr.msk.f32.mxu1 %vm225_vm1, %v11830_v28  ;;  %v3406_v20 = vpop.f32.mrf.mxu1  ;;  %v3776_v41 = vpop.f32.mrf.mxu0  ;;  %v13594_v59 = vld [vmem:[#allocation104_spill] sm:$0xff] }
 0x23d   : > { %13589 = vst [vmem:[#allocation69_spill] sm:$0xff] %v11832_v10  ;;  %13590 = vst [vmem:[#allocation117_spill] sm:$0xff] %v11834_v6  ;;  %v3909_v9 = vmax.f32 %v3877_v37, 0.0  ;;  %v3876_v61 = vadd.f32 %v11471_v45, %v3837_v51  ;;  %9335 = vmatprep.mubr.msk.f32.mxu0 %vm225_vm1, %v11832_v10  ;;  %v13591_v12 = vld [vmem:[#allocation102_spill] sm:$0xff]  ;;  %v13592_v22 = vld [vmem:[#allocation105_spill] sm:$0xff]  ;;  %v3452_v21 = vadd.f32 %v11753_v63, %v3062_v2 }
 0x23e   : > { %v2672_v36 = vadd.f32 %v13591_v12, %v2282_v19  ;;  %v2284_v30 = vadd.f32 %v13592_v22, %v1894_v57  ;;  %v13593_v33 = vld [vmem:[#allocation134_spill] sm:$0xff]  ;;  %9286 = vmatmul.mubr.msk.f32.gmra.mxu1 %vm225_vm1, %v11843_v56  ;;  %9336 = vmatmul.mubr.msk.f32.gmra.mxu0 %vm225_vm1, %v11834_v6  ;;  %v3879_v51 = vadd.f32 %v11471_v45, %v3840_v17  ;;  %v13595_v57 = vld [vmem:[#allocation103_spill] sm:$0xff] }
 0x23f   : > { %v3064_v40 = vadd.f32 %v13593_v33, %v2673_v52  ;;  %3942 = vst.msk [vmem:[#allocation3 + $0x129] sm:$0xff] %vm225_vm1, %v3909_v9  ;;  %v3908_v37 = vmax.f32 %v3876_v61, 0.0  ;;  %v3839_v19 = vadd.f32 %v3776_v41, %v3449_v7  ;;  %v2675_v35 = vadd.f32 %v13595_v57, %v13594_v59  ;;  %v9249_v52 = vpop.f32.mrf.mxu0  ;;  %v11858_v46 = vld [vmem:[#allocation3 + $0xf1] sm:$0xff]  ;;  %v13598_v61 = vld [vmem:[#allocation106_spill] sm:$0xff]  ;;  %v9205_v33 = vpop.f32.mrf.mxu1 }
 0x240   : > { %v3063_v48 = vadd.f32 %v11446_v32, %v2672_v36  ;;  %v11860_v12 = vld [vmem:[#allocation3 + $0xf0] sm:$0xff]  ;;  %v11862_v22 = vld [vmem:[#allocation3 + $0xf8] sm:$0xff]  ;;  %v3451_v63 = vadd.f32 %v11786_v1, %v3061_v44  ;;  %v3911_v2 = vmax.f32 %v3879_v51, 0.0  ;;  %v3842_v7 = vadd.f32 %v9249_v52, %v3452_v21  ;;  %9288 = vmatprep.mubr.msk.f32.mxu1 %vm225_vm1, %v11858_v46 }
 0x241   : > { %13596 = vst [vmem:[#allocation110_spill] sm:$0xff] %v11860_v12  ;;  %13597 = vst [vmem:[#allocation27_spill] sm:$0xff] %v11862_v22  ;;  %v3878_v9 = vadd.f32 %v11471_v45, %v3839_v19  ;;  %9338 = vmatprep.mubr.msk.f32.mxu0 %vm225_vm1, %v11860_v12  ;;  %v11871_v32 = vld [vmem:[#allocation3 + $0xf9] sm:$0xff]  ;;  %v2674_v17 = vadd.f32 %v13598_v61, %v2284_v30  ;;  %v3454_v36 = vadd.f32 %v9202_v39, %v3064_v40  ;;  %v3786_v41 = vpop.f32.mrf.mxu0 }
 0x242   : > { %3941 = vst.msk [vmem:[#allocation3 + $0x121] sm:$0xff] %vm225_vm1, %v3908_v37  ;;  %9289 = vmatmul.mubr.msk.f32.gmra.mxu1 %vm225_vm1, %v11871_v32  ;;  %9339 = vmatmul.mubr.msk.f32.gmra.mxu0 %vm225_vm1, %v11862_v22  ;;  %v3066_v1 = vadd.f32 %v11452_v42, %v2675_v35  ;;  %3944 = vst.msk [vmem:[#allocation3 + $0x141] sm:$0xff] %vm225_vm1, %v3911_v2  ;;  %v3881_v21 = vadd.f32 %v11471_v45, %v3842_v7 }
 0x243   : > { %v3910_v44 = vmax.f32 %v3878_v9, 0.0  ;;  %v3841_v37 = vadd.f32 %v3786_v41, %v3451_v63  ;;  %v3453_v51 = vadd.f32 %v3406_v20, %v3063_v48  ;;  %v9252_v19 = vpop.f32.mrf.mxu0  ;;  %v11881_v30 = vld [vmem:[#allocation3 + $0x109] sm:$0xff]  ;;  %v3065_v59 = vadd.f32 %v11459_v43, %v2674_v17  ;;  %v11894_v20 = vld [vmem:[#allocation3 + $0x111] sm:$0xff]  ;;  %v3416_v48 = vpop.f32.mrf.mxu1 }
 0x244   : > { %v11883_v39 = vld [vmem:[#allocation3 + $0x108] sm:$0xff]  ;;  %v11885_v40 = vld [vmem:[#allocation3 + $0x110] sm:$0xff]  ;;  %v3913_v57 = vmax.f32 %v3881_v21, 0.0  ;;  %v3844_v35 = vadd.f32 %v9252_v19, %v3454_v36  ;;  %9291 = vmatprep.mubr.msk.f32.mxu1 %vm225_vm1, %v11881_v30  ;;  %v3456_v43 = vadd.f32 %v9205_v33, %v3066_v1 }
 0x245   : > { %13599 = vst [vmem:[#allocation28_spill] sm:$0xff] %v11883_v39  ;;  %13600 = vst [vmem:[#allocation40_spill] sm:$0xff] %v11885_v40  ;;  %v3880_v42 = vadd.f32 %v11471_v45, %v3841_v37  ;;  %9341 = vmatprep.mubr.msk.f32.mxu0 %vm225_vm1, %v11883_v39  ;;  %v3796_v52 = vpop.f32.mrf.mxu0  ;;  %v3455_v41 = vadd.f32 %v3416_v48, %v3065_v59 }
 0x246   : > { %3943 = vst.msk [vmem:[#allocation3 + $0x139] sm:$0xff] %vm225_vm1, %v3910_v44  ;;  %9292 = vmatmul.mubr.msk.f32.gmra.mxu1 %vm225_vm1, %v11894_v20  ;;  %9342 = vmatmul.mubr.msk.f32.gmra.mxu0 %vm225_vm1, %v11885_v40  ;;  %3946 = vst.msk [vmem:[#allocation3 + $0x159] sm:$0xff] %vm225_vm1, %v3913_v57  ;;  %v3883_v2 = vadd.f32 %v11471_v45, %v3844_v35  ;;  %v3843_v9 = vadd.f32 %v3796_v52, %v3453_v51  ;;  %v11914_v1 = vld [vmem:[#allocation3 + $0x129] sm:$0xff] }
 0x247   : > { %v3912_v63 = vmax.f32 %v3880_v42, 0.0  ;;  %v9255_v7 = vpop.f32.mrf.mxu0 }
 0x248   : > { %v3915_v44 = vmax.f32 %v3883_v2, 0.0  ;;  %v3882_v21 = vadd.f32 %v11471_v45, %v3843_v9  ;;  %v3846_v33 = vadd.f32 %v9255_v7, %v3456_v43 }
 0x249   : > { %v11902_v61 = vld [vmem:[#allocation3 + $0x121] sm:$0xff]  ;;  %3945 = vst.msk [vmem:[#allocation3 + $0x151] sm:$0xff] %vm225_vm1, %v3912_v63  ;;  %v3806_v37 = vpop.f32.mrf.mxu0 }
 0x24a   : > { %v11904_v17 = vld [vmem:[#allocation3 + $0x120] sm:$0xff]  ;;  %v11906_v36 = vld [vmem:[#allocation3 + $0x128] sm:$0xff]  ;;  %9294 = vmatprep.mubr.msk.f32.mxu1 %vm225_vm1, %v11902_v61  ;;  %3948 = vst.msk [vmem:[#allocation3 + $0x171] sm:$0xff] %vm225_vm1, %v3915_v44  ;;  %v3914_v51 = vmax.f32 %v3882_v21, 0.0  ;;  %v3885_v19 = vadd.f32 %v11471_v45, %v3846_v33  ;;  %v3845_v59 = vadd.f32 %v3806_v37, %v3455_v41 }
 0x24b   : > { %13601 = vst [vmem:[#allocation31_spill] sm:$0xff] %v11904_v17  ;;  %13602 = vst [vmem:[#allocation68_spill] sm:$0xff] %v11906_v36  ;;  %9344 = vmatprep.mubr.msk.f32.mxu0 %vm225_vm1, %v11904_v17  ;;  %9295 = vmatmul.mubr.msk.f32.gmra.mxu1 %vm225_vm1, %v11914_v1  ;;  %v11934_v43 = vld [vmem:[#allocation3 + $0x141] sm:$0xff] }
 0x24c   : > { %9345 = vmatmul.mubr.msk.f32.gmra.mxu0 %vm225_vm1, %v11906_v36  ;;  %3947 = vst.msk [vmem:[#allocation3 + $0x169] sm:$0xff] %vm225_vm1, %v3914_v51  ;;  %v3917_v48 = vmax.f32 %v3885_v19, 0.0  ;;  %v3884_v52 = vadd.f32 %v11471_v45, %v3845_v59  ;;  %v4666_v41 = vld [vmem:[#allocation3 + $0x2] sm:$0xff]  ;;  %v4667_v51 = vld [vmem:[#allocation3 + $0xa] sm:$0xff] }
 0x24d   : > { %v11922_v57 = vld [vmem:[#allocation3 + $0x139] sm:$0xff] }
 0x24e   : > { %v11924_v42 = vld [vmem:[#allocation3 + $0x138] sm:$0xff]  ;;  %v11926_v35 = vld [vmem:[#allocation3 + $0x140] sm:$0xff]  ;;  %9297 = vmatprep.mubr.msk.f32.mxu1 %vm225_vm1, %v11922_v57  ;;  %3950 = vst.msk [vmem:[#allocation3 + $0x189] sm:$0xff] %vm225_vm1, %v3917_v48  ;;  %v3916_v63 = vmax.f32 %v3884_v52, 0.0  ;;  %v11985_v52 = vld [vmem:[%s13192_s3 + $0x18] sm:$0xf] }
 0x24f   : > { %13603 = vst [vmem:[#allocation67_spill] sm:$0xff] %v11924_v42  ;;  %13604 = vst [vmem:[#allocation120_spill] sm:$0xff] %v11926_v35  ;;  %9347 = vmatprep.mubr.msk.f32.mxu0 %vm225_vm1, %v11924_v42  ;;  %9298 = vmatmul.mubr.msk.f32.gmra.mxu1 %vm225_vm1, %v11934_v43  ;;  %v11952_v7 = vld [vmem:[#allocation3 + $0x159] sm:$0xff] }
 0x250   : > { %9348 = vmatmul.mubr.msk.f32.gmra.mxu0 %vm225_vm1, %v11926_v35  ;;  %v11941_v2 = vld [vmem:[#allocation3 + $0x151] sm:$0xff]  ;;  %3949 = vst.msk [vmem:[#allocation3 + $0x181] sm:$0xff] %vm225_vm1, %v3916_v63  ;;  %v9260_v19 = vpop.f32.mrf.mxu1  ;;  %v11980_v48 = vld [vmem:[#allocation3 + $0x1a] sm:$0xff] }
 0x251   : > { %v11943_v45 = vld [vmem:[#allocation3 + $0x150] sm:$0xff]  ;;  %v11945_v9 = vld [vmem:[#allocation3 + $0x158] sm:$0xff]  ;;  %9300 = vmatprep.mubr.msk.f32.mxu1 %vm225_vm1, %v11941_v2  ;;  %v9310_v59 = vpop.f32.mrf.mxu0 }
 0x252   : > { %13605 = vst [vmem:[#allocation112_spill] sm:$0xff] %v11943_v45  ;;  %13606 = vst [vmem:[#allocation70_spill] sm:$0xff] %v11945_v9  ;;  %9350 = vmatprep.mubr.msk.f32.mxu0 %vm225_vm1, %v11943_v45  ;;  %v11968_v37 = vld [vmem:[#allocation3 + $0x171] sm:$0xff]  ;;  %v11992_v63 = vadd.f32 %v9310_v59, %v9260_v19 }
 0x253   : > { %9301 = vmatmul.mubr.msk.f32.gmra.mxu1 %vm225_vm1, %v11952_v7  ;;  %v11958_v44 = vld [vmem:[#allocation3 + $0x169] sm:$0xff]  ;;  %v12030_v59 = vld [vmem:[#allocation3 + $0x52] sm:$0xff] }
 0x254   : > { %9351 = vmatmul.mubr.msk.f32.gmra.mxu0 %vm225_vm1, %v11945_v9  ;;  %v11960_v21 = vld [vmem:[#allocation3 + $0x168] sm:$0xff]  ;;  %v11962_v33 = vld [vmem:[#allocation3 + $0x170] sm:$0xff]  ;;  %9303 = vmatprep.mubr.msk.f32.mxu1 %vm225_vm1, %v11958_v44  ;;  %13608 = vst [vmem:[#allocation113_spill] sm:$0xff] %v11992_v63 }
 0x255   : > { %13607 = vst [vmem:[#allocation73_spill] sm:$0xff] %v11960_v21  ;;  %9353 = vmatprep.mubr.msk.f32.mxu0 %vm225_vm1, %v11960_v21  ;;  %v12024_v19 = vld [vmem:[#allocation3 + $0x4a] sm:$0xff] }
 0x256   : > { %v12042_v63 = vld [vmem:[#allocation3 + $0x6a] sm:$0xff] }
 0x257   : > { %9304 = vmatmul.mubr.msk.f32.gmra.mxu1 %vm225_vm1, %v11968_v37 }
 0x258   : > { %9354 = vmatmul.mubr.msk.f32.gmra.mxu0 %vm225_vm1, %v11962_v33  ;;  %9358 = vmatprep.mubr.msk.f32.mxu1 %vm225_vm1, %v4666_v41  ;;  %v13609_v41 = vld [vmem:[#allocation107_spill] sm:$0xff] }
 0x259   : > { %9408 = vmatprep.mubr.msk.f32.mxu0 %vm225_vm1, %v11571_v25  ;;  %v11990_v25 = vld [vmem:[%s13192_s3 + $0x1c] sm:$0xf] }
 0x25b   : > { %9359 = vmatmul.mubr.msk.f32.vlgmr.msra.gmra.mxu1 %vm225_vm1, %v4667_v51  ;;  %v12012_v51 = vld [vmem:[#allocation3 + $0x32] sm:$0xff] }
 0x25c   : > { %9409 = vmatmul.mubr.msk.f32.vlgmr.msra.gmra.mxu0 %vm225_vm1, %v11573_v16  ;;  %9457 = vmatpush3.msk.msra.mxu1 %vm563_vm0, %v13609_v41  ;;  %v12002_v16 = vld [vmem:[#allocation3 + $0x22] sm:$0xff] }
 0x25d   : > { %9361 = vmatprep.mubr.msk.f32.mxu1 %vm225_vm1, %v11980_v48  ;;  %9411 = vmatprep.mubr.msk.f32.mxu0 %vm225_vm1, %v11605_v58  ;;  %v12036_v41 = vld [vmem:[#allocation3 + $0x62] sm:$0xff] }
 0x25e   : > { %9507 = vmatpush3.msk.msra.mxu0 %vm563_vm0, %v11532_v18  ;;  %9556 = vmatprep.subr.msk.mxu1 %vm563_vm0, %v11985_v52  ;;  %v12018_v18 = vld [vmem:[#allocation3 + $0x3a] sm:$0xff] }
 0x25f   : > { %9606 = vmatprep.subr.msk.mxu0 %vm563_vm0, %v11990_v25  ;;  %9362 = vmatmul.mubr.msk.f32.gmra.mxu1 %vm225_vm1, %v12002_v16 }
 0x260   : > { %9412 = vmatmul.mubr.msk.f32.gmra.mxu0 %vm225_vm1, %v11607_v0  ;;  %9364 = vmatprep.mubr.msk.f32.mxu1 %vm225_vm1, %v12012_v51 }
 0x261   : > { %9414 = vmatprep.mubr.msk.f32.mxu0 %vm225_vm1, %v11638_v8 }
 0x263   : > { %9365 = vmatmul.mubr.msk.f32.gmra.mxu1 %vm225_vm1, %v12018_v18 }
 0x264   : > { %9415 = vmatmul.mubr.msk.f32.gmra.mxu0 %vm225_vm1, %v11640_v5  ;;  %9367 = vmatprep.mubr.msk.f32.mxu1 %vm225_vm1, %v12024_v19  ;;  %v12170_v5 = vld [vmem:[#allocation3 + $0x180] sm:$0xff] }
 0x265   : > { %9417 = vmatprep.mubr.msk.f32.mxu0 %vm225_vm1, %v11671_v31  ;;  %v12048_v31 = vld [vmem:[#allocation3 + $0x7a] sm:$0xff]  ;;  %13610 = vst [vmem:[#allocation123_spill] sm:$0xff] %v12170_v5 }
 0x267   : > { %9368 = vmatmul.mubr.msk.f32.gmra.mxu1 %vm225_vm1, %v12030_v59 }
 0x268   : > { %9418 = vmatmul.mubr.msk.f32.gmra.mxu0 %vm225_vm1, %v11673_v50  ;;  %9370 = vmatprep.mubr.msk.f32.mxu1 %vm225_vm1, %v12036_v41  ;;  %v12054_v50 = vld [vmem:[#allocation3 + $0x82] sm:$0xff] }
 0x269   : > { %9420 = vmatprep.mubr.msk.f32.mxu0 %vm225_vm1, %v11704_v14  ;;  %v12060_v14 = vld [vmem:[#allocation3 + $0x92] sm:$0xff] }
 0x26b   : > { %9371 = vmatmul.mubr.msk.f32.gmra.mxu1 %vm225_vm1, %v12042_v63 }
 0x26c   : > { %9421 = vmatmul.mubr.msk.f32.gmra.mxu0 %vm225_vm1, %v11706_v49  ;;  %9373 = vmatprep.mubr.msk.f32.mxu1 %vm225_vm1, %v12048_v31  ;;  %v12066_v49 = vld [vmem:[#allocation3 + $0x9a] sm:$0xff] }
 0x26d   : > { %9423 = vmatprep.mubr.msk.f32.mxu0 %vm225_vm1, %v11737_v38  ;;  %v12072_v38 = vld [vmem:[#allocation3 + $0xaa] sm:$0xff] }
 0x26f   : > { %9374 = vmatmul.mubr.msk.f32.gmra.mxu1 %vm225_vm1, %v12054_v50 }
 0x270   : > { %9424 = vmatmul.mubr.msk.f32.gmra.mxu0 %vm225_vm1, %v11739_v3  ;;  %9376 = vmatprep.mubr.msk.f32.mxu1 %vm225_vm1, %v12060_v14  ;;  %v12078_v3 = vld [vmem:[#allocation3 + $0xb2] sm:$0xff] }
 0x271   : > { %9426 = vmatprep.mubr.msk.f32.mxu0 %vm225_vm1, %v11770_v11  ;;  %v12084_v11 = vld [vmem:[#allocation3 + $0xc2] sm:$0xff] }
 0x273   : > { %9377 = vmatmul.mubr.msk.f32.gmra.mxu1 %vm225_vm1, %v12066_v49 }
 0x274   : > { %9427 = vmatmul.mubr.msk.f32.gmra.mxu0 %vm225_vm1, %v11772_v24  ;;  %9379 = vmatprep.mubr.msk.f32.mxu1 %vm225_vm1, %v12072_v38  ;;  %v12090_v24 = vld [vmem:[#allocation3 + $0xca] sm:$0xff] }
 0x275   : > { %9429 = vmatprep.mubr.msk.f32.mxu0 %vm225_vm1, %v11803_v53  ;;  %v12096_v53 = vld [vmem:[#allocation3 + $0xda] sm:$0xff] }
 0x277   : > { %9380 = vmatmul.mubr.msk.f32.gmra.mxu1 %vm225_vm1, %v12078_v3 }
 0x278   : > { %9430 = vmatmul.mubr.msk.f32.gmra.mxu0 %vm225_vm1, %v11805_v55  ;;  %9382 = vmatprep.mubr.msk.f32.mxu1 %vm225_vm1, %v12084_v11  ;;  %v12102_v55 = vld [vmem:[#allocation3 + $0xe2] sm:$0xff] }
 0x279   : > { %9432 = vmatprep.mubr.msk.f32.mxu0 %vm225_vm1, %v11832_v10  ;;  %v12108_v10 = vld [vmem:[#allocation3 + $0xf2] sm:$0xff] }
 0x27b   : > { %9383 = vmatmul.mubr.msk.f32.gmra.mxu1 %vm225_vm1, %v12090_v24 }
 0x27c   : > { %9433 = vmatmul.mubr.msk.f32.gmra.mxu0 %vm225_vm1, %v11834_v6  ;;  %9385 = vmatprep.mubr.msk.f32.mxu1 %vm225_vm1, %v12096_v53  ;;  %v12114_v6 = vld [vmem:[#allocation3 + $0xfa] sm:$0xff] }
 0x27d   : > { %9435 = vmatprep.mubr.msk.f32.mxu0 %vm225_vm1, %v11860_v12  ;;  %v12120_v12 = vld [vmem:[#allocation3 + $0x10a] sm:$0xff] }
 0x27f   : > { %9386 = vmatmul.mubr.msk.f32.gmra.mxu1 %vm225_vm1, %v12102_v55 }
 0x280   : > { %9436 = vmatmul.mubr.msk.f32.gmra.mxu0 %vm225_vm1, %v11862_v22  ;;  %9388 = vmatprep.mubr.msk.f32.mxu1 %vm225_vm1, %v12108_v10  ;;  %v12126_v22 = vld [vmem:[#allocation3 + $0x112] sm:$0xff] }
 0x281   : > { %9438 = vmatprep.mubr.msk.f32.mxu0 %vm225_vm1, %v11883_v39  ;;  %v12132_v39 = vld [vmem:[#allocation3 + $0x122] sm:$0xff] }
 0x283   : > { %9389 = vmatmul.mubr.msk.f32.gmra.mxu1 %vm225_vm1, %v12114_v6 }
 0x284   : > { %9439 = vmatmul.mubr.msk.f32.gmra.mxu0 %vm225_vm1, %v11885_v40  ;;  %9391 = vmatprep.mubr.msk.f32.mxu1 %vm225_vm1, %v12120_v12  ;;  %v12138_v40 = vld [vmem:[#allocation3 + $0x12a] sm:$0xff] }
 0x285   : > { %9441 = vmatprep.mubr.msk.f32.mxu0 %vm225_vm1, %v11904_v17  ;;  %v12144_v17 = vld [vmem:[#allocation3 + $0x13a] sm:$0xff] }
 0x287   : > { %9392 = vmatmul.mubr.msk.f32.gmra.mxu1 %vm225_vm1, %v12126_v22 }
 0x288   : > { %9442 = vmatmul.mubr.msk.f32.gmra.mxu0 %vm225_vm1, %v11906_v36  ;;  %9394 = vmatprep.mubr.msk.f32.mxu1 %vm225_vm1, %v12132_v39  ;;  %v12150_v36 = vld [vmem:[#allocation3 + $0x142] sm:$0xff] }
 0x289   : > { %9444 = vmatprep.mubr.msk.f32.mxu0 %vm225_vm1, %v11924_v42  ;;  %v12156_v42 = vld [vmem:[#allocation3 + $0x152] sm:$0xff] }
 0x28b   : > { %9395 = vmatmul.mubr.msk.f32.gmra.mxu1 %vm225_vm1, %v12138_v40 }
 0x28c   : > { %9445 = vmatmul.mubr.msk.f32.gmra.mxu0 %vm225_vm1, %v11926_v35  ;;  %9397 = vmatprep.mubr.msk.f32.mxu1 %vm225_vm1, %v12144_v17  ;;  %v12162_v35 = vld [vmem:[#allocation3 + $0x15a] sm:$0xff] }
 0x28d   : > { %9447 = vmatprep.mubr.msk.f32.mxu0 %vm225_vm1, %v11943_v45  ;;  %v12168_v45 = vld [vmem:[#allocation3 + $0x16a] sm:$0xff] }
 0x28f   : > { %9398 = vmatmul.mubr.msk.f32.gmra.mxu1 %vm225_vm1, %v12150_v36 }
 0x290   : > { %9448 = vmatmul.mubr.msk.f32.gmra.mxu0 %vm225_vm1, %v11945_v9  ;;  %9400 = vmatprep.mubr.msk.f32.mxu1 %vm225_vm1, %v12156_v42  ;;  %v12176_v9 = vld [vmem:[#allocation3 + $0x172] sm:$0xff] }
 0x291   : > { %9450 = vmatprep.mubr.msk.f32.mxu0 %vm225_vm1, %v11960_v21  ;;  %v12178_v21 = vld [vmem:[#allocation3 + $0x188] sm:$0xff] }
 0x293   : > { %9401 = vmatmul.mubr.msk.f32.gmra.mxu1 %vm225_vm1, %v12162_v35 }
 0x294   : > { %9451 = vmatmul.mubr.msk.f32.gmra.mxu0 %vm225_vm1, %v11962_v33  ;;  %9403 = vmatprep.mubr.msk.f32.mxu1 %vm225_vm1, %v12168_v45 }
 0x295   : > { %9453 = vmatprep.mubr.msk.f32.mxu0 %vm225_vm1, %v12170_v5  ;;  %v12195_v5 = vld [vmem:[%s13192_s3 + $0x20] sm:$0xf] }
 0x297   : > { %9404 = vmatmul.mubr.msk.f32.gmra.mxu1 %vm225_vm1, %v12176_v9 }
 0x298   : > { %9454 = vmatmul.mubr.msk.f32.gmra.mxu0 %vm225_vm1, %v12178_v21  ;;  %9458 = vmatprep.mubr.msk.f32.mxu1 %vm225_vm1, %v11569_v29  ;;  %v13611_v29 = vld [vmem:[#allocation29_spill] sm:$0xff] }
 0x299   : > { %9508 = vmatprep.mubr.msk.f32.mxu0 %vm225_vm1, %v11980_v48  ;;  %v13613_v48 = vld [vmem:[#allocation114_spill] sm:$0xff] }
 0x29b   : > { %9459 = vmatmul.mubr.msk.f32.vlgmr.msra.gmra.mxu1 %vm225_vm1, %v11582_v27  ;;  %v13612_v27 = vld [vmem:[#allocation64_spill] sm:$0xff] }
 0x29c   : > { %9509 = vmatmul.mubr.msk.f32.vlgmr.msra.gmra.mxu0 %vm225_vm1, %v12002_v16  ;;  %9557 = vmatpush3.msk.msra.mxu1 %vm563_vm0, %v11985_v52  ;;  %v13614_v52 = vld [vmem:[#allocation66_spill] sm:$0xff]  ;;  %v13617_v16 = vld [vmem:[#allocation108_spill] sm:$0xff] }
 0x29d   : > { %9461 = vmatprep.mubr.msk.f32.mxu1 %vm225_vm1, %v11603_v47  ;;  %9511 = vmatprep.mubr.msk.f32.mxu0 %vm225_vm1, %v12012_v51 }
 0x29e   : > { %9607 = vmatpush3.msk.msra.mxu0 %vm563_vm0, %v11990_v25  ;;  %9656 = vmatprep.subr.msk.mxu1 %vm563_vm0, %v12195_v5 }
 0x29f   : > { %9462 = vmatmul.mubr.msk.f32.gmra.mxu1 %vm225_vm1, %v11616_v23 }
 0x2a0   : > { %9512 = vmatmul.mubr.msk.f32.gmra.mxu0 %vm225_vm1, %v12018_v18  ;;  %9464 = vmatprep.mubr.msk.f32.mxu1 %vm225_vm1, %v11636_v62 }
 0x2a1   : > { %9514 = vmatprep.mubr.msk.f32.mxu0 %vm225_vm1, %v12024_v19 }
 0x2a3   : > { %9465 = vmatmul.mubr.msk.f32.gmra.mxu1 %vm225_vm1, %v11649_v13 }
 0x2a4   : > { %9515 = vmatmul.mubr.msk.f32.gmra.mxu0 %vm225_vm1, %v12030_v59  ;;  %9467 = vmatprep.mubr.msk.f32.mxu1 %vm225_vm1, %v11669_v15 }
 0x2a5   : > { %9517 = vmatprep.mubr.msk.f32.mxu0 %vm225_vm1, %v12036_v41 }
 0x2a7   : > { %9468 = vmatmul.mubr.msk.f32.gmra.mxu1 %vm225_vm1, %v11682_v4 }
 0x2a8   : > { %9518 = vmatmul.mubr.msk.f32.gmra.mxu0 %vm225_vm1, %v12042_v63  ;;  %9470 = vmatprep.mubr.msk.f32.mxu1 %vm225_vm1, %v11702_v60 }
 0x2a9   : > { %9520 = vmatprep.mubr.msk.f32.mxu0 %vm225_vm1, %v12048_v31 }
 0x2ab   : > { %9471 = vmatmul.mubr.msk.f32.gmra.mxu1 %vm225_vm1, %v11715_v34 }
 0x2ac   : > { %9521 = vmatmul.mubr.msk.f32.gmra.mxu0 %vm225_vm1, %v12054_v50  ;;  %9473 = vmatprep.mubr.msk.f32.mxu1 %vm225_vm1, %v11735_v26 }
 0x2ad   : > { %9523 = vmatprep.mubr.msk.f32.mxu0 %vm225_vm1, %v12060_v14 }
 0x2af   : > { %9474 = vmatmul.mubr.msk.f32.gmra.mxu1 %vm225_vm1, %v13611_v29 }
 0x2b0   : > { %9524 = vmatmul.mubr.msk.f32.gmra.mxu0 %vm225_vm1, %v12066_v49  ;;  %9476 = vmatprep.mubr.msk.f32.mxu1 %vm225_vm1, %v13612_v27 }
 0x2b1   : > { %9526 = vmatprep.mubr.msk.f32.mxu0 %vm225_vm1, %v12072_v38 }
 0x2b3   : > { %9477 = vmatmul.mubr.msk.f32.gmra.mxu1 %vm225_vm1, %v13613_v48 }
 0x2b4   : > { %9527 = vmatmul.mubr.msk.f32.gmra.mxu0 %vm225_vm1, %v12078_v3  ;;  %9479 = vmatprep.mubr.msk.f32.mxu1 %vm225_vm1, %v11801_v54 }
 0x2b5   : > { %9529 = vmatprep.mubr.msk.f32.mxu0 %vm225_vm1, %v12084_v11 }
 0x2b7   : > { %9480 = vmatmul.mubr.msk.f32.gmra.mxu1 %vm225_vm1, %v13614_v52 }
 0x2b8   : > { %9530 = vmatmul.mubr.msk.f32.gmra.mxu0 %vm225_vm1, %v12090_v24  ;;  %9482 = vmatprep.mubr.msk.f32.mxu1 %vm225_vm1, %v11830_v28 }
 0x2b9   : > { %9532 = vmatprep.mubr.msk.f32.mxu0 %vm225_vm1, %v12096_v53 }
 0x2bb   : > { %9483 = vmatmul.mubr.msk.f32.gmra.mxu1 %vm225_vm1, %v11843_v56 }
 0x2bc   : > { %9533 = vmatmul.mubr.msk.f32.gmra.mxu0 %vm225_vm1, %v12102_v55  ;;  %9485 = vmatprep.mubr.msk.f32.mxu1 %vm225_vm1, %v11858_v46 }
 0x2bd   : > { %9535 = vmatprep.mubr.msk.f32.mxu0 %vm225_vm1, %v12108_v10 }
 0x2bf   : > { %9486 = vmatmul.mubr.msk.f32.gmra.mxu1 %vm225_vm1, %v11871_v32 }
 0x2c0   : > { %9536 = vmatmul.mubr.msk.f32.gmra.mxu0 %vm225_vm1, %v12114_v6  ;;  %9488 = vmatprep.mubr.msk.f32.mxu1 %vm225_vm1, %v11881_v30 }
 0x2c1   : > { %9538 = vmatprep.mubr.msk.f32.mxu0 %vm225_vm1, %v12120_v12 }
 0x2c3   : > { %9489 = vmatmul.mubr.msk.f32.gmra.mxu1 %vm225_vm1, %v11894_v20 }
 0x2c4   : > { %9539 = vmatmul.mubr.msk.f32.gmra.mxu0 %vm225_vm1, %v12126_v22  ;;  %9491 = vmatprep.mubr.msk.f32.mxu1 %vm225_vm1, %v11902_v61  ;;  %v12315_v22 = vld [vmem:[#allocation3 + $0x181] sm:$0xff] }
 0x2c5   : > { %9541 = vmatprep.mubr.msk.f32.mxu0 %vm225_vm1, %v12132_v39 }
 0x2c7   : > { %9492 = vmatmul.mubr.msk.f32.gmra.mxu1 %vm225_vm1, %v11914_v1 }
 0x2c8   : > { %9542 = vmatmul.mubr.msk.f32.gmra.mxu0 %vm225_vm1, %v12138_v40  ;;  %9494 = vmatprep.mubr.msk.f32.mxu1 %vm225_vm1, %v11922_v57  ;;  %v12317_v40 = vld [vmem:[#allocation3 + $0x182] sm:$0xff] }
 0x2c9   : > { %9544 = vmatprep.mubr.msk.f32.mxu0 %vm225_vm1, %v12144_v17  ;;  %v12323_v17 = vld [vmem:[#allocation3 + $0x189] sm:$0xff] }
 0x2cb   : > { %9495 = vmatmul.mubr.msk.f32.gmra.mxu1 %vm225_vm1, %v11934_v43 }
 0x2cc   : > { %9545 = vmatmul.mubr.msk.f32.gmra.mxu0 %vm225_vm1, %v12150_v36  ;;  %9497 = vmatprep.mubr.msk.f32.mxu1 %vm225_vm1, %v11941_v2  ;;  %v12325_v36 = vld [vmem:[#allocation3 + $0x18a] sm:$0xff] }
 0x2cd   : > { %9547 = vmatprep.mubr.msk.f32.mxu0 %vm225_vm1, %v12156_v42  ;;  %v12343_v42 = vpop.f32.mrf.mxu1 }
 0x2cf   : > { %9498 = vmatmul.mubr.msk.f32.gmra.mxu1 %vm225_vm1, %v11952_v7 }
 0x2d0   : > { %9548 = vmatmul.mubr.msk.f32.gmra.mxu0 %vm225_vm1, %v12162_v35  ;;  %9500 = vmatprep.mubr.msk.f32.mxu1 %vm225_vm1, %v11958_v44  ;;  %v12345_v35 = vpop.f32.mrf.mxu0 }
 0x2d1   : > { %9550 = vmatprep.mubr.msk.f32.mxu0 %vm225_vm1, %v12168_v45  ;;  %v13615_v45 = vld [vmem:[#allocation62_spill] sm:$0xff] }
 0x2d3   : > { %9501 = vmatmul.mubr.msk.f32.gmra.mxu1 %vm225_vm1, %v11968_v37 }
 0x2d4   : > { %9551 = vmatmul.mubr.msk.f32.gmra.mxu0 %vm225_vm1, %v12176_v9  ;;  %9503 = vmatprep.mubr.msk.f32.mxu1 %vm225_vm1, %v12315_v22 }
 0x2d5   : > { %9553 = vmatprep.mubr.msk.f32.mxu0 %vm225_vm1, %v12317_v40 }
 0x2d7   : > { %9504 = vmatmul.mubr.msk.f32.gmra.mxu1 %vm225_vm1, %v12323_v17 }
 0x2d8   : > { %9554 = vmatmul.mubr.msk.f32.gmra.mxu0 %vm225_vm1, %v12325_v36  ;;  %9558 = vmatprep.mubr.msk.f32.mxu1 %vm225_vm1, %v11605_v58 }
 0x2d9   : > { %9608 = vmatprep.mubr.msk.f32.mxu0 %vm225_vm1, %v11603_v47 }
 0x2db   : > { %9559 = vmatmul.mubr.msk.f32.vlgmr.msra.gmra.mxu1 %vm225_vm1, %v11607_v0  ;;  %v9263_v47 = vpop.f32.mrf.mxu1 }
 0x2dc   : > { %9609 = vmatmul.mubr.msk.f32.vlgmr.msra.gmra.mxu0 %vm225_vm1, %v11616_v23  ;;  %9657 = vmatpush3.msk.msra.mxu1 %vm563_vm0, %v12195_v5  ;;  %v9313_v58 = vpop.f32.mrf.mxu0  ;;  %v13616_v23 = vld [vmem:[#allocation65_spill] sm:$0xff] }
 0x2dd   : > { %9561 = vmatprep.mubr.msk.f32.mxu1 %vm225_vm1, %v11638_v8  ;;  %9611 = vmatprep.mubr.msk.f32.mxu0 %vm225_vm1, %v11636_v62  ;;  %v12353_v0 = vadd.f32 %v9313_v58, %v9263_v47  ;;  %v4193_v8 = vpop.f32.mrf.mxu1  ;;  %v13618_v47 = vld [vmem:[#allocation111_spill] sm:$0xff] }
 0x2de   : > { %v4517_v5 = vpop.f32.mrf.mxu0 }
 0x2df   : > { %9562 = vmatmul.mubr.msk.f32.gmra.mxu1 %vm225_vm1, %v13615_v45  ;;  %v12359_v9 = vadd.f32 %v4517_v5, %v4193_v8  ;;  %v9266_v62 = vpop.f32.mrf.mxu1  ;;  %v13619_v5 = vld [vmem:[#allocation63_spill] sm:$0xff] }
 0x2e0   : > { %9612 = vmatmul.mubr.msk.f32.gmra.mxu0 %vm225_vm1, %v11649_v13  ;;  %9564 = vmatprep.mubr.msk.f32.mxu1 %vm225_vm1, %v13616_v23  ;;  %v9316_v25 = vpop.f32.mrf.mxu0 }
 0x2e1   : > { %9614 = vmatprep.mubr.msk.f32.mxu0 %vm225_vm1, %v11669_v15  ;;  %v12365_v13 = vadd.f32 %v9316_v25, %v9266_v62  ;;  %v4203_v15 = vpop.f32.mrf.mxu1  ;;  %v13620_v62 = vld [vmem:[#allocation24_spill] sm:$0xff] }
 0x2e2   : > { %v4527_v58 = vpop.f32.mrf.mxu0 }
 0x2e3   : > { %9565 = vmatmul.mubr.msk.f32.gmra.mxu1 %vm225_vm1, %v13617_v16  ;;  %v12371_v45 = vadd.f32 %v4527_v58, %v4203_v15  ;;  %v9269_v23 = vpop.f32.mrf.mxu1  ;;  %v13621_v58 = vld [vmem:[#allocation30_spill] sm:$0xff] }
 0x2e4   : > { %9615 = vmatmul.mubr.msk.f32.gmra.mxu0 %vm225_vm1, %v11682_v4  ;;  %9567 = vmatprep.mubr.msk.f32.mxu1 %vm225_vm1, %v13618_v47  ;;  %v9319_v8 = vpop.f32.mrf.mxu0 }
 0x2e5   : > { %9617 = vmatprep.mubr.msk.f32.mxu0 %vm225_vm1, %v11702_v60  ;;  %v12377_v4 = vadd.f32 %v9319_v8, %v9269_v23  ;;  %v4213_v60 = vpop.f32.mrf.mxu1  ;;  %v13622_v23 = vld [vmem:[#allocation61_spill] sm:$0xff] }
 0x2e6   : > { %v4537_v25 = vpop.f32.mrf.mxu0 }
 0x2e7   : > { %9568 = vmatmul.mubr.msk.f32.gmra.mxu1 %vm225_vm1, %v13619_v5  ;;  %v12383_v16 = vadd.f32 %v4537_v25, %v4213_v60  ;;  %v9272_v47 = vpop.f32.mrf.mxu1  ;;  %v13623_v25 = vld [vmem:[#allocation109_spill] sm:$0xff] }
 0x2e8   : > { %9618 = vmatmul.mubr.msk.f32.gmra.mxu0 %vm225_vm1, %v11715_v34  ;;  %9570 = vmatprep.mubr.msk.f32.mxu1 %vm225_vm1, %v13620_v62  ;;  %v9322_v15 = vpop.f32.mrf.mxu0 }
 0x2e9   : > { %9620 = vmatprep.mubr.msk.f32.mxu0 %vm225_vm1, %v11735_v26  ;;  %v12389_v34 = vadd.f32 %v9322_v15, %v9272_v47  ;;  %v4223_v26 = vpop.f32.mrf.mxu1  ;;  %v13624_v47 = vld [vmem:[#allocation25_spill] sm:$0xff] }
 0x2ea   : > { %v4547_v8 = vpop.f32.mrf.mxu0 }
 0x2eb   : > { %9571 = vmatmul.mubr.msk.f32.gmra.mxu1 %vm225_vm1, %v13621_v58  ;;  %v12395_v5 = vadd.f32 %v4547_v8, %v4223_v26  ;;  %v13625_v8 = vld [vmem:[#allocation26_spill] sm:$0xff] }
 0x2ec   : > { %9621 = vmatmul.mubr.msk.f32.gmra.mxu0 %vm225_vm1, %v13611_v29  ;;  %9573 = vmatprep.mubr.msk.f32.mxu1 %vm225_vm1, %v13622_v23  ;;  %v9275_v62 = vpop.f32.mrf.mxu1  ;;  %v9325_v60 = vpop.f32.mrf.mxu0 }
 0x2ed   : > { %9623 = vmatprep.mubr.msk.f32.mxu0 %vm225_vm1, %v13612_v27  ;;  %v12401_v29 = vadd.f32 %v9325_v60, %v9275_v62  ;;  %v13626_v62 = vld [vmem:[#allocation69_spill] sm:$0xff] }
 0x2ee   : > { %v4233_v27 = vpop.f32.mrf.mxu1  ;;  %v4557_v15 = vpop.f32.mrf.mxu0 }
 0x2ef   : > { %9574 = vmatmul.mubr.msk.f32.gmra.mxu1 %vm225_vm1, %v13623_v25  ;;  %v12407_v58 = vadd.f32 %v4557_v15, %v4233_v27  ;;  %v13627_v15 = vld [vmem:[#allocation117_spill] sm:$0xff] }
 0x2f0   : > { %9624 = vmatmul.mubr.msk.f32.gmra.mxu0 %vm225_vm1, %v13613_v48  ;;  %9576 = vmatprep.mubr.msk.f32.mxu1 %vm225_vm1, %v13624_v47 }
 0x2f1   : > { %9626 = vmatprep.mubr.msk.f32.mxu0 %vm225_vm1, %v11801_v54  ;;  %v9278_v23 = vpop.f32.mrf.mxu1 }
 0x2f2   : > { %v9328_v26 = vpop.f32.mrf.mxu0 }
 0x2f3   : > { %9577 = vmatmul.mubr.msk.f32.gmra.mxu1 %vm225_vm1, %v13625_v8  ;;  %v12413_v48 = vadd.f32 %v9328_v26, %v9278_v23  ;;  %v4243_v54 = vpop.f32.mrf.mxu1  ;;  %v13628_v23 = vld [vmem:[#allocation110_spill] sm:$0xff] }
 0x2f4   : > { %9627 = vmatmul.mubr.msk.f32.gmra.mxu0 %vm225_vm1, %v13614_v52  ;;  %9579 = vmatprep.mubr.msk.f32.mxu1 %vm225_vm1, %v13626_v62  ;;  %v4567_v60 = vpop.f32.mrf.mxu0 }
 0x2f5   : > { %9629 = vmatprep.mubr.msk.f32.mxu0 %vm225_vm1, %v11830_v28  ;;  %v12419_v25 = vadd.f32 %v4567_v60, %v4243_v54  ;;  %v9281_v47 = vpop.f32.mrf.mxu1  ;;  %v13629_v60 = vld [vmem:[#allocation27_spill] sm:$0xff] }
 0x2f6   : > { %v9331_v27 = vpop.f32.mrf.mxu0 }
 0x2f7   : > { %9580 = vmatmul.mubr.msk.f32.gmra.mxu1 %vm225_vm1, %v13627_v15  ;;  %v12425_v52 = vadd.f32 %v9331_v27, %v9281_v47  ;;  %v4253_v28 = vpop.f32.mrf.mxu1  ;;  %v13630_v47 = vld [vmem:[#allocation28_spill] sm:$0xff] }
 0x2f8   : > { %9630 = vmatmul.mubr.msk.f32.gmra.mxu0 %vm225_vm1, %v11843_v56  ;;  %9582 = vmatprep.mubr.msk.f32.mxu1 %vm225_vm1, %v13628_v23  ;;  %v4577_v26 = vpop.f32.mrf.mxu0 }
 0x2f9   : > { %9632 = vmatprep.mubr.msk.f32.mxu0 %vm225_vm1, %v11858_v46  ;;  %v12431_v8 = vadd.f32 %v4577_v26, %v4253_v28  ;;  %v13631_v26 = vld [vmem:[#allocation40_spill] sm:$0xff] }
 0x2fa   : > { %v9284_v62 = vpop.f32.mrf.mxu1  ;;  %v9334_v54 = vpop.f32.mrf.mxu0 }
 0x2fb   : > { %9583 = vmatmul.mubr.msk.f32.gmra.mxu1 %vm225_vm1, %v13629_v60  ;;  %v12437_v56 = vadd.f32 %v9334_v54, %v9284_v62  ;;  %v13632_v62 = vld [vmem:[#allocation31_spill] sm:$0xff] }
 0x2fc   : > { %9633 = vmatmul.mubr.msk.f32.gmra.mxu0 %vm225_vm1, %v11871_v32  ;;  %9585 = vmatprep.mubr.msk.f32.mxu1 %vm225_vm1, %v13630_v47  ;;  %v4263_v46 = vpop.f32.mrf.mxu1  ;;  %v4587_v27 = vpop.f32.mrf.mxu0 }
 0x2fd   : > { %9635 = vmatprep.mubr.msk.f32.mxu0 %vm225_vm1, %v11881_v30  ;;  %v12443_v15 = vadd.f32 %v4587_v27, %v4263_v46  ;;  %v13633_v27 = vld [vmem:[#allocation68_spill] sm:$0xff] }
 0x2fe   : > { %v9287_v23 = vpop.f32.mrf.mxu1  ;;  %v9337_v28 = vpop.f32.mrf.mxu0 }
 0x2ff   : > { %9586 = vmatmul.mubr.msk.f32.gmra.mxu1 %vm225_vm1, %v13631_v26  ;;  %v12449_v32 = vadd.f32 %v9337_v28, %v9287_v23  ;;  %v13634_v23 = vld [vmem:[#allocation67_spill] sm:$0xff] }
 0x300   : > { %9636 = vmatmul.mubr.msk.f32.gmra.mxu0 %vm225_vm1, %v11894_v20  ;;  %9588 = vmatprep.mubr.msk.f32.mxu1 %vm225_vm1, %v13632_v62  ;;  %v4273_v30 = vpop.f32.mrf.mxu1  ;;  %v4597_v54 = vpop.f32.mrf.mxu0 }
 0x301   : > { %9638 = vmatprep.mubr.msk.f32.mxu0 %vm225_vm1, %v11902_v61  ;;  %v12455_v60 = vadd.f32 %v4597_v54, %v4273_v30  ;;  %v13635_v54 = vld [vmem:[#allocation120_spill] sm:$0xff] }
 0x302   : > { %v9290_v47 = vpop.f32.mrf.mxu1  ;;  %v9340_v46 = vpop.f32.mrf.mxu0 }
 0x303   : > { %9589 = vmatmul.mubr.msk.f32.gmra.mxu1 %vm225_vm1, %v13633_v27  ;;  %v12461_v20 = vadd.f32 %v9340_v46, %v9290_v47  ;;  %v13636_v47 = vld [vmem:[#allocation112_spill] sm:$0xff] }
 0x304   : > { %9639 = vmatmul.mubr.msk.f32.gmra.mxu0 %vm225_vm1, %v11914_v1  ;;  %9591 = vmatprep.mubr.msk.f32.mxu1 %vm225_vm1, %v13634_v23  ;;  %v4283_v61 = vpop.f32.mrf.mxu1  ;;  %v4607_v28 = vpop.f32.mrf.mxu0 }
 0x305   : > { %9641 = vmatprep.mubr.msk.f32.mxu0 %vm225_vm1, %v11922_v57  ;;  %v12467_v26 = vadd.f32 %v4607_v28, %v4283_v61  ;;  %v13637_v28 = vld [vmem:[#allocation70_spill] sm:$0xff] }
 0x306   : > { %v9293_v62 = vpop.f32.mrf.mxu1  ;;  %v9343_v30 = vpop.f32.mrf.mxu0 }
 0x307   : > { %9592 = vmatmul.mubr.msk.f32.gmra.mxu1 %vm225_vm1, %v13635_v54  ;;  %v12473_v1 = vadd.f32 %v9343_v30, %v9293_v62  ;;  %v13638_v62 = vld [vmem:[#allocation73_spill] sm:$0xff] }
 0x308   : > { %9642 = vmatmul.mubr.msk.f32.gmra.mxu0 %vm225_vm1, %v11934_v43  ;;  %9594 = vmatprep.mubr.msk.f32.mxu1 %vm225_vm1, %v13636_v47  ;;  %v4293_v57 = vpop.f32.mrf.mxu1  ;;  %v4617_v46 = vpop.f32.mrf.mxu0 }
 0x309   : > { %9644 = vmatprep.mubr.msk.f32.mxu0 %vm225_vm1, %v11941_v2  ;;  %v12479_v27 = vadd.f32 %v4617_v46, %v4293_v57  ;;  %v13639_v46 = vld [vmem:[#allocation123_spill] sm:$0xff] }
 0x30b   : > { %v9296_v23 = vpop.f32.mrf.mxu1  ;;  %9595 = vmatmul.mubr.msk.f32.gmra.mxu1 %vm225_vm1, %v13637_v28  ;;  %v6647_v28 = vld [vmem:[#allocation3 + $0x199] sm:$0xff] }
 0x30c   : > { %v9346_v61 = vpop.f32.mrf.mxu0  ;;  %9645 = vmatmul.mubr.msk.f32.gmra.mxu0 %vm225_vm1, %v11952_v7  ;;  %9597 = vmatprep.mubr.msk.f32.mxu1 %vm225_vm1, %v13638_v62 }
 0x30d   : > { %v12485_v43 = vadd.f32 %v9346_v61, %v9296_v23  ;;  %9647 = vmatprep.mubr.msk.f32.mxu0 %vm225_vm1, %v11958_v44  ;;  %v4303_v2 = vpop.f32.mrf.mxu1  ;;  %v6257_v61 = vld [vmem:[#allocation3 + $0x198] sm:$0xff] }
 0x30e   : > { %v4627_v30 = vpop.f32.mrf.mxu0 }
 0x30f   : > { %v12491_v54 = vadd.f32 %v4627_v30, %v4303_v2  ;;  %v9299_v47 = vpop.f32.mrf.mxu1  ;;  %9598 = vmatmul.mubr.msk.f32.gmra.mxu1 %vm225_vm1, %v11962_v33 }
 0x310   : > { %v9349_v57 = vpop.f32.mrf.mxu0  ;;  %9648 = vmatmul.mubr.msk.f32.gmra.mxu0 %vm225_vm1, %v11968_v37  ;;  %9600 = vmatprep.mubr.msk.f32.mxu1 %vm225_vm1, %v13639_v46  ;;  %v6258_v37 = vld [vmem:[#allocation3 + $0x1a0] sm:$0xff] }
 0x311   : > { %v12497_v7 = vadd.f32 %v9349_v57, %v9299_v47  ;;  %9650 = vmatprep.mubr.msk.f32.mxu0 %vm225_vm1, %v12315_v22  ;;  %v4313_v44 = vpop.f32.mrf.mxu1  ;;  %v6648_v22 = vld [vmem:[#allocation3 + $0x1a1] sm:$0xff] }
 0x312   : > { %v4637_v23 = vpop.f32.mrf.mxu0 }
 0x313   : > { %v12503_v62 = vadd.f32 %v4637_v23, %v4313_v44  ;;  %v9302_v2 = vpop.f32.mrf.mxu1  ;;  %9601 = vmatmul.mubr.msk.f32.gmra.mxu1 %vm225_vm1, %v12178_v21 }
 0x314   : > { %v9352_v30 = vpop.f32.mrf.mxu0  ;;  %9651 = vmatmul.mubr.msk.f32.gmra.mxu0 %vm225_vm1, %v12323_v17  ;;  %9603 = vmatprep.mubr.msk.f32.mxu1 %vm225_vm1, %v6257_v61 }
 0x315   : > { %v12509_v33 = vadd.f32 %v9352_v30, %v9302_v2  ;;  %9653 = vmatprep.mubr.msk.f32.mxu0 %vm225_vm1, %v6647_v28  ;;  %v4323_v47 = vpop.f32.mrf.mxu1 }
 0x316   : > { %v4647_v57 = vpop.f32.mrf.mxu0 }
 0x317   : > { %v12513_v46 = vadd.f32 %v4647_v57, %v4323_v47  ;;  %v9305_v44 = vpop.f32.mrf.mxu1  ;;  %9604 = vmatmul.mubr.msk.f32.gmra.mxu1 %vm225_vm1, %v6258_v37  ;;  %v4508_v47 = vadd.f32 %v12345_v35, %v12343_v42  ;;  %v13641_v37 = vld [vmem:[#allocation113_spill] sm:$0xff] }
 0x318   : > { %v9355_v23 = vpop.f32.mrf.mxu0  ;;  %9654 = vmatmul.mubr.msk.f32.gmra.mxu0 %vm225_vm1, %v6648_v22  ;;  %9658 = vmatprep.mubr.msk.f32.mxu1 %vm225_vm1, %v12012_v51 }
 0x319   : > { %v12517_v21 = vadd.f32 %v9355_v23, %v9305_v44  ;;  %v4333_v17 = vpop.f32.mrf.mxu1 }
 0x31a   : > { %v4657_v61 = vpop.f32.mrf.mxu0 }
 0x31b   : > { %v12521_v2 = vadd.f32 %v4657_v61, %v4333_v17  ;;  %v9360_v28 = vpop.f32.mrf.mxu1  ;;  %9659 = vmatmul.mubr.msk.f32.vlgmr.msra.gmra.mxu1 %vm225_vm1, %v12018_v18 }
 0x31c   : > { %v9410_v30 = vpop.f32.mrf.mxu0  ;;  %v5025_v57 = vadd.f32 %v9360_v28, %v13641_v37  ;;  %9661 = vmatprep.mubr.msk.f32.mxu1 %vm225_vm1, %v12024_v19 }
 0x31d   : > { %13640 = vst [vmem:[#allocation44_spill] sm:$0xff] %v12521_v2  ;;  %v4865_v22 = vpop.f32.mrf.mxu1 }
 0x31e   : > { %v5255_v44 = vpop.f32.mrf.mxu0  ;;  %v12530_v51 = vadd.f32 %v9410_v30, %v5025_v57  ;;  %v5024_v23 = vadd.f32 %v4865_v22, %v4508_v47 }
 0x31f   : > { %v9363_v17 = vpop.f32.mrf.mxu1  ;;  %9662 = vmatmul.mubr.msk.f32.gmra.mxu1 %vm225_vm1, %v12030_v59 }
 0x320   : > { %v9413_v61 = vpop.f32.mrf.mxu0  ;;  %v12534_v2 = vadd.f32 %v5255_v44, %v5024_v23  ;;  %v5027_v18 = vadd.f32 %v9363_v17, %v12353_v0  ;;  %9664 = vmatprep.mubr.msk.f32.mxu1 %vm225_vm1, %v12036_v41 }
 0x321   : > { %v4875_v42 = vpop.f32.mrf.mxu1 }
 0x322   : > { %v5265_v35 = vpop.f32.mrf.mxu0  ;;  %v12539_v19 = vadd.f32 %v9413_v61, %v5027_v18  ;;  %v5026_v28 = vadd.f32 %v4875_v42, %v12359_v9 }
 0x323   : > { %v9366_v30 = vpop.f32.mrf.mxu1  ;;  %9665 = vmatmul.mubr.msk.f32.gmra.mxu1 %vm225_vm1, %v12042_v63 }
 0x324   : > { %v9416_v47 = vpop.f32.mrf.mxu0  ;;  %v12544_v37 = vadd.f32 %v5265_v35, %v5026_v28  ;;  %v5029_v59 = vadd.f32 %v9366_v30, %v12365_v13  ;;  %9667 = vmatprep.mubr.msk.f32.mxu1 %vm225_vm1, %v12048_v31 }
 0x325   : > { %v4885_v0 = vpop.f32.mrf.mxu1 }
 0x326   : > { %v5275_v41 = vpop.f32.mrf.mxu0  ;;  %v12549_v57 = vadd.f32 %v9416_v47, %v5029_v59  ;;  %v5028_v22 = vadd.f32 %v4885_v0, %v12371_v45 }
 0x327   : > { %v9369_v44 = vpop.f32.mrf.mxu1  ;;  %9668 = vmatmul.mubr.msk.f32.gmra.mxu1 %vm225_vm1, %v12054_v50 }
 0x328   : > { %v9419_v9 = vpop.f32.mrf.mxu0  ;;  %v12554_v23 = vadd.f32 %v5275_v41, %v5028_v22  ;;  %v5031_v63 = vadd.f32 %v9369_v44, %v12377_v4  ;;  %9670 = vmatprep.mubr.msk.f32.mxu1 %vm225_vm1, %v12060_v14 }
 0x329   : > { %v4895_v13 = vpop.f32.mrf.mxu1 }
 0x32a   : > { %v5285_v31 = vpop.f32.mrf.mxu0  ;;  %v12559_v17 = vadd.f32 %v9419_v9, %v5031_v63  ;;  %v5030_v61 = vadd.f32 %v4895_v13, %v12383_v16 }
 0x32b   : > { %v9372_v18 = vpop.f32.mrf.mxu1  ;;  %9671 = vmatmul.mubr.msk.f32.gmra.mxu1 %vm225_vm1, %v12066_v49 }
 0x32c   : > { %v9422_v45 = vpop.f32.mrf.mxu0  ;;  %v12564_v42 = vadd.f32 %v5285_v31, %v5030_v61  ;;  %v5033_v50 = vadd.f32 %v9372_v18, %v12389_v34  ;;  %9673 = vmatprep.mubr.msk.f32.mxu1 %vm225_vm1, %v12072_v38 }
 0x32d   : > { %v4905_v4 = vpop.f32.mrf.mxu1 }
 0x32e   : > { %v5295_v14 = vpop.f32.mrf.mxu0  ;;  %v12569_v35 = vadd.f32 %v9422_v45, %v5033_v50  ;;  %v5032_v28 = vadd.f32 %v4905_v4, %v12395_v5 }
 0x32f   : > { %v9375_v30 = vpop.f32.mrf.mxu1  ;;  %9674 = vmatmul.mubr.msk.f32.gmra.mxu1 %vm225_vm1, %v12078_v3 }
 0x330   : > { %v9425_v16 = vpop.f32.mrf.mxu0  ;;  %v12574_v47 = vadd.f32 %v5295_v14, %v5032_v28  ;;  %v5035_v49 = vadd.f32 %v9375_v30, %v12401_v29  ;;  %9676 = vmatprep.mubr.msk.f32.mxu1 %vm225_vm1, %v12084_v11  ;;  %v7026_v14 = vld [vmem:[#allocation3 + $0x112] sm:$0xff] }
 0x331   : > { %v4915_v34 = vpop.f32.mrf.mxu1 }
 0x332   : > { %v5305_v38 = vpop.f32.mrf.mxu0  ;;  %v12579_v59 = vadd.f32 %v9425_v16, %v5035_v49  ;;  %v5034_v0 = vadd.f32 %v4915_v34, %v12407_v58  ;;  %v7028_v34 = vld [vmem:[#allocation3 + $0x12a] sm:$0xff] }
 0x333   : > { %v9378_v41 = vpop.f32.mrf.mxu1  ;;  %9677 = vmatmul.mubr.msk.f32.gmra.mxu1 %vm225_vm1, %v12090_v24 }
 0x334   : > { %v9428_v5 = vpop.f32.mrf.mxu0  ;;  %v12584_v22 = vadd.f32 %v5305_v38, %v5034_v0  ;;  %v5037_v3 = vadd.f32 %v9378_v41, %v12413_v48  ;;  %9679 = vmatprep.mubr.msk.f32.mxu1 %vm225_vm1, %v12096_v53  ;;  %v7029_v0 = vld [vmem:[#allocation3 + $0x13a] sm:$0xff] }
 0x335   : > { %v4925_v29 = vpop.f32.mrf.mxu1 }
 0x336   : > { %v5315_v11 = vpop.f32.mrf.mxu0  ;;  %v12589_v44 = vadd.f32 %v9428_v5, %v5037_v3  ;;  %v5036_v9 = vadd.f32 %v4925_v29, %v12419_v25 }
 0x337   : > { %v9381_v63 = vpop.f32.mrf.mxu1  ;;  %9680 = vmatmul.mubr.msk.f32.gmra.mxu1 %vm225_vm1, %v12102_v55 }
 0x338   : > { %v9431_v58 = vpop.f32.mrf.mxu0  ;;  %v12594_v13 = vadd.f32 %v5315_v11, %v5036_v9  ;;  %v5039_v24 = vadd.f32 %v9381_v63, %v12425_v52  ;;  %9682 = vmatprep.mubr.msk.f32.mxu1 %vm225_vm1, %v12108_v10  ;;  %v7030_v11 = vld [vmem:[#allocation3 + $0x142] sm:$0xff]  ;;  %v7031_v63 = vld [vmem:[#allocation3 + $0x152] sm:$0xff] }
 0x339   : > { %v4935_v48 = vpop.f32.mrf.mxu1 }
 0x33a   : > { %v5325_v53 = vpop.f32.mrf.mxu0  ;;  %v12599_v31 = vadd.f32 %v9431_v58, %v5039_v24  ;;  %v5038_v61 = vadd.f32 %v4935_v48, %v12431_v8 }
 0x33b   : > { %v9384_v18 = vpop.f32.mrf.mxu1  ;;  %9683 = vmatmul.mubr.msk.f32.gmra.mxu1 %vm225_vm1, %v12114_v6 }
 0x33c   : > { %v9434_v25 = vpop.f32.mrf.mxu0  ;;  %v12604_v45 = vadd.f32 %v5325_v53, %v5038_v61  ;;  %v5041_v55 = vadd.f32 %v9384_v18, %v12437_v56  ;;  %9685 = vmatprep.mubr.msk.f32.mxu1 %vm225_vm1, %v12120_v12  ;;  %v7032_v18 = vld [vmem:[#allocation3 + $0x15a] sm:$0xff] }
 0x33d   : > { %v4945_v52 = vpop.f32.mrf.mxu1 }
 0x33e   : > { %v5335_v10 = vpop.f32.mrf.mxu0  ;;  %v12609_v50 = vadd.f32 %v9434_v25, %v5041_v55  ;;  %v5040_v4 = vadd.f32 %v4945_v52, %v12443_v15  ;;  %v7033_v55 = vld [vmem:[#allocation3 + $0x16a] sm:$0xff] }
 0x33f   : > { %v9387_v8 = vpop.f32.mrf.mxu1  ;;  %9686 = vmatmul.mubr.msk.f32.gmra.mxu1 %vm225_vm1, %v7026_v14 }
 0x340   : > { %v9437_v28 = vpop.f32.mrf.mxu0  ;;  %v12613_v30 = vadd.f32 %v5335_v10, %v5040_v4  ;;  %v5043_v6 = vadd.f32 %v9387_v8, %v12449_v32  ;;  %9688 = vmatprep.mubr.msk.f32.mxu1 %vm225_vm1, %v12132_v39 }
 0x341   : > { %v4955_v56 = vpop.f32.mrf.mxu1 }
 0x342   : > { %v5345_v12 = vpop.f32.mrf.mxu0  ;;  %v12618_v16 = vadd.f32 %v9437_v28, %v5043_v6  ;;  %v5042_v49 = vadd.f32 %v4955_v56, %v12455_v60  ;;  %v7034_v28 = vld [vmem:[#allocation3 + $0x172] sm:$0xff] }
 0x343   : > { %v9390_v15 = vpop.f32.mrf.mxu1  ;;  %9689 = vmatmul.mubr.msk.f32.gmra.mxu1 %vm225_vm1, %v7028_v34  ;;  %v7037_v34 = vld [vmem:[#allocation3 + $0x19a] sm:$0xff] }
 0x344   : > { %v9440_v38 = vpop.f32.mrf.mxu0  ;;  %v12622_v41 = vadd.f32 %v5345_v12, %v5042_v49  ;;  %v5045_v5 = vadd.f32 %v9390_v15, %v12461_v20  ;;  %9691 = vmatprep.mubr.msk.f32.mxu1 %vm225_vm1, %v7029_v0 }
 0x345   : > { %v4965_v32 = vpop.f32.mrf.mxu1 }
 0x346   : > { %v5355_v39 = vpop.f32.mrf.mxu0  ;;  %v12626_v3 = vadd.f32 %v9440_v38, %v5045_v5  ;;  %v5044_v29 = vadd.f32 %v4965_v32, %v12467_v26 }
 0x347   : > { %v9393_v60 = vpop.f32.mrf.mxu1  ;;  %9692 = vmatmul.mubr.msk.f32.gmra.mxu1 %vm225_vm1, %v7030_v11 }
 0x348   : > { %v9443_v9 = vpop.f32.mrf.mxu0  ;;  %v12630_v58 = vadd.f32 %v5355_v39, %v5044_v29  ;;  %v5047_v24 = vadd.f32 %v9393_v60, %v12473_v1  ;;  %9694 = vmatprep.mubr.msk.f32.mxu1 %vm225_vm1, %v7031_v63 }
 0x349   : > { %v4975_v20 = vpop.f32.mrf.mxu1 }
 0x34a   : > { %v5365_v48 = vpop.f32.mrf.mxu0  ;;  %v12634_v53 = vadd.f32 %v9443_v9, %v5047_v24  ;;  %v5046_v61 = vadd.f32 %v4975_v20, %v12479_v27  ;;  %v13642_v20 = vld [vmem:[#allocation44_spill] sm:$0xff] }
 0x34b   : > { %v9396_v26 = vpop.f32.mrf.mxu1  ;;  %9695 = vmatmul.mubr.msk.f32.gmra.mxu1 %vm225_vm1, %v7032_v18 }
 0x34c   : > { %v9446_v25 = vpop.f32.mrf.mxu0  ;;  %v12638_v52 = vadd.f32 %v5365_v48, %v5046_v61  ;;  %v5049_v10 = vadd.f32 %v9396_v26, %v12485_v43  ;;  %9697 = vmatprep.mubr.msk.f32.mxu1 %vm225_vm1, %v7033_v55 }
 0x34d   : > { %v4985_v1 = vpop.f32.mrf.mxu1 }
 0x34e   : > { %v5375_v4 = vpop.f32.mrf.mxu0  ;;  %v12642_v14 = vadd.f32 %v9446_v25, %v5049_v10  ;;  %v5048_v8 = vadd.f32 %v4985_v1, %v12491_v54 }
 0x34f   : > { %v9399_v27 = vpop.f32.mrf.mxu1  ;;  %9698 = vmatmul.mubr.msk.f32.gmra.mxu1 %vm225_vm1, %v7034_v28 }
 0x350   : > { %v9449_v6 = vpop.f32.mrf.mxu0  ;;  %v12646_v56 = vadd.f32 %v5375_v4, %v5048_v8  ;;  %v5051_v12 = vadd.f32 %v9399_v27, %v12497_v7  ;;  %9700 = vmatprep.mubr.msk.f32.mxu1 %vm225_vm1, %v12317_v40  ;;  %v7038_v7 = vld [vmem:[#allocation3 + $0x1a2] sm:$0xff] }
 0x351   : > { %v4995_v43 = vpop.f32.mrf.mxu1 }
 0x352   : > { %v5385_v49 = vpop.f32.mrf.mxu0  ;;  %v12651_v15 = vadd.f32 %v9449_v6, %v5051_v12  ;;  %v5050_v38 = vadd.f32 %v4995_v43, %v12503_v62 }
 0x353   : > { %v9402_v54 = vpop.f32.mrf.mxu1  ;;  %9701 = vmatmul.mubr.msk.f32.gmra.mxu1 %vm225_vm1, %v12325_v36 }
 0x354   : > { %v9452_v0 = vpop.f32.mrf.mxu0  ;;  %v12656_v5 = vadd.f32 %v5385_v49, %v5050_v38  ;;  %v5053_v32 = vadd.f32 %v9402_v54, %v12509_v33  ;;  %9703 = vmatprep.mubr.msk.f32.mxu1 %vm225_vm1, %v7037_v34 }
 0x355   : > { %v5005_v40 = vpop.f32.mrf.mxu1 }
 0x356   : > { %v5395_v39 = vpop.f32.mrf.mxu0  ;;  %v12660_v29 = vadd.f32 %v9452_v0, %v5053_v32  ;;  %v5052_v11 = vadd.f32 %v5005_v40, %v12513_v46 }
 0x357   : > { %v9405_v60 = vpop.f32.mrf.mxu1  ;;  %9704 = vmatmul.mubr.msk.f32.gmra.mxu1 %vm225_vm1, %v7038_v7 }
 0x358   : > { %v9455_v62 = vpop.f32.mrf.mxu0  ;;  %v12664_v9 = vadd.f32 %v5395_v39, %v5052_v11  ;;  %v5055_v36 = vadd.f32 %v9405_v60, %v12517_v21 }
 0x359   : > { %v5015_v63 = vpop.f32.mrf.mxu1 }
 0x35a   : > { %v5405_v24 = vpop.f32.mrf.mxu0  ;;  %v12667_v33 = vadd.f32 %v9455_v62, %v5055_v36  ;;  %v5054_v48 = vadd.f32 %v5015_v63, %v13642_v20 }
 0x35b   : > { %v9460_v61 = vpop.f32.mrf.mxu1 }
 0x35c   : > { %v12670_v18 = vpop.f32.mrf.mxu0  ;;  %v12672_v26 = vadd.f32 %v5405_v24, %v5054_v48  ;;  %v12675_v46 = vadd.f32 %v9460_v61, %v12530_v51 }
 0x35d   : > { %v5645_v25 = vpop.f32.mrf.mxu1 }
 0x35e   : > { %v12677_v55 = vpop.f32.mrf.mxu0  ;;  %v12680_v10 = vadd.f32 %v5645_v25, %v12534_v2 }
 0x35f   : > { %v9463_v21 = vpop.f32.mrf.mxu1 }
 0x360   : > { %v12682_v1 = vpop.f32.mrf.mxu0  ;;  %v12685_v4 = vadd.f32 %v9463_v21, %v12539_v19 }
 0x361   : > { %v5655_v8 = vpop.f32.mrf.mxu1 }
 0x362   : > { %v12687_v28 = vpop.f32.mrf.mxu0  ;;  %v12690_v27 = vadd.f32 %v5655_v8, %v12544_v37 }
 0x363   : > { %v9466_v51 = vpop.f32.mrf.mxu1 }
 0x364   : > { %v12692_v6 = vpop.f32.mrf.mxu0  ;;  %v12695_v12 = vadd.f32 %v9466_v51, %v12549_v57 }
 0x365   : > { %v5665_v2 = vpop.f32.mrf.mxu1 }
 0x366   : > { %v12697_v43 = vpop.f32.mrf.mxu0  ;;  %v12700_v49 = vadd.f32 %v5665_v2, %v12554_v23 }
 0x367   : > { %v9469_v19 = vpop.f32.mrf.mxu1 }
 0x368   : > { %v12702_v34 = vpop.f32.mrf.mxu0  ;;  %v12705_v38 = vadd.f32 %v9469_v19, %v12559_v17 }
 0x369   : > { %v5675_v37 = vpop.f32.mrf.mxu1 }
 0x36a   : > { %v12707_v54 = vpop.f32.mrf.mxu0  ;;  %v12710_v0 = vadd.f32 %v5675_v37, %v12564_v42 }
 0x36b   : > { %v9472_v57 = vpop.f32.mrf.mxu1 }
 0x36c   : > { %v12712_v32 = vpop.f32.mrf.mxu0  ;;  %v12715_v7 = vadd.f32 %v9472_v57, %v12569_v35 }
 0x36d   : > { %v5685_v23 = vpop.f32.mrf.mxu1 }
 0x36e   : > { %v12717_v40 = vpop.f32.mrf.mxu0  ;;  %v12720_v39 = vadd.f32 %v5685_v23, %v12574_v47 }
 0x36f   : > { %v9475_v17 = vpop.f32.mrf.mxu1 }
 0x370   : > { %v12722_v11 = vpop.f32.mrf.mxu0  ;;  %v12725_v60 = vadd.f32 %v9475_v17, %v12579_v59 }
 0x371   : > { %v5695_v42 = vpop.f32.mrf.mxu1 }
 0x372   : > { %v12727_v62 = vpop.f32.mrf.mxu0  ;;  %v12730_v36 = vadd.f32 %v5695_v42, %v12584_v22 }
 0x373   : > { %v9478_v35 = vpop.f32.mrf.mxu1 }
 0x374   : > { %v12732_v63 = vpop.f32.mrf.mxu0  ;;  %v12735_v24 = vadd.f32 %v9478_v35, %v12589_v44 }
 0x375   : > { %v5705_v47 = vpop.f32.mrf.mxu1 }
 0x376   : > { %v12737_v20 = vpop.f32.mrf.mxu0  ;;  %v12740_v48 = vadd.f32 %v5705_v47, %v12594_v13 }
 0x377   : > { %v9481_v59 = vpop.f32.mrf.mxu1 }
 0x378   : > { %v12742_v61 = vpop.f32.mrf.mxu0  ;;  %v12745_v25 = vadd.f32 %v9481_v59, %v12599_v31 }
 0x379   : > { %13643 = vst [vmem:[#allocation43_spill] sm:$0xff] %v12742_v61  ;;  %v5715_v22 = vpop.f32.mrf.mxu1 }
 0x37a   : > { %v12747_v21 = vpop.f32.mrf.mxu0  ;;  %v12750_v8 = vadd.f32 %v5715_v22, %v12604_v45 }
 0x37b   : > { %13644 = vst [vmem:[#allocation45_spill] sm:$0xff] %v12747_v21  ;;  %v9484_v44 = vpop.f32.mrf.mxu1 }
 0x37c   : > { %13645 = vst [vmem:[#allocation72_spill] sm:$0xff] %v12750_v8  ;;  %v12752_v51 = vpop.f32.mrf.mxu0  ;;  %v12755_v2 = vadd.f32 %v9484_v44, %v12609_v50 }
 0x37d   : > { %13646 = vst [vmem:[#allocation71_spill] sm:$0xff] %v12752_v51  ;;  %v5725_v13 = vpop.f32.mrf.mxu1 }
 0x37e   : > { %13647 = vst [vmem:[#allocation115_spill] sm:$0xff] %v12755_v2  ;;  %v12757_v19 = vpop.f32.mrf.mxu0  ;;  %v12760_v37 = vadd.f32 %v5725_v13, %v12613_v30 }
 0x37f   : > { %13648 = vst [vmem:[#allocation74_spill] sm:$0xff] %v12757_v19  ;;  %v9487_v31 = vpop.f32.mrf.mxu1 }
 0x380   : > { %13649 = vst [vmem:[#allocation77_spill] sm:$0xff] %v12760_v37  ;;  %v12762_v57 = vpop.f32.mrf.mxu0  ;;  %v12765_v23 = vadd.f32 %v9487_v31, %v12618_v16 }
 0x381   : > { %13650 = vst [vmem:[#allocation128_spill] sm:$0xff] %v12762_v57  ;;  %v5735_v45 = vpop.f32.mrf.mxu1 }
 0x382   : > { %13651 = vst [vmem:[#allocation116_spill] sm:$0xff] %v12765_v23  ;;  %v12767_v17 = vpop.f32.mrf.mxu0  ;;  %v12770_v42 = vadd.f32 %v5735_v45, %v12622_v41 }
 0x383   : > { %13652 = vst [vmem:[#allocation46_spill] sm:$0xff] %v12767_v17  ;;  %v9490_v50 = vpop.f32.mrf.mxu1 }
 0x384   : > { %13653 = vst [vmem:[#allocation47_spill] sm:$0xff] %v12770_v42  ;;  %v12772_v35 = vpop.f32.mrf.mxu0  ;;  %v12775_v47 = vadd.f32 %v9490_v50, %v12626_v3 }
 0x385   : > { %13654 = vst [vmem:[#allocation76_spill] sm:$0xff] %v12772_v35  ;;  %v5745_v30 = vpop.f32.mrf.mxu1 }
 0x386   : > { %13655 = vst [vmem:[#allocation75_spill] sm:$0xff] %v12775_v47  ;;  %v12777_v59 = vpop.f32.mrf.mxu0  ;;  %v12780_v22 = vadd.f32 %v5745_v30, %v12630_v58 }
 0x387   : > { %13656 = vst [vmem:[#allocation118_spill] sm:$0xff] %v12777_v59  ;;  %v9493_v16 = vpop.f32.mrf.mxu1 }
 0x388   : > { %13657 = vst [vmem:[#allocation78_spill] sm:$0xff] %v12780_v22  ;;  %v12782_v44 = vpop.f32.mrf.mxu0  ;;  %v12785_v13 = vadd.f32 %v9493_v16, %v12634_v53 }
 0x389   : > { %13658 = vst [vmem:[#allocation81_spill] sm:$0xff] %v12782_v44  ;;  %v5755_v41 = vpop.f32.mrf.mxu1 }
 0x38a   : > { %13659 = vst [vmem:[#allocation119_spill] sm:$0xff] %v12785_v13  ;;  %v12787_v31 = vpop.f32.mrf.mxu0  ;;  %v12790_v45 = vadd.f32 %v5755_v41, %v12638_v52 }
 0x38b   : > { %13660 = vst [vmem:[#allocation133_spill] sm:$0xff] %v12787_v31  ;;  %v9496_v3 = vpop.f32.mrf.mxu1 }
 0x38c   : > { %13661 = vst [vmem:[#allocation48_spill] sm:$0xff] %v12790_v45  ;;  %v12792_v50 = vpop.f32.mrf.mxu0  ;;  %v12795_v59 = vadd.f32 %v9496_v3, %v12642_v14 }
 0x38d   : > { %13662 = vst [vmem:[#allocation49_spill] sm:$0xff] %v12792_v50  ;;  %v5765_v58 = vpop.f32.mrf.mxu1 }
 0x38e   : > { %13663 = vst [vmem:[#allocation80_spill] sm:$0xff] %v12795_v59  ;;  %v12797_v30 = vpop.f32.mrf.mxu0  ;;  %v12800_v44 = vadd.f32 %v5765_v58, %v12646_v56 }
 0x38f   : > { %13664 = vst [vmem:[#allocation79_spill] sm:$0xff] %v12797_v30  ;;  %v9499_v53 = vpop.f32.mrf.mxu1 }
 0x390   : > { %13665 = vst [vmem:[#allocation121_spill] sm:$0xff] %v12800_v44  ;;  %v12802_v16 = vpop.f32.mrf.mxu0  ;;  %v12805_v31 = vadd.f32 %v9499_v53, %v12651_v15 }
 0x391   : > { %13666 = vst [vmem:[#allocation82_spill] sm:$0xff] %v12802_v16  ;;  %v5775_v52 = vpop.f32.mrf.mxu1 }
 0x392   : > { %13667 = vst [vmem:[#allocation85_spill] sm:$0xff] %v12805_v31  ;;  %v12807_v41 = vpop.f32.mrf.mxu0  ;;  %v12810_v50 = vadd.f32 %v5775_v52, %v12656_v5 }
 0x393   : > { %13668 = vst [vmem:[#allocation122_spill] sm:$0xff] %v12807_v41  ;;  %v9502_v14 = vpop.f32.mrf.mxu1 }
 0x394   : > { %13669 = vst [vmem:[#allocation50_spill] sm:$0xff] %v12810_v50  ;;  %v12812_v3 = vpop.f32.mrf.mxu0  ;;  %v12815_v30 = vadd.f32 %v9502_v14, %v12660_v29 }
 0x395   : > { %13670 = vst [vmem:[#allocation53_spill] sm:$0xff] %v12812_v3  ;;  %v5785_v56 = vpop.f32.mrf.mxu1 }
 0x396   : > { %13671 = vst [vmem:[#allocation84_spill] sm:$0xff] %v12815_v30  ;;  %v12817_v58 = vpop.f32.mrf.mxu0  ;;  %v12820_v16 = vadd.f32 %v5785_v56, %v12664_v9 }
 0x397   : > { %13672 = vst [vmem:[#allocation83_spill] sm:$0xff] %v12817_v58  ;;  %v9505_v15 = vpop.f32.mrf.mxu1 }
 0x398   : > { %13673 = vst [vmem:[#allocation124_spill] sm:$0xff] %v12820_v16  ;;  %v12822_v53 = vpop.f32.mrf.mxu0  ;;  %v12825_v41 = vadd.f32 %v9505_v15, %v12667_v33 }
 0x399   : > { %13674 = vst [vmem:[#allocation86_spill] sm:$0xff] %v12822_v53  ;;  %v5795_v5 = vpop.f32.mrf.mxu1 }
 0x39a   : > { %13675 = vst [vmem:[#allocation89_spill] sm:$0xff] %v12825_v41  ;;  %v12827_v52 = vpop.f32.mrf.mxu0  ;;  %v12830_v3 = vadd.f32 %v5795_v5, %v12672_v26 }
 0x39b   : > { %13676 = vst [vmem:[#allocation125_spill] sm:$0xff] %v12827_v52  ;;  %v9560_v29 = vpop.f32.mrf.mxu1 }
 0x39c   : > { %13677 = vst [vmem:[#allocation54_spill] sm:$0xff] %v12830_v3  ;;  %v9610_v14 = vpop.f32.mrf.mxu0 }
 0x39d   : > { %v6426_v30 = vpop.f32.mrf.mxu1 }
 0x39e   : > { %v6816_v50 = vpop.f32.mrf.mxu0 }
 0x39f   : > { %v9563_v58 = vpop.f32.mrf.mxu1 }
 0x3a0   : > { %v9613_v9 = vpop.f32.mrf.mxu0 }
 0x3a1   : > { %v6436_v31 = vpop.f32.mrf.mxu1 }
 0x3a2   : > { %v12834_v53 = vpop.f32.mrf.mxu0 }
 0x3a3   : > { %v9566_v56 = vpop.f32.mrf.mxu1 }
 0x3a4   : > { %v12840_v52 = vpop.f32.mrf.mxu0 }
 0x3a5   : > { %v12832_v16 = vpop.f32.mrf.mxu1 }
 0x3a6   : > { %v12846_v3 = vpop.f32.mrf.mxu0 }
 0x3a7   : > { %v12836_v33 = vpop.f32.mrf.mxu1 }
 0x3a8   : > { %v12852_v59 = vpop.f32.mrf.mxu0 }
 0x3a9   : > { %v12838_v15 = vpop.f32.mrf.mxu1 }
 0x3aa   : > { %v12858_v22 = vpop.f32.mrf.mxu0 }
 0x3ab   : > { %v12842_v26 = vpop.f32.mrf.mxu1 }
 0x3ac   : > { %v12864_v17 = vpop.f32.mrf.mxu0 }
 0x3ad   : > { %v12844_v5 = vpop.f32.mrf.mxu1 }
 0x3ae   : > { %v12870_v23 = vpop.f32.mrf.mxu0 }
 0x3af   : > { %v12848_v41 = vpop.f32.mrf.mxu1 }
 0x3b0   : > { %v12876_v51 = vpop.f32.mrf.mxu0 }
 0x3b1   : > { %v12850_v44 = vpop.f32.mrf.mxu1 }
 0x3b3   : > { %v12854_v45 = vpop.f32.mrf.mxu1 }
 0x3b5   : > { %v12856_v13 = vpop.f32.mrf.mxu1 }
 0x3b6   : > { %13678 = vst [vmem:[#allocation55_spill] sm:$0xff] %v12856_v13 }
 0x3b7   : > { %v12860_v35 = vpop.f32.mrf.mxu1 }
 0x3b8   : > { %13679 = vst [vmem:[#allocation88_spill] sm:$0xff] %v12860_v35  ;;  %v12882_v35 = vpop.f32.mrf.mxu0 }
 0x3b9   : > { %v12862_v47 = vpop.f32.mrf.mxu1 }
 0x3ba   : > { %13680 = vst [vmem:[#allocation87_spill] sm:$0xff] %v12862_v47 }
 0x3bb   : > { %v12866_v42 = vpop.f32.mrf.mxu1 }
 0x3bc   : > { %13681 = vst [vmem:[#allocation126_spill] sm:$0xff] %v12866_v42  ;;  %v12888_v42 = vpop.f32.mrf.mxu0 }
 0x3bd   : > { %v12868_v57 = vpop.f32.mrf.mxu1  ;;  %13689 = vst [vmem:[#allocation129_spill] sm:$0xff] %v12888_v42 }
 0x3be   : > { %13682 = vst [vmem:[#allocation90_spill] sm:$0xff] %v12868_v57 }
 0x3bf   : > { %v12872_v19 = vpop.f32.mrf.mxu1 }
 0x3c0   : > { %13683 = vst [vmem:[#allocation93_spill] sm:$0xff] %v12872_v19  ;;  %v12894_v19 = vpop.f32.mrf.mxu0 }
 0x3c1   : > { %v12874_v37 = vpop.f32.mrf.mxu1  ;;  %13692 = vst [vmem:[#allocation130_spill] sm:$0xff] %v12894_v19 }
 0x3c2   : > { %13684 = vst [vmem:[#allocation127_spill] sm:$0xff] %v12874_v37 }
 0x3c3   : > { %v12878_v2 = vpop.f32.mrf.mxu1 }
 0x3c4   : > { %13685 = vst [vmem:[#allocation56_spill] sm:$0xff] %v12878_v2  ;;  %v12900_v2 = vpop.f32.mrf.mxu0 }
 0x3c5   : > { %v12880_v21 = vpop.f32.mrf.mxu1  ;;  %13695 = vst [vmem:[#allocation96_spill] sm:$0xff] %v12900_v2 }
 0x3c6   : > { %13686 = vst [vmem:[#allocation57_spill] sm:$0xff] %v12880_v21 }
 0x3c7   : > { %v12884_v47 = vpop.f32.mrf.mxu1 }
 0x3c8   : > { %13687 = vst [vmem:[#allocation92_spill] sm:$0xff] %v12884_v47  ;;  %v6195_v47 = vadd.f32 %v12670_v18, %v12675_v46 }
 0x3c9   : > { %v12886_v8 = vpop.f32.mrf.mxu1 }
 0x3ca   : > { %13688 = vst [vmem:[#allocation91_spill] sm:$0xff] %v12886_v8  ;;  %v6586_v42 = vadd.f32 %v9560_v29, %v6195_v47  ;;  %v12927_v47 = vld [vmem:[%s13193_s4] ss:$0 sm:$0xff] }
 0x3cb   : > { %v12890_v57 = vpop.f32.mrf.mxu1 }
 0x3cc   : > { %13690 = vst [vmem:[#allocation94_spill] sm:$0xff] %v12890_v57  ;;  %v6194_v57 = vadd.f32 %v12677_v55, %v12680_v10  ;;  %v6976_v18 = vadd.f32 %v9610_v14, %v6586_v42  ;;  %v6199_v55 = vadd.f32 %v12692_v6, %v12695_v12  ;;  %v6200_v14 = vadd.f32 %v12707_v54, %v12710_v0 }
 0x3cd   : > { %v12892_v13 = vpop.f32.mrf.mxu1  ;;  %v6203_v0 = vadd.f32 %v12712_v32, %v12715_v7 }
 0x3ce   : > { %13691 = vst [vmem:[#allocation97_spill] sm:$0xff] %v12892_v13  ;;  %v12910_v13 = vpop.f32.mrf.mxu0 }
 0x3cf   : > { %v12896_v37 = vpop.f32.mrf.mxu1  ;;  %v6594_v32 = vadd.f32 %v12842_v26, %v6203_v0  ;;  %v6206_v0 = vadd.f32 %v12737_v20, %v12740_v48  ;;  %v13707_v48 = vld [vmem:[#allocation55_spill] sm:$0xff] }
 0x3d0   : > { %13693 = vst [vmem:[#allocation58_spill] sm:$0xff] %v12896_v37  ;;  %v6585_v37 = vadd.f32 %v6426_v30, %v6194_v57  ;;  %v6198_v30 = vadd.f32 %v12697_v43, %v12700_v49 }
 0x3d1   : > { %v12898_v61 = vpop.f32.mrf.mxu1 }
 0x3d2   : > { %13694 = vst [vmem:[#allocation59_spill] sm:$0xff] %v12898_v61  ;;  %v6197_v61 = vadd.f32 %v12682_v1, %v12685_v4  ;;  %v6975_v1 = vadd.f32 %v6816_v50, %v6585_v37  ;;  %v6589_v29 = vadd.f32 %v12832_v16, %v6198_v30 }
 0x3d3   : > { %v12902_v21 = vpop.f32.mrf.mxu1 }
 0x3d4   : > { %13696 = vst [vmem:[#allocation95_spill] sm:$0xff] %v12902_v21  ;;  %v6196_v21 = vadd.f32 %v12687_v28, %v12690_v27  ;;  %v6588_v46 = vadd.f32 %v9563_v58, %v6197_v61  ;;  %v6590_v28 = vadd.f32 %v9566_v56, %v6199_v55  ;;  %v6201_v58 = vadd.f32 %v12702_v34, %v12705_v38 }
 0x3d5   : > { %v12906_v8 = vpop.f32.mrf.mxu1 }
 0x3d6   : > { %13697 = vst [vmem:[#allocation131_spill] sm:$0xff] %v12906_v8  ;;  %v12920_v8 = vpop.f32.mrf.mxu0  ;;  %v6587_v4 = vadd.f32 %v6436_v31, %v6196_v21  ;;  %v6978_v61 = vadd.f32 %v9613_v9, %v6588_v46  ;;  %v13698_v31 = vld [vmem:[#allocation5_spill] sm:$0xff]  ;;  %v6980_v9 = vadd.f32 %v12840_v52, %v6590_v28  ;;  %v6592_v56 = vadd.f32 %v12836_v33, %v6201_v58 }
 0x3d7   : > { %v12912_v19 = vpop.f32.mrf.mxu1  ;;  %v6979_v52 = vadd.f32 %v12846_v3, %v6589_v29  ;;  %v6591_v33 = vadd.f32 %v12838_v15, %v6200_v14  ;;  %v6202_v28 = vadd.f32 %v12717_v40, %v12720_v39  ;;  %v6205_v29 = vadd.f32 %v12722_v11, %v12725_v60  ;;  %v13703_v14 = vld [vmem:[#allocation8_spill] sm:$0xff] }
 0x3d8   : > { %v12931_v42 = vpop.f32.mrf.mxu0  ;;  %v6977_v21 = vadd.f32 %v12834_v53, %v6587_v4  ;;  %v13699_v53 = vld [vmem:[#allocation4_spill] sm:$0xff] }
 0x3d9   : > { %v12916_v2 = vpop.f32.mrf.mxu1  ;;  %v6981_v40 = vadd.f32 %v12858_v22, %v6591_v33  ;;  %v6593_v39 = vadd.f32 %v12844_v5, %v6202_v28  ;;  %v6596_v11 = vadd.f32 %v12848_v41, %v6205_v29  ;;  %v13705_v33 = vld [vmem:[#allocation10_spill] sm:$0xff]  ;;  %v13708_v28 = vld [vmem:[#allocation13_spill] sm:$0xff] }
 0x3da   : > { %v12951_v38 = vpop.f32.mrf.mxu0 }
 0x3db   : > { %v9660_v10 = vpop.f32.mrf.mxu1 }
 0x3dc   : > { %v7366_v57 = vadd.f32 %v9660_v10, %v6976_v18  ;;  %v12967_v3 = vpop.f32.mrf.mxu0 }
 0x3dd   : > { %v7206_v27 = vpop.f32.mrf.mxu1 }
 0x3de   : > { %v7405_v6 = vadd.f32 %v12927_v47, %v7366_v57  ;;  %v7365_v12 = vadd.f32 %v7206_v27, %v6975_v1  ;;  %v13700_v1 = vld [vmem:[#allocation7_spill] sm:$0xff]  ;;  %v6982_v27 = vadd.f32 %v12852_v59, %v6592_v56  ;;  %v12985_v22 = vpop.f32.mrf.mxu0 }
 0x3df   : > { %v9663_v37 = vpop.f32.mrf.mxu1 }
 0x3e0   : > { %v7437_v50 = vadd.f32 %v7405_v6, %v13698_v31  ;;  %v7404_v43 = vadd.f32 %v12927_v47, %v7365_v12  ;;  %v7368_v49 = vadd.f32 %v9663_v37, %v6978_v61  ;;  %v13701_v61 = vld [vmem:[#allocation6_spill] sm:$0xff]  ;;  %v13702_v37 = vld [vmem:[#allocation9_spill] sm:$0xff] }
 0x3e1   : > { %v7216_v34 = vpop.f32.mrf.mxu1 }
 0x3e2   : > { %v7469_v16 = vmax.f32 %v7437_v50, 0.0  ;;  %v7436_v18 = vadd.f32 %v7404_v43, %v13699_v53  ;;  %v7407_v46 = vadd.f32 %v12927_v47, %v7368_v49  ;;  %v7367_v54 = vadd.f32 %v7216_v34, %v6977_v21  ;;  %v13704_v53 = vld [vmem:[#allocation11_spill] sm:$0xff] }
 0x3e3   : > { %v9666_v55 = vpop.f32.mrf.mxu1  ;;  %v6204_v43 = vadd.f32 %v12727_v62, %v12730_v36  ;;  %v6984_v49 = vadd.f32 %v12864_v17, %v6594_v32  ;;  %v6983_v62 = vadd.f32 %v12870_v23, %v6593_v39  ;;  %v13003_v23 = vpop.f32.mrf.mxu0 }
 0x3e4   : > { %7501 = vst.msk [vmem:[%s12949_s22 + $0x8] sm:$0xff] %vm225_vm1, %v7469_v16  ;;  %v7468_v10 = vmax.f32 %v7436_v18, 0.0  ;;  %v7439_v4 = vadd.f32 %v7407_v46, %v13700_v1  ;;  %v7406_v57 = vadd.f32 %v12927_v47, %v7367_v54  ;;  %v7370_v30 = vadd.f32 %v9666_v55, %v6980_v9 }
 0x3e5   : > { %v7226_v7 = vpop.f32.mrf.mxu1  ;;  %v6207_v16 = vadd.f32 %v12732_v63, %v12735_v24  ;;  %v6595_v36 = vadd.f32 %v12850_v44, %v6204_v43 }
 0x3e6   : > { %7500 = vst.msk [vmem:[%s12949_s22] sm:$0xff] %vm225_vm1, %v7468_v10  ;;  %v7471_v15 = vmax.f32 %v7439_v4, 0.0  ;;  %v7438_v6 = vadd.f32 %v7406_v57, %v13701_v61  ;;  %v7409_v12 = vadd.f32 %v12927_v47, %v7370_v30  ;;  %v7369_v58 = vadd.f32 %v7226_v7, %v6979_v52  ;;  %v13706_v4 = vld [vmem:[#allocation43_spill] sm:$0xff]  ;;  %v13710_v61 = vld [vmem:[#allocation45_spill] sm:$0xff] }
 0x3e7   : > { %v9669_v59 = vpop.f32.mrf.mxu1  ;;  %v6986_v52 = vadd.f32 %v12876_v51, %v6596_v11  ;;  %v6598_v63 = vadd.f32 %v12854_v45, %v6207_v16  ;;  %v6209_v57 = vadd.f32 %v13706_v4, %v12745_v25  ;;  %v6985_v20 = vadd.f32 %v12882_v35, %v6595_v36  ;;  %v13712_v25 = vld [vmem:[#allocation88_spill] sm:$0xff]  ;;  %v13719_v36 = vld [vmem:[#allocation77_spill] sm:$0xff] }
 0x3e8   : > { %7503 = vst.msk [vmem:[%s12949_s22 + $0x18] sm:$0xff] %vm225_vm1, %v7471_v15  ;;  %v7470_v26 = vmax.f32 %v7438_v6, 0.0  ;;  %v7441_v21 = vadd.f32 %v7409_v12, %v13702_v37  ;;  %v7408_v31 = vadd.f32 %v12927_v47, %v7369_v58  ;;  %v7372_v50 = vadd.f32 %v9669_v59, %v6982_v27  ;;  %v13709_v15 = vld [vmem:[#allocation72_spill] sm:$0xff]  ;;  %v13711_v12 = vld [vmem:[#allocation129_spill] sm:$0xff] }
 0x3e9   : > { %v7236_v60 = vpop.f32.mrf.mxu1  ;;  %v6597_v51 = vadd.f32 %v13707_v48, %v6206_v0  ;;  %v6208_v6 = vadd.f32 %v13710_v61, %v13709_v15  ;;  %v6988_v58 = vadd.f32 %v13711_v12, %v6598_v63  ;;  %v6600_v29 = vadd.f32 %v13712_v25, %v6209_v57  ;;  %v13713_v59 = vld [vmem:[#allocation12_spill] sm:$0xff]  ;;  %v13729_v15 = vld [vmem:[#allocation46_spill] sm:$0xff]  ;;  %v13730_v12 = vld [vmem:[#allocation93_spill] sm:$0xff] }
 0x3ea   : > { %7502 = vst.msk [vmem:[%s12949_s22 + $0x10] sm:$0xff] %vm225_vm1, %v7470_v26  ;;  %v7473_v5 = vmax.f32 %v7441_v21, 0.0  ;;  %v7440_v9 = vadd.f32 %v7408_v31, %v13703_v14  ;;  %v7411_v56 = vadd.f32 %v12927_v47, %v7372_v50  ;;  %v7371_v34 = vadd.f32 %v7236_v60, %v6981_v40  ;;  %v13021_v40 = vpop.f32.mrf.mxu0  ;;  %v13714_v31 = vld [vmem:[#allocation115_spill] sm:$0xff] }
 0x3eb   : > { %v9672_v17 = vpop.f32.mrf.mxu1  ;;  %v13715_v50 = vld [vmem:[#allocation71_spill] sm:$0xff] }
 0x3ec   : > { %7505 = vst.msk [vmem:[%s12949_s22 + $0x28] sm:$0xff] %vm225_vm1, %v7473_v5  ;;  %v7472_v41 = vmax.f32 %v7440_v9, 0.0  ;;  %v7443_v18 = vadd.f32 %v7411_v56, %v13704_v53  ;;  %v7410_v46 = vadd.f32 %v12927_v47, %v7371_v34  ;;  %v7374_v54 = vadd.f32 %v9672_v17, %v6984_v49  ;;  %v13716_v49 = vld [vmem:[#allocation130_spill] sm:$0xff]  ;;  %v13717_v60 = vld [vmem:[#allocation87_spill] sm:$0xff]  ;;  %v13721_v53 = vld [vmem:[#allocation96_spill] sm:$0xff] }
 0x3ed   : > { %v7246_v24 = vpop.f32.mrf.mxu1  ;;  %v6211_v43 = vadd.f32 %v13715_v50, %v13714_v31  ;;  %v6987_v11 = vadd.f32 %v13716_v49, %v6597_v51  ;;  %v6599_v5 = vadd.f32 %v13717_v60, %v6208_v6  ;;  %v13718_v56 = vld [vmem:[#allocation15_spill] sm:$0xff]  ;;  %v13720_v17 = vld [vmem:[#allocation74_spill] sm:$0xff] }
 0x3ee   : > { %7504 = vst.msk [vmem:[%s12949_s22 + $0x20] sm:$0xff] %vm225_vm1, %v7472_v41  ;;  %v7475_v44 = vmax.f32 %v7443_v18, 0.0  ;;  %v7442_v55 = vadd.f32 %v7410_v46, %v13705_v33  ;;  %v7413_v10 = vadd.f32 %v12927_v47, %v7374_v54  ;;  %v7373_v1 = vadd.f32 %v7246_v24, %v6983_v62  ;;  %v13722_v46 = vld [vmem:[#allocation126_spill] sm:$0xff]  ;;  %v13735_v60 = vld [vmem:[#allocation19_spill] sm:$0xff] }
 0x3ef   : > { %v9675_v45 = vpop.f32.mrf.mxu1  ;;  %v6210_v41 = vadd.f32 %v13720_v17, %v13719_v36  ;;  %v6990_v18 = vadd.f32 %v13721_v53, %v6600_v29  ;;  %v6602_v54 = vadd.f32 %v13722_v46, %v6211_v43  ;;  %v13723_v24 = vld [vmem:[#allocation14_spill] sm:$0xff]  ;;  %v6989_v57 = vadd.f32 %v12910_v13, %v6599_v5  ;;  %v13738_v36 = vld [vmem:[#allocation56_spill] sm:$0xff] }
 0x3f0   : > { %7507 = vst.msk [vmem:[%s12949_s22 + $0x38] sm:$0xff] %vm225_vm1, %v7475_v44  ;;  %v7474_v30 = vmax.f32 %v7442_v55, 0.0  ;;  %v7445_v27 = vadd.f32 %v7413_v10, %v13708_v28  ;;  %v7412_v32 = vadd.f32 %v12927_v47, %v7373_v1  ;;  %v7376_v7 = vadd.f32 %v9675_v45, %v6986_v52  ;;  %v13039_v52 = vpop.f32.mrf.mxu0  ;;  %v13724_v10 = vld [vmem:[#allocation116_spill] sm:$0xff] }
 0x3f1   : > { %v7256_v35 = vpop.f32.mrf.mxu1  ;;  %v13725_v1 = vld [vmem:[#allocation128_spill] sm:$0xff]  ;;  %v6992_v6 = vadd.f32 %v12920_v8, %v6602_v54  ;;  %v13734_v8 = vld [vmem:[#allocation127_spill] sm:$0xff] }
 0x3f2   : > { %7506 = vst.msk [vmem:[%s12949_s22 + $0x30] sm:$0xff] %vm225_vm1, %v7474_v30  ;;  %v7477_v39 = vmax.f32 %v7445_v27, 0.0  ;;  %v7444_v26 = vadd.f32 %v7412_v32, %v13713_v59  ;;  %v7415_v37 = vadd.f32 %v12927_v47, %v7376_v7  ;;  %v7375_v21 = vadd.f32 %v7256_v35, %v6985_v20  ;;  %v13726_v20 = vld [vmem:[#allocation90_spill] sm:$0xff]  ;;  %v13727_v30 = vld [vmem:[#allocation17_spill] sm:$0xff]  ;;  %v13728_v7 = vld [vmem:[#allocation47_spill] sm:$0xff]  ;;  %v13057_v25 = vpop.f32.mrf.mxu0 }
 0x3f3   : > { %v9678_v14 = vpop.f32.mrf.mxu1  ;;  %v6213_v4 = vadd.f32 %v13725_v1, %v13724_v10  ;;  %v6601_v48 = vadd.f32 %v13726_v20, %v6210_v41  ;;  %v6212_v61 = vadd.f32 %v13729_v15, %v13728_v7  ;;  %v13731_v35 = vld [vmem:[#allocation16_spill] sm:$0xff] }
 0x3f4   : > { %7509 = vst.msk [vmem:[%s12949_s22 + $0x48] sm:$0xff] %vm225_vm1, %v7477_v39  ;;  %v7476_v9 = vmax.f32 %v7444_v26, 0.0  ;;  %v7447_v34 = vadd.f32 %v7415_v37, %v13718_v56  ;;  %v7414_v16 = vadd.f32 %v12927_v47, %v7375_v21  ;;  %v7378_v62 = vadd.f32 %v9678_v14, %v6988_v58  ;;  %v13732_v37 = vld [vmem:[#allocation75_spill] sm:$0xff]  ;;  %v13733_v21 = vld [vmem:[#allocation76_spill] sm:$0xff]  ;;  %v13736_v56 = vld [vmem:[#allocation78_spill] sm:$0xff]  ;;  %v13075_v41 = vpop.f32.mrf.mxu0 }
 0x3f5   : > { %v7266_v0 = vpop.f32.mrf.mxu1  ;;  %v6604_v58 = vadd.f32 %v13730_v12, %v6213_v4  ;;  %v6215_v31 = vadd.f32 %v13733_v21, %v13732_v37  ;;  %v6991_v50 = vadd.f32 %v12931_v42, %v6601_v48  ;;  %v6603_v43 = vadd.f32 %v13734_v8, %v6212_v61  ;;  %v13743_v4 = vld [vmem:[#allocation21_spill] sm:$0xff]  ;;  %v13747_v61 = vld [vmem:[#allocation20_spill] sm:$0xff]  ;;  %v13751_v21 = vld [vmem:[#allocation23_spill] sm:$0xff] }
 0x3f6   : > { %7508 = vst.msk [vmem:[%s12949_s22 + $0x40] sm:$0xff] %vm225_vm1, %v7476_v9  ;;  %v7479_v63 = vmax.f32 %v7447_v34, 0.0  ;;  %v7446_v44 = vadd.f32 %v7414_v16, %v13723_v24  ;;  %v7417_v33 = vadd.f32 %v12927_v47, %v7378_v62  ;;  %v7377_v55 = vadd.f32 %v7266_v0, %v6987_v11  ;;  %v13737_v34 = vld [vmem:[#allocation118_spill] sm:$0xff]  ;;  %v13741_v24 = vld [vmem:[#allocation81_spill] sm:$0xff]  ;;  %v9649_v7 = vpop.f32.mrf.mxu0 }
 0x3f7   : > { %v9681_v51 = vpop.f32.mrf.mxu1  ;;  %v6214_v16 = vadd.f32 %v13737_v34, %v13736_v56  ;;  %v6994_v62 = vadd.f32 %v12951_v38, %v6604_v58  ;;  %v6606_v17 = vadd.f32 %v13738_v36, %v6215_v31  ;;  %v13742_v38 = vld [vmem:[#allocation57_spill] sm:$0xff]  ;;  %v13755_v34 = vld [vmem:[#allocation22_spill] sm:$0xff] }
 0x3f8   : > { %7511 = vst.msk [vmem:[%s12949_s22 + $0x58] sm:$0xff] %vm225_vm1, %v7479_v63  ;;  %v7478_v45 = vmax.f32 %v7446_v44, 0.0  ;;  %v7449_v28 = vadd.f32 %v7417_v33, %v13727_v30  ;;  %v7416_v27 = vadd.f32 %v12927_v47, %v7377_v55  ;;  %v7380_v32 = vadd.f32 %v9681_v51, %v6990_v18  ;;  %v13739_v18 = vld [vmem:[#allocation18_spill] sm:$0xff]  ;;  %v13740_v63 = vld [vmem:[#allocation119_spill] sm:$0xff]  ;;  %v13744_v51 = vld [vmem:[#allocation48_spill] sm:$0xff] }
 0x3f9   : > { %v7276_v13 = vpop.f32.mrf.mxu1  ;;  %v6217_v44 = vadd.f32 %v13741_v24, %v13740_v63  ;;  %v6993_v33 = vadd.f32 %v12967_v3, %v6603_v43  ;;  %v6605_v55 = vadd.f32 %v13742_v38, %v6214_v16  ;;  %v13752_v43 = vld [vmem:[#allocation121_spill] sm:$0xff]  ;;  %v13760_v38 = vld [vmem:[#allocation50_spill] sm:$0xff] }
 0x3fa   : > { %7510 = vst.msk [vmem:[%s12949_s22 + $0x50] sm:$0xff] %vm225_vm1, %v7478_v45  ;;  %v7481_v29 = vmax.f32 %v7449_v28, 0.0  ;;  %v7448_v39 = vadd.f32 %v7416_v27, %v13731_v35  ;;  %v7419_v59 = vadd.f32 %v12927_v47, %v7380_v32  ;;  %v7379_v26 = vadd.f32 %v7276_v13, %v6989_v57  ;;  %v13745_v45 = vld [vmem:[#allocation133_spill] sm:$0xff]  ;;  %v13746_v27 = vld [vmem:[#allocation92_spill] sm:$0xff] }
 0x3fb   : > { %v9684_v49 = vpop.f32.mrf.mxu1  ;;  %v6216_v30 = vadd.f32 %v13745_v45, %v13744_v51  ;;  %v6996_v28 = vadd.f32 %v12985_v22, %v6606_v17  ;;  %v6608_v32 = vadd.f32 %v13746_v27, %v6217_v44  ;;  %v13748_v13 = vld [vmem:[#allocation80_spill] sm:$0xff]  ;;  %v13756_v17 = vld [vmem:[#allocation85_spill] sm:$0xff] }
 0x3fc   : > { %7513 = vst.msk [vmem:[%s12949_s22 + $0x68] sm:$0xff] %vm225_vm1, %v7481_v29  ;;  %v7480_v11 = vmax.f32 %v7448_v39, 0.0  ;;  %v7451_v5 = vadd.f32 %v7419_v59, %v13735_v60  ;;  %v7418_v14 = vadd.f32 %v12927_v47, %v7379_v26  ;;  %v7382_v9 = vadd.f32 %v9684_v49, %v6992_v6  ;;  %v13749_v29 = vld [vmem:[#allocation49_spill] sm:$0xff]  ;;  %v13750_v59 = vld [vmem:[#allocation91_spill] sm:$0xff]  ;;  %v13763_v51 = vld [vmem:[#allocation32_spill] sm:$0xff] }
 0x3fd   : > { %v7286_v42 = vpop.f32.mrf.mxu1  ;;  %v6219_v35 = vadd.f32 %v13749_v29, %v13748_v13  ;;  %v6995_v39 = vadd.f32 %v13003_v23, %v6605_v55  ;;  %v6607_v22 = vadd.f32 %v13750_v59, %v6216_v30  ;;  %v13753_v49 = vld [vmem:[#allocation79_spill] sm:$0xff]  ;;  %v6998_v60 = vadd.f32 %v13021_v40, %v6608_v32  ;;  %v13759_v63 = vld [vmem:[#allocation33_spill] sm:$0xff]  ;;  %v13761_v55 = vld [vmem:[#allocation122_spill] sm:$0xff] }
 0x3fe   : > { %7512 = vst.msk [vmem:[%s12949_s22 + $0x60] sm:$0xff] %vm225_vm1, %v7480_v11  ;;  %v7483_v53 = vmax.f32 %v7451_v5, 0.0  ;;  %v7450_v46 = vadd.f32 %v7418_v14, %v13739_v18  ;;  %v7421_v54 = vadd.f32 %v12927_v47, %v7382_v9  ;;  %v7381_v0 = vadd.f32 %v7286_v42, %v6991_v50  ;;  %v13754_v5 = vld [vmem:[#allocation94_spill] sm:$0xff]  ;;  %v6946_v9 = vpop.f32.mrf.mxu0  ;;  %v13764_v27 = vld [vmem:[#allocation84_spill] sm:$0xff]  ;;  %v13765_v32 = vld [vmem:[#allocation53_spill] sm:$0xff] }
 0x3ff   : > { %v9687_v10 = vpop.f32.mrf.mxu1  ;;  %v6218_v11 = vadd.f32 %v13753_v49, %v13752_v43  ;;  %v6610_v14 = vadd.f32 %v13754_v5, %v6219_v35  ;;  %v13757_v42 = vld [vmem:[#allocation82_spill] sm:$0xff]  ;;  %v6997_v18 = vadd.f32 %v13039_v52, %v6607_v22  ;;  %v13769_v59 = vld [vmem:[#allocation83_spill] sm:$0xff] }
 0x400   : > { %7515 = vst.msk [vmem:[%s12949_s22 + $0x78] sm:$0xff] %vm225_vm1, %v7483_v53  ;;  %v7482_v1 = vmax.f32 %v7450_v46, 0.0  ;;  %v7453_v57 = vadd.f32 %v7421_v54, %v13743_v4  ;;  %v7420_v20 = vadd.f32 %v12927_v47, %v7381_v0  ;;  %v7384_v48 = vadd.f32 %v9687_v10, %v6994_v62  ;;  %v13758_v46 = vld [vmem:[#allocation97_spill] sm:$0xff]  ;;  %v13762_v4 = vld [vmem:[#allocation58_spill] sm:$0xff] }
 0x401   : > { %v7296_v3 = vpop.f32.mrf.mxu1  ;;  %v6221_v53 = vadd.f32 %v13757_v42, %v13756_v17  ;;  %v6609_v40 = vadd.f32 %v13758_v46, %v6218_v11  ;;  %v6220_v10 = vadd.f32 %v13761_v55, %v13760_v38  ;;  %v13773_v5 = vld [vmem:[#allocation86_spill] sm:$0xff]  ;;  %v13777_v46 = vld [vmem:[#allocation125_spill] sm:$0xff] }
 0x402   : > { %7514 = vst.msk [vmem:[%s12949_s22 + $0x70] sm:$0xff] %vm225_vm1, %v7482_v1  ;;  %v7485_v15 = vmax.f32 %v7453_v57, 0.0  ;;  %v7452_v6 = vadd.f32 %v7420_v20, %v13747_v61  ;;  %v7423_v12 = vadd.f32 %v12927_v47, %v7384_v48  ;;  %v7383_v58 = vadd.f32 %v7296_v3, %v6993_v33  ;;  %v9652_v20 = vpop.f32.mrf.mxu0  ;;  %v13766_v61 = vld [vmem:[#allocation59_spill] sm:$0xff] }
 0x403   : > { %v9690_v26 = vpop.f32.mrf.mxu1  ;;  %v7000_v1 = vadd.f32 %v13057_v25, %v6610_v14  ;;  %v6612_v57 = vadd.f32 %v13762_v4, %v6221_v53  ;;  %v6223_v3 = vadd.f32 %v13765_v32, %v13764_v27  ;;  %v6611_v25 = vadd.f32 %v13766_v61, %v6220_v10 }
 0x404   : > { %7517 = vst.msk [vmem:[%s12949_s22 + $0x88] sm:$0xff] %vm225_vm1, %v7485_v15  ;;  %v7484_v37 = vmax.f32 %v7452_v6, 0.0  ;;  %v7455_v31 = vadd.f32 %v7423_v12, %v13751_v21  ;;  %v7422_v50 = vadd.f32 %v12927_v47, %v7383_v58  ;;  %v7386_v8 = vadd.f32 %v9690_v26, %v6996_v28  ;;  %v13767_v58 = vld [vmem:[#allocation35_spill] sm:$0xff] }
 0x405   : > { %v7306_v23 = vpop.f32.mrf.mxu1  ;;  %v6999_v15 = vadd.f32 %v13075_v41, %v6609_v40  ;;  %v7002_v26 = vadd.f32 %v9649_v7, %v6612_v57  ;;  %v6956_v41 = vpop.f32.mrf.mxu0 }
 0x406   : > { %7516 = vst.msk [vmem:[%s12949_s22 + $0x80] sm:$0xff] %vm225_vm1, %v7484_v37  ;;  %v7487_v56 = vmax.f32 %v7455_v31, 0.0  ;;  %v7454_v16 = vadd.f32 %v7422_v50, %v13755_v34  ;;  %v7425_v62 = vadd.f32 %v12927_v47, %v7386_v8  ;;  %v7385_v36 = vadd.f32 %v7306_v23, %v6995_v39  ;;  %v13768_v39 = vld [vmem:[#allocation124_spill] sm:$0xff]  ;;  %v13770_v37 = vld [vmem:[#allocation95_spill] sm:$0xff]  ;;  %v13771_v8 = vld [vmem:[#allocation34_spill] sm:$0xff] }
 0x407   : > { %v9693_v54 = vpop.f32.mrf.mxu1  ;;  %v6222_v22 = vadd.f32 %v13769_v59, %v13768_v39  ;;  %v6614_v21 = vadd.f32 %v13770_v37, %v6223_v3  ;;  %v7001_v23 = vadd.f32 %v6946_v9, %v6611_v25  ;;  %v13781_v25 = vld [vmem:[#allocation42_spill] sm:$0xff]  ;;  %v13783_v37 = vld [vmem:[#allocation52_spill] sm:$0xff] }
 0x408   : > { %7519 = vst.msk [vmem:[%s12949_s22 + $0x98] sm:$0xff] %vm225_vm1, %v7487_v56  ;;  %v7486_v0 = vmax.f32 %v7454_v16, 0.0  ;;  %v7457_v24 = vadd.f32 %v7425_v62, %v13759_v63  ;;  %v7424_v44 = vadd.f32 %v12927_v47, %v7385_v36  ;;  %v7388_v33 = vadd.f32 %v9693_v54, %v6998_v60  ;;  %v13772_v60 = vld [vmem:[#allocation89_spill] sm:$0xff]  ;;  %v13774_v56 = vld [vmem:[#allocation131_spill] sm:$0xff]  ;;  %v9655_v16 = vpop.f32.mrf.mxu0 }
 0x409   : > { %v7316_v52 = vpop.f32.mrf.mxu1  ;;  %v6225_v14 = vadd.f32 %v13773_v5, %v13772_v60  ;;  %v6613_v34 = vadd.f32 %v13774_v56, %v6222_v22  ;;  %v13775_v36 = vld [vmem:[#allocation37_spill] sm:$0xff]  ;;  %v7004_v54 = vadd.f32 %v9652_v20, %v6614_v21 }
 0x40a   : > { %7518 = vst.msk [vmem:[%s12949_s22 + $0x90] sm:$0xff] %vm225_vm1, %v7486_v0  ;;  %v7489_v48 = vmax.f32 %v7457_v24, 0.0  ;;  %v7456_v45 = vadd.f32 %v7424_v44, %v13763_v51  ;;  %v7427_v30 = vadd.f32 %v12927_v47, %v7388_v33  ;;  %v7387_v28 = vadd.f32 %v7316_v52, %v6997_v18  ;;  %v13776_v18 = vld [vmem:[#allocation54_spill] sm:$0xff]  ;;  %v13778_v24 = vld [vmem:[#allocation36_spill] sm:$0xff]  ;;  %v6966_v4 = vpop.f32.mrf.mxu0 }
 0x40b   : > { %v9696_v6 = vpop.f32.mrf.mxu1  ;;  %v6224_v40 = vadd.f32 %v13777_v46, %v13776_v18  ;;  %v6616_v0 = vadd.f32 %v12912_v19, %v6225_v14  ;;  %v7003_v55 = vadd.f32 %v6956_v41, %v6613_v34  ;;  %v13779_v19 = vld [vmem:[#allocation39_spill] sm:$0xff] }
 0x40c   : > { %7521 = vst.msk [vmem:[%s12949_s22 + $0xa8] sm:$0xff] %vm225_vm1, %v7489_v48  ;;  %v7488_v12 = vmax.f32 %v7456_v45, 0.0  ;;  %v7459_v13 = vadd.f32 %v7427_v30, %v13767_v58  ;;  %v7426_v29 = vadd.f32 %v12927_v47, %v7387_v28  ;;  %v7390_v35 = vadd.f32 %v9696_v6, %v7000_v1  ;;  %v13780_v28 = vld [vmem:[#allocation38_spill] sm:$0xff] }
 0x40d   : > { %v7326_v31 = vpop.f32.mrf.mxu1  ;;  %v6615_v10 = vadd.f32 %v12916_v2, %v6224_v40  ;;  %v7006_v51 = vadd.f32 %v9655_v16, %v6616_v0 }
 0x40e   : > { %7520 = vst.msk [vmem:[%s12949_s22 + $0xa0] sm:$0xff] %vm225_vm1, %v7488_v12  ;;  %v7491_v50 = vmax.f32 %v7459_v13, 0.0  ;;  %v7458_v43 = vadd.f32 %v7426_v29, %v13771_v8  ;;  %v7429_v49 = vadd.f32 %v12927_v47, %v7390_v35  ;;  %v7389_v11 = vadd.f32 %v7326_v31, %v6999_v15  ;;  %v13782_v35 = vld [vmem:[#allocation41_spill] sm:$0xff] }
 0x40f   : > { %v9699_v7 = vpop.f32.mrf.mxu1  ;;  %v7005_v3 = vadd.f32 %v6966_v4, %v6615_v10 }
 0x410   : > { %7523 = vst.msk [vmem:[%s12949_s22 + $0xb8] sm:$0xff] %vm225_vm1, %v7491_v50  ;;  %v7490_v62 = vmax.f32 %v7458_v43, 0.0  ;;  %v7461_v17 = vadd.f32 %v7429_v49, %v13775_v36  ;;  %v7428_v42 = vadd.f32 %v12927_v47, %v7389_v11  ;;  %v7392_v53 = vadd.f32 %v9699_v7, %v7002_v26  ;;  %v13784_v50 = vld [vmem:[#allocation51_spill] sm:$0xff] }
 0x411   : > { %v7336_v9 = vpop.f32.mrf.mxu1 }
 0x412   : > { %7522 = vst.msk [vmem:[%s12949_s22 + $0xb0] sm:$0xff] %vm225_vm1, %v7490_v62  ;;  %v7493_v63 = vmax.f32 %v7461_v17, 0.0  ;;  %v7460_v44 = vadd.f32 %v7428_v42, %v13778_v24  ;;  %v7431_v33 = vadd.f32 %v12927_v47, %v7392_v53  ;;  %v7391_v38 = vadd.f32 %v7336_v9, %v7001_v23 }
 0x413   : > { %v9702_v1 = vpop.f32.mrf.mxu1 }
 0x414   : > { %7525 = vst.msk [vmem:[%s12949_s22 + $0xc8] sm:$0xff] %vm225_vm1, %v7493_v63  ;;  %v7492_v57 = vmax.f32 %v7460_v44, 0.0  ;;  %v7463_v52 = vadd.f32 %v7431_v33, %v13779_v19  ;;  %v7430_v20 = vadd.f32 %v12927_v47, %v7391_v38  ;;  %v7394_v48 = vadd.f32 %v9702_v1, %v7004_v54 }
 0x415   : > { %v7346_v45 = vpop.f32.mrf.mxu1 }
 0x416   : > { %7524 = vst.msk [vmem:[%s12949_s22 + $0xc0] sm:$0xff] %vm225_vm1, %v7492_v57  ;;  %v7495_v30 = vmax.f32 %v7463_v52, 0.0  ;;  %v7462_v27 = vadd.f32 %v7430_v20, %v13780_v28  ;;  %v7433_v2 = vadd.f32 %v12927_v47, %v7394_v48  ;;  %v7393_v32 = vadd.f32 %v7346_v45, %v7003_v55 }
 0x417   : > { %v9705_v15 = vpop.f32.mrf.mxu1 }
 0x418   : > { %7527 = vst.msk [vmem:[%s12949_s22 + $0xd8] sm:$0xff] %vm225_vm1, %v7495_v30  ;;  %v7494_v61 = vmax.f32 %v7462_v27, 0.0  ;;  %v7465_v6 = vadd.f32 %v7433_v2, %v13781_v25  ;;  %v7432_v12 = vadd.f32 %v12927_v47, %v7393_v32  ;;  %v7396_v58 = vadd.f32 %v9705_v15, %v7006_v51 }
 0x419   : > { %v7356_v13 = vpop.f32.mrf.mxu1 }
 0x41a   : > { %7526 = vst.msk [vmem:[%s12949_s22 + $0xd0] sm:$0xff] %vm225_vm1, %v7494_v61  ;;  %v7497_v29 = vmax.f32 %v7465_v6, 0.0  ;;  %v7464_v39 = vadd.f32 %v7432_v12, %v13782_v35  ;;  %v7435_v59 = vadd.f32 %v12927_v47, %v7396_v58  ;;  %v7395_v22 = vadd.f32 %v7356_v13, %v7005_v3 }
 0x41c   : > { %7529 = vst.msk [vmem:[%s12949_s22 + $0xe8] sm:$0xff] %vm225_vm1, %v7497_v29  ;;  %v7496_v26 = vmax.f32 %v7464_v39, 0.0  ;;  %v7467_v21 = vadd.f32 %v7435_v59, %v13783_v37  ;;  %v7434_v31 = vadd.f32 %v12927_v47, %v7395_v22 }
 0x41e   : > { %7528 = vst.msk [vmem:[%s12949_s22 + $0xe0] sm:$0xff] %vm225_vm1, %v7496_v26  ;;  %v7499_v41 = vmax.f32 %v7467_v21, 0.0  ;;  %v7466_v8 = vadd.f32 %v7434_v31, %v13784_v50 }
 0x420   : > { %7531 = vst.msk [vmem:[%s12949_s22 + $0xf8] sm:$0xff] %vm225_vm1, %v7499_v41  ;;  %v7498_v43 = vmax.f32 %v7466_v8, 0.0 }
 0x422   : > { %7530 = vst.msk [vmem:[%s12949_s22 + $0xf0] sm:$0xff] %vm225_vm1, %v7498_v43 }
 0x423 PF: > { %s15_s18 = sadd.s32 1, %s9721_s18  }
 0x424   : > { %p12_p4 = scmp.ge.s32.totalorder %s15_s18, 4  }
 0x426   :  { %14 = sbr.rel (!%p12_p4) target bundleno = 1 (0x1), region = 90 }

</bundles_post_ra>
